<compile_context>
chip_gen: v7x
topology: tpu7x:2x2x1
jax: 0.10.0
libtpu: 0.0.40
codegen_flags: <defaults>
</compile_context>

<pallas_src>
import jax
import jax.numpy as jnp
from jax.experimental import pallas as pl
from jax.experimental.pallas import tpu as pltpu

LEAKY_SLOPE = 0.01          # nn.LeakyReLU() default negative_slope
BN_EPS = 1e-5
_W0 = 7                     # halo column; interior store starts at sublane offset 8
_VMEM_LIMIT = 64 * 1024 * 1024


def _round_up(v, m):
    return ((v + m - 1) // m) * m


# ----------------------------- in-kernel helpers -----------------------------

def _zero_halo(pad_ref):
    """Zero only the 1-pixel halo ring of the (Hp+2, Wp+9, C) pad scratch."""
    Hq, Wq, C = pad_ref.shape
    Hp, Wp = Hq - 2, Wq - 9
    dt = pad_ref.dtype
    pad_ref[0:1, :, :] = jnp.zeros((1, Wq, C), dt)                       # top row
    pad_ref[Hp + 1:Hp + 2, :, :] = jnp.zeros((1, Wq, C), dt)             # bottom row
    pad_ref[1:Hp + 1, _W0:_W0 + 1, :] = jnp.zeros((Hp, 1, C), dt)        # left col
    pad_ref[1:Hp + 1, _W0 + Wp + 1:_W0 + Wp + 2, :] = jnp.zeros((Hp, 1, C), dt)  # right col


def _conv3x3_from_padded(pad_ref, w_ref):
    """3x3 conv via im2col on the zero-halo bf16 VMEM scratch.

    pad_ref: (Hp+2, Wp+9, Cin) bf16, image interior at [1:Hp+1, 8:Wp+8, :]
    w_ref:   (9*Cin, Cp) bf16, tap order (ky, kx, cin)
    returns: (Hp*Wp, Cp) f32 accumulator (single MXU matmul, K = 9*Cin)
    """
    Hq, Wq, _ = pad_ref.shape
    Hp, Wp = Hq - 2, Wq - 9
    taps = [pad_ref[ky:ky + Hp, _W0 + kx:_W0 + kx + Wp, :]
            for ky in range(3) for kx in range(3)]
    patch = jnp.concatenate(taps, axis=-1)                  # (Hp, Wp, 9*Cin) bf16
    slab = patch.reshape(Hp * Wp, patch.shape[-1])          # im2col slab
    return jnp.dot(slab, w_ref[...], preferred_element_type=jnp.float32)


# ------------------------------ Pallas kernels -------------------------------

def _pool_conv_stats_kernel(x_ref, w_ref, y_ref, s_ref, q_ref, pad_ref):
    # x_ref: (Hp, 2, Wp, 2*Cin) bf16 -- free metadata-reshape of one image so the
    #        2x2 max-pool is two slice-max ops (no strided/5D reshapes).
    # y_ref: (1, Hp, Wp, Cp) bf16 conv1 output (pre-BN), lane-dense.
    # s_ref/q_ref: (1, 1, Cp) f32 per-image channel sum / sum of squares.
    Hp, _, Wp, C2 = x_ref.shape
    Cin = C2 // 2

    r0 = x_ref[:, 0, :, :]                                  # rows 2h
    r1 = x_ref[:, 1, :, :]                                  # rows 2h+1
    m = jnp.maximum(r0, r1)                                 # (Hp, Wp, 2*Cin)
    pooled = jnp.maximum(m[:, :, :Cin], m[:, :, Cin:])      # cols 2w vs 2w+1 (bf16)

    _zero_halo(pad_ref)                                     # halo ring only
    pad_ref[1:Hp + 1, _W0 + 1:_W0 + 1 + Wp, :] = pooled     # sublane-aligned store

    acc = _conv3x3_from_padded(pad_ref, w_ref)              # (Hp*Wp, Cp) f32
    y_ref[0] = acc.reshape(Hp, Wp, -1).astype(y_ref.dtype)
    s_ref[0] = jnp.sum(acc, axis=0, keepdims=True)
    q_ref[0] = jnp.sum(acc * acc, axis=0, keepdims=True)


def _bn_lrelu_conv_stats_kernel(y_ref, ss_ref, w_ref, z_ref, s_ref, q_ref, pad_ref):
    # y_ref:  (1, Hp, Wp, Cp1) bf16 conv1 pre-BN output
    # ss_ref: (2, Cp1) f32 -- row 0 = BN1 scale, row 1 = BN1 shift
    # w_ref:  (9*C1, Cp2) bf16
    _, Hp, Wp, _ = y_ref.shape
    C1 = w_ref.shape[0] // 9                                # real channel count

    a = y_ref[0, :, :, :C1].astype(jnp.float32)
    a = a * ss_ref[0:1, :C1] + ss_ref[1:2, :C1]             # BN1 affine (f32)
    a = jnp.where(a >= 0.0, a, LEAKY_SLOPE * a)             # LeakyReLU

    _zero_halo(pad_ref)
    pad_ref[1:Hp + 1, _W0 + 1:_W0 + 1 + Wp, :] = a.astype(pad_ref.dtype)

    acc = _conv3x3_from_padded(pad_ref, w_ref)              # (Hp*Wp, Cp2) f32
    z_ref[0] = acc.reshape(Hp, Wp, -1).astype(z_ref.dtype)
    s_ref[0] = jnp.sum(acc, axis=0, keepdims=True)
    q_ref[0] = jnp.sum(acc * acc, axis=0, keepdims=True)


def _bn_lrelu_out_kernel(z_ref, ss_ref, o_ref):
    # BN2 affine + LeakyReLU; channel slice + f32 cast folded into the output.
    C = o_ref.shape[-1]
    y = z_ref[0, :, :, :C].astype(jnp.float32) * ss_ref[0:1, :C] + ss_ref[1:2, :C]
    o_ref[0] = jnp.where(y >= 0.0, y, LEAKY_SLOPE * y)


# ------------------------------ pallas wrappers -------------------------------

def pool_conv_stats(x, w9):
    """maxpool2x2 + conv3x3(pad=1) + per-image BN partial sums."""
    N, H, W, Cin = x.shape
    Hp, Wp = H // 2, W // 2
    Cp = w9.shape[1]
    # free metadata reshape: (N, H, W, Cin) -> (N*Hp, 2, Wp, 2*Cin)
    xr = x.reshape(N * Hp, 2, Wp, 2 * Cin)
    return pl.pallas_call(
        _pool_conv_stats_kernel,
        out_shape=(
            jax.ShapeDtypeStruct((N, Hp, Wp, Cp), jnp.bfloat16),
            jax.ShapeDtypeStruct((N, 1, Cp), jnp.float32),
            jax.ShapeDtypeStruct((N, 1, Cp), jnp.float32),
        ),
        grid=(N,),
        in_specs=[
            pl.BlockSpec((Hp, 2, Wp, 2 * Cin), lambda n: (n, 0, 0, 0)),
            pl.BlockSpec(w9.shape, lambda n: (0, 0)),       # constant index map: DMA'd once
        ],
        out_specs=(
            pl.BlockSpec((1, Hp, Wp, Cp), lambda n: (n, 0, 0, 0)),
            pl.BlockSpec((1, 1, Cp), lambda n: (n, 0, 0)),
            pl.BlockSpec((1, 1, Cp), lambda n: (n, 0, 0)),
        ),
        scratch_shapes=[pltpu.VMEM((Hp + 2, Wp + 9, Cin), jnp.bfloat16)],
        compiler_params=pltpu.CompilerParams(
            dimension_semantics=("parallel",),
            vmem_limit_bytes=_VMEM_LIMIT),
    )(xr, w9)


def bn_lrelu_conv_stats(y1, ss1, w9):
    """BN1 affine + LeakyReLU + conv3x3(pad=1) + BN2 partial sums."""
    N, Hp, Wp, Cp1 = y1.shape
    Cp2 = w9.shape[1]
    C1 = w9.shape[0] // 9
    return pl.pallas_call(
        _bn_lrelu_conv_stats_kernel,
        out_shape=(
            jax.ShapeDtypeStruct((N, Hp, Wp, Cp2), jnp.bfloat16),
            jax.ShapeDtypeStruct((N, 1, Cp2), jnp.float32),
            jax.ShapeDtypeStruct((N, 1, Cp2), jnp.float32),
        ),
        grid=(N,),
        in_specs=[
            pl.BlockSpec((1, Hp, Wp, Cp1), lambda n: (n, 0, 0, 0)),
            pl.BlockSpec((2, Cp1), lambda n: (0, 0)),
            pl.BlockSpec(w9.shape, lambda n: (0, 0)),
        ],
        out_specs=(
            pl.BlockSpec((1, Hp, Wp, Cp2), lambda n: (n, 0, 0, 0)),
            pl.BlockSpec((1, 1, Cp2), lambda n: (n, 0, 0)),
            pl.BlockSpec((1, 1, Cp2), lambda n: (n, 0, 0)),
        ),
        scratch_shapes=[pltpu.VMEM((Hp + 2, Wp + 9, C1), jnp.bfloat16)],
        compiler_params=pltpu.CompilerParams(
            dimension_semantics=("parallel",),
            vmem_limit_bytes=_VMEM_LIMIT),
    )(y1, ss1, w9)


def bn_lrelu_out(z, ss, c_out):
    """Final BN affine + LeakyReLU; emits channel-sliced f32 NHWC output."""
    N, Hp, Wp, Cp = z.shape
    return pl.pallas_call(
        _bn_lrelu_out_kernel,
        out_shape=jax.ShapeDtypeStruct((N, Hp, Wp, c_out), jnp.float32),
        grid=(N,),
        in_specs=[
            pl.BlockSpec((1, Hp, Wp, Cp), lambda n: (n, 0, 0, 0)),
            pl.BlockSpec((2, Cp), lambda n: (0, 0)),
        ],
        out_specs=pl.BlockSpec((1, Hp, Wp, c_out), lambda n: (n, 0, 0, 0)),
        compiler_params=pltpu.CompilerParams(
            dimension_semantics=("parallel",),
            vmem_limit_bytes=_VMEM_LIMIT),
    )(z, ss)


# ------------------------------- JAX glue -------------------------------------

def affine_from_stats(ssum, ssq, count, gamma, beta, eps=BN_EPS):
    """Fold batch-BN (training mode, biased var) into per-channel scale/shift."""
    Cp = ssum.shape[-1]
    C = gamma.shape[0]
    s = jnp.sum(ssum, axis=(0, 1))[:C]
    q = jnp.sum(ssq, axis=(0, 1))[:C]
    mean = s / count
    var = jnp.maximum(q / count - mean * mean, 0.0)
    scale = gamma / jnp.sqrt(var + eps)
    shift = beta - mean * scale
    scale = jnp.pad(scale, (0, Cp - C))    # padded channels stay exactly zero
    shift = jnp.pad(shift, (0, Cp - C))
    return jnp.stack([scale, shift], axis=0)                # (2, Cp) f32


# ------------------------- parameter construction -----------------------------

def _prep_conv3x3(key, cin, cout, cpad):
    # Conv bias omitted on purpose: a per-channel constant before training-mode
    # BatchNorm is exactly cancelled by the mean subtraction (output identical).
    w = jax.random.normal(key, (3, 3, cin, cout), jnp.float32) / jnp.sqrt(9.0 * cin)
    return jnp.pad(w.reshape(9 * cin, cout),
                   ((0, 0), (0, cpad - cout))).astype(jnp.bfloat16)


def init_downblock(key, in_channels, out_channels, dropout_p=0.0):
    cpad = _round_up(out_channels, 128)                     # lane-dense channels
    k1, k2 = jax.random.split(key)
    return dict(
        w1=_prep_conv3x3(k1, in_channels, out_channels, cpad),
        g1=jnp.ones((out_channels,), jnp.float32),
        be1=jnp.zeros((out_channels,), jnp.float32),
        w2=_prep_conv3x3(k2, out_channels, out_channels, cpad),
        g2=jnp.ones((out_channels,), jnp.float32),
        be2=jnp.zeros((out_channels,), jnp.float32),
        dropout_p=float(dropout_p),
    )


# -------------------------------- forward -------------------------------------

def downblock_forward(x_nchw, params):
    """DownBlock forward. x_nchw: (N, Cin, H, W) f32 -> (N, Cout, H//2, W//2) f32."""
    # bf16 cast BEFORE the layout transpose: halves the largest HBM pass; the conv
    # operand is bf16 anyway and rounding commutes with the max-pool.
    x = jnp.transpose(x_nchw.astype(jnp.bfloat16), (0, 2, 3, 1))      # NHWC bf16
    N, H, W, _ = x.shape
    x = x[:, :(H // 2) * 2, :(W // 2) * 2, :]                         # MaxPool floor
    Hp, Wp = H // 2, W // 2
    count = N * Hp * Wp

    # maxpool + conv1 + BN1 partial stats (one fused pallas_call)
    y1, s1, q1 = pool_conv_stats(x, params['w1'])
    ss1 = affine_from_stats(s1, q1, count, params['g1'], params['be1'])

    # TODO(synk): dropout_p > 0 (training-mode dropout between the two convs) not
    # implemented; the reference test uses dropout_p = 0.0 (identity).

    # BN1 + LeakyReLU + conv2 + BN2 partial stats (one fused pallas_call)
    y2, s2, q2 = bn_lrelu_conv_stats(y1, ss1, params['w2'])
    ss2 = affine_from_stats(s2, q2, count, params['g2'], params['be2'])

    # BN2 + LeakyReLU, channel slice + f32 cast done in-kernel
    c_out = params['g2'].shape[0]
    out = bn_lrelu_out(y2, ss2, c_out)                                # (N,Hp,Wp,Cout) f32
    # TODO(synk): the NHWC->NCHW transpose could also be folded into kernel 3 (or
    # the NHWC layout kept downstream) to drop this last XLA relayout pass.
    return jnp.transpose(out, (0, 3, 1, 2))                           # NCHW


# ---------------------------------- main ---------------------------------------

if __name__ == "__main__":
    key = jax.random.PRNGKey(0)
    k_param, k_x = jax.random.split(key)

    in_channels, out_channels = 4, 8
    N, H, W = 2, 16, 16

    params = init_downblock(k_param, in_channels, out_channels, dropout_p=0.0)
    x = jax.random.normal(k_x, (N, in_channels, H, W), jnp.float32)

    fwd = jax.jit(lambda inp: downblock_forward(inp, params))
    out = jax.block_until_ready(fwd(x))

    assert out.shape == (N, out_channels, H // 2, W // 2), out.shape
    assert bool(jnp.all(jnp.isfinite(out)))
    print("KERNEL_OK")
</pallas_src>

<mosaic_0001>
module attributes {stable_mosaic.version = 11 : i64} {
  func.func @_pool_conv_stats_kernel(%arg0: i32, %arg1: memref<8x2x8x8xbf16, #tpu.memory_space<vmem>>, %arg2: memref<36x128xbf16, #tpu.memory_space<vmem>>, %arg3: memref<1x8x8x128xbf16, #tpu.memory_space<vmem>>, %arg4: memref<1x1x128xf32, #tpu.memory_space<vmem>>, %arg5: memref<1x1x128xf32, #tpu.memory_space<vmem>>, %arg6: memref<10x17x4xbf16, #tpu.memory_space<vmem>>) attributes {dimension_semantics = [#tpu.dimension_semantics<parallel>], iteration_bounds = array<i64: 2>, scalar_prefetch = 0 : i64, scratch_operands = 1 : i64, tpu.core_type = #tpu.core_type<tc>, window_params = [{transform_indices = @transform_0, window_bounds = array<i64: 8, 2, 8, 8>}, {pipeline_mode = #tpu.pipeline_mode<synchronous>, transform_indices = @transform_1, window_bounds = array<i64: 36, 128>}, {transform_indices = @transform_2, window_bounds = array<i64: 1, 8, 8, 128>}, {transform_indices = @transform_3, window_bounds = array<i64: 1, 1, 128>}, {transform_indices = @transform_4, window_bounds = array<i64: 1, 1, 128>}]} {
    %c0 = arith.constant 0 : index
    %c0_0 = arith.constant 0 : index
    %c0_1 = arith.constant 0 : index
    %c0_2 = arith.constant 0 : index
    %0 = vector.load %arg1[%c0, %c0_0, %c0_1, %c0_2] : memref<8x2x8x8xbf16, #tpu.memory_space<vmem>>, vector<8x1x8x8xbf16>
    %1 = vector.shape_cast %0 : vector<8x1x8x8xbf16> to vector<8x8x8xbf16>
    %c0_3 = arith.constant 0 : index
    %c1 = arith.constant 1 : index
    %c0_4 = arith.constant 0 : index
    %c0_5 = arith.constant 0 : index
    %2 = vector.load %arg1[%c0_3, %c1, %c0_4, %c0_5] : memref<8x2x8x8xbf16, #tpu.memory_space<vmem>>, vector<8x1x8x8xbf16>
    %3 = vector.shape_cast %2 : vector<8x1x8x8xbf16> to vector<8x8x8xbf16>
    %4 = arith.maximumf %1, %3 : vector<8x8x8xbf16>
    %5 = vector.extract_strided_slice %4 {offsets = [0, 0, 0], sizes = [8, 8, 4], strides = [1, 1, 1]} : vector<8x8x8xbf16> to vector<8x8x4xbf16>
    %6 = vector.extract_strided_slice %4 {offsets = [0, 0, 4], sizes = [8, 8, 4], strides = [1, 1, 1]} : vector<8x8x8xbf16> to vector<8x8x4xbf16>
    %7 = arith.maximumf %5, %6 : vector<8x8x4xbf16>
    %cst = arith.constant 0.000000e+00 : bf16
    %8 = vector.broadcast %cst : bf16 to vector<1x17x4xbf16>
    %c0_6 = arith.constant 0 : index
    %c0_7 = arith.constant 0 : index
    %c0_8 = arith.constant 0 : index
    %9 = vector.load %arg6[%c0_6, %c0_7, %c0_8] : memref<10x17x4xbf16, #tpu.memory_space<vmem>>, vector<1x17x4xbf16>
    tpu.vector_store %arg6[%c0_6, %c0_7, %c0_8], %8 {strides = array<i32>} : memref<10x17x4xbf16, #tpu.memory_space<vmem>>, vector<1x17x4xbf16>,
    %cst_9 = arith.constant 0.000000e+00 : bf16
    %10 = vector.broadcast %cst_9 : bf16 to vector<1x17x4xbf16>
    %c9 = arith.constant 9 : index
    %c0_10 = arith.constant 0 : index
    %c0_11 = arith.constant 0 : index
    %11 = vector.load %arg6[%c9, %c0_10, %c0_11] : memref<10x17x4xbf16, #tpu.memory_space<vmem>>, vector<1x17x4xbf16>
    tpu.vector_store %arg6[%c9, %c0_10, %c0_11], %10 {strides = array<i32>} : memref<10x17x4xbf16, #tpu.memory_space<vmem>>, vector<1x17x4xbf16>,
    %cst_12 = arith.constant 0.000000e+00 : bf16
    %12 = vector.broadcast %cst_12 : bf16 to vector<8x1x4xbf16>
    %c1_13 = arith.constant 1 : index
    %c7 = arith.constant 7 : index
    %c0_14 = arith.constant 0 : index
    %13 = vector.load %arg6[%c1_13, %c7, %c0_14] : memref<10x17x4xbf16, #tpu.memory_space<vmem>>, vector<8x1x4xbf16>
    tpu.vector_store %arg6[%c1_13, %c7, %c0_14], %12 {strides = array<i32>} : memref<10x17x4xbf16, #tpu.memory_space<vmem>>, vector<8x1x4xbf16>,
    %cst_15 = arith.constant 0.000000e+00 : bf16
    %14 = vector.broadcast %cst_15 : bf16 to vector<8x1x4xbf16>
    %c1_16 = arith.constant 1 : index
    %c16 = arith.constant 16 : index
    %c0_17 = arith.constant 0 : index
    %15 = vector.load %arg6[%c1_16, %c16, %c0_17] : memref<10x17x4xbf16, #tpu.memory_space<vmem>>, vector<8x1x4xbf16>
    tpu.vector_store %arg6[%c1_16, %c16, %c0_17], %14 {strides = array<i32>} : memref<10x17x4xbf16, #tpu.memory_space<vmem>>, vector<8x1x4xbf16>,
    %c1_18 = arith.constant 1 : index
    %c8 = arith.constant 8 : index
    %c0_19 = arith.constant 0 : index
    %16 = vector.load %arg6[%c1_18, %c8, %c0_19] : memref<10x17x4xbf16, #tpu.memory_space<vmem>>, vector<8x8x4xbf16>
    tpu.vector_store %arg6[%c1_18, %c8, %c0_19], %7 {strides = array<i32>} : memref<10x17x4xbf16, #tpu.memory_space<vmem>>, vector<8x8x4xbf16>,
    %c0_20 = arith.constant 0 : index
    %c7_21 = arith.constant 7 : index
    %c0_22 = arith.constant 0 : index
    %17 = vector.load %arg6[%c0_20, %c7_21, %c0_22] : memref<10x17x4xbf16, #tpu.memory_space<vmem>>, vector<8x8x4xbf16>
    %c0_23 = arith.constant 0 : index
    %c8_24 = arith.constant 8 : index
    %c0_25 = arith.constant 0 : index
    %18 = vector.load %arg6[%c0_23, %c8_24, %c0_25] : memref<10x17x4xbf16, #tpu.memory_space<vmem>>, vector<8x8x4xbf16>
    %c0_26 = arith.constant 0 : index
    %c9_27 = arith.constant 9 : index
    %c0_28 = arith.constant 0 : index
    %19 = vector.load %arg6[%c0_26, %c9_27, %c0_28] : memref<10x17x4xbf16, #tpu.memory_space<vmem>>, vector<8x8x4xbf16>
    %c1_29 = arith.constant 1 : index
    %c7_30 = arith.constant 7 : index
    %c0_31 = arith.constant 0 : index
    %20 = vector.load %arg6[%c1_29, %c7_30, %c0_31] : memref<10x17x4xbf16, #tpu.memory_space<vmem>>, vector<8x8x4xbf16>
    %c1_32 = arith.constant 1 : index
    %c8_33 = arith.constant 8 : index
    %c0_34 = arith.constant 0 : index
    %21 = vector.load %arg6[%c1_32, %c8_33, %c0_34] : memref<10x17x4xbf16, #tpu.memory_space<vmem>>, vector<8x8x4xbf16>
    %c1_35 = arith.constant 1 : index
    %c9_36 = arith.constant 9 : index
    %c0_37 = arith.constant 0 : index
    %22 = vector.load %arg6[%c1_35, %c9_36, %c0_37] : memref<10x17x4xbf16, #tpu.memory_space<vmem>>, vector<8x8x4xbf16>
    %c2 = arith.constant 2 : index
    %c7_38 = arith.constant 7 : index
    %c0_39 = arith.constant 0 : index
    %23 = vector.load %arg6[%c2, %c7_38, %c0_39] : memref<10x17x4xbf16, #tpu.memory_space<vmem>>, vector<8x8x4xbf16>
    %c2_40 = arith.constant 2 : index
    %c8_41 = arith.constant 8 : index
    %c0_42 = arith.constant 0 : index
    %24 = vector.load %arg6[%c2_40, %c8_41, %c0_42] : memref<10x17x4xbf16, #tpu.memory_space<vmem>>, vector<8x8x4xbf16>
    %c2_43 = arith.constant 2 : index
    %c9_44 = arith.constant 9 : index
    %c0_45 = arith.constant 0 : index
    %25 = vector.load %arg6[%c2_43, %c9_44, %c0_45] : memref<10x17x4xbf16, #tpu.memory_space<vmem>>, vector<8x8x4xbf16>
    %26 = tpu.concatenate %17, %18, %19, %20, %21, %22, %23, %24, %25 in 2 : vector<8x8x4xbf16>, vector<8x8x4xbf16>, vector<8x8x4xbf16>, vector<8x8x4xbf16>, vector<8x8x4xbf16>, vector<8x8x4xbf16>, vector<8x8x4xbf16>, vector<8x8x4xbf16>, vector<8x8x4xbf16> -> vector<8x8x36xbf16>
    %27 = vector.shape_cast %26 : vector<8x8x36xbf16> to vector<64x36xbf16>
    %c0_46 = arith.constant 0 : index
    %c0_47 = arith.constant 0 : index
    %28 = vector.load %arg2[%c0_46, %c0_47] : memref<36x128xbf16, #tpu.memory_space<vmem>>, vector<36x128xbf16>
    %cst_48 = arith.constant dense<0.000000e+00> : vector<64x128xf32>
    %29 = tpu.matmul %27, %28, %cst_48 {dimension_numbers = #tpu.dot_dimension_numbers<[1], [0], [0], [1], [0, 0, 1, 1], [], []>} : vector<64x36xbf16>, vector<36x128xbf16>, vector<64x128xf32> -> vector<64x128xf32>
    %30 = vector.shape_cast %29 : vector<64x128xf32> to vector<8x8x128xf32>
    %31 = arith.truncf %30 : vector<8x8x128xf32> to vector<8x8x128xbf16>
    %c0_49 = arith.constant 0 : index
    %c0_50 = arith.constant 0 : index
    %c0_51 = arith.constant 0 : index
    %c0_52 = arith.constant 0 : index
    %32 = vector.load %arg3[%c0_49, %c0_50, %c0_51, %c0_52] : memref<1x8x8x128xbf16, #tpu.memory_space<vmem>>, vector<1x8x8x128xbf16>
    %33 = vector.shape_cast %32 : vector<1x8x8x128xbf16> to vector<8x8x128xbf16>
    %34 = vector.shape_cast %31 : vector<8x8x128xbf16> to vector<1x8x8x128xbf16>
    tpu.vector_store %arg3[%c0_49, %c0_50, %c0_51, %c0_52], %34 {strides = array<i32>} : memref<1x8x8x128xbf16, #tpu.memory_space<vmem>>, vector<1x8x8x128xbf16>,
    %cst_53 = arith.constant dense<0.000000e+00> : vector<128xf32>
    %35 = vector.multi_reduction <add>, %29, %cst_53 [0] : vector<64x128xf32> to vector<128xf32>
    %36 = vector.shape_cast %35 : vector<128xf32> to vector<1x128xf32>
    %c0_54 = arith.constant 0 : index
    %c0_55 = arith.constant 0 : index
    %c0_56 = arith.constant 0 : index
    %37 = vector.load %arg4[%c0_54, %c0_55, %c0_56] : memref<1x1x128xf32, #tpu.memory_space<vmem>>, vector<1x1x128xf32>
    %38 = vector.shape_cast %37 : vector<1x1x128xf32> to vector<1x128xf32>
    %39 = vector.shape_cast %36 : vector<1x128xf32> to vector<1x1x128xf32>
    tpu.vector_store %arg4[%c0_54, %c0_55, %c0_56], %39 {strides = array<i32>} : memref<1x1x128xf32, #tpu.memory_space<vmem>>, vector<1x1x128xf32>,
    %40 = arith.mulf %29, %29 : vector<64x128xf32>
    %cst_57 = arith.constant dense<0.000000e+00> : vector<128xf32>
    %41 = vector.multi_reduction <add>, %40, %cst_57 [0] : vector<64x128xf32> to vector<128xf32>
    %42 = vector.shape_cast %41 : vector<128xf32> to vector<1x128xf32>
    %c0_58 = arith.constant 0 : index
    %c0_59 = arith.constant 0 : index
    %c0_60 = arith.constant 0 : index
    %43 = vector.load %arg5[%c0_58, %c0_59, %c0_60] : memref<1x1x128xf32, #tpu.memory_space<vmem>>, vector<1x1x128xf32>
    %44 = vector.shape_cast %43 : vector<1x1x128xf32> to vector<1x128xf32>
    %45 = vector.shape_cast %42 : vector<1x128xf32> to vector<1x1x128xf32>
    tpu.vector_store %arg5[%c0_58, %c0_59, %c0_60], %45 {strides = array<i32>} : memref<1x1x128xf32, #tpu.memory_space<vmem>>, vector<1x1x128xf32>,
    return
  }
  func.func @transform_0(%arg0: i32) -> (i32, i32, i32, i32) {
    %c0_i32 = arith.constant 0 : i32
    %c0_i32_0 = arith.constant 0 : i32
    %c0_i32_1 = arith.constant 0 : i32
    %c0_i32_2 = arith.constant 0 : i32
    return %arg0, %c0_i32, %c0_i32_0, %c0_i32_1 : i32, i32, i32, i32
  }
  func.func @transform_1(%arg0: i32) -> (i32, i32) {
    %c0_i32 = arith.constant 0 : i32
    %c0_i32_0 = arith.constant 0 : i32
    %c0_i32_1 = arith.constant 0 : i32
    return %c0_i32, %c0_i32_0 : i32, i32
  }
  func.func @transform_2(%arg0: i32) -> (i32, i32, i32, i32) {
    %c0_i32 = arith.constant 0 : i32
    %c0_i32_0 = arith.constant 0 : i32
    %c0_i32_1 = arith.constant 0 : i32
    %c0_i32_2 = arith.constant 0 : i32
    return %arg0, %c0_i32, %c0_i32_0, %c0_i32_1 : i32, i32, i32, i32
  }
  func.func @transform_3(%arg0: i32) -> (i32, i32, i32) {
    %c0_i32 = arith.constant 0 : i32
    %c0_i32_0 = arith.constant 0 : i32
    %c0_i32_1 = arith.constant 0 : i32
    return %arg0, %c0_i32, %c0_i32_0 : i32, i32, i32
  }
  func.func @transform_4(%arg0: i32) -> (i32, i32, i32) {
    %c0_i32 = arith.constant 0 : i32
    %c0_i32_0 = arith.constant 0 : i32
    %c0_i32_1 = arith.constant 0 : i32
    return %arg0, %c0_i32, %c0_i32_0 : i32, i32, i32
  }
}

module attributes {stable_mosaic.version = 11 : i64} {
  func.func @_bn_lrelu_conv_stats_kernel(%arg0: i32, %arg1: memref<1x8x8x128xbf16, #tpu.memory_space<vmem>>, %arg2: memref<2x128xf32, #tpu.memory_space<vmem>>, %arg3: memref<72x128xbf16, #tpu.memory_space<vmem>>, %arg4: memref<1x8x8x128xbf16, #tpu.memory_space<vmem>>, %arg5: memref<1x1x128xf32, #tpu.memory_space<vmem>>, %arg6: memref<1x1x128xf32, #tpu.memory_space<vmem>>, %arg7: memref<10x17x8xbf16, #tpu.memory_space<vmem>>) attributes {dimension_semantics = [#tpu.dimension_semantics<parallel>], iteration_bounds = array<i64: 2>, scalar_prefetch = 0 : i64, scratch_operands = 1 : i64, tpu.core_type = #tpu.core_type<tc>, window_params = [{transform_indices = @transform_0, window_bounds = array<i64: 1, 8, 8, 128>}, {pipeline_mode = #tpu.pipeline_mode<synchronous>, transform_indices = @transform_1, window_bounds = array<i64: 2, 128>}, {pipeline_mode = #tpu.pipeline_mode<synchronous>, transform_indices = @transform_2, window_bounds = array<i64: 72, 128>}, {transform_indices = @transform_3, window_bounds = array<i64: 1, 8, 8, 128>}, {transform_indices = @transform_4, window_bounds = array<i64: 1, 1, 128>}, {transform_indices = @transform_5, window_bounds = array<i64: 1, 1, 128>}]} {
    %c0 = arith.constant 0 : index
    %c0_0 = arith.constant 0 : index
    %c0_1 = arith.constant 0 : index
    %c0_2 = arith.constant 0 : index
    %0 = vector.load %arg1[%c0, %c0_0, %c0_1, %c0_2] : memref<1x8x8x128xbf16, #tpu.memory_space<vmem>>, vector<1x8x8x8xbf16>
    %1 = vector.shape_cast %0 : vector<1x8x8x8xbf16> to vector<8x8x8xbf16>
    %2 = arith.extf %1 : vector<8x8x8xbf16> to vector<8x8x8xf32>
    %c0_3 = arith.constant 0 : index
    %c0_4 = arith.constant 0 : index
    %3 = vector.load %arg2[%c0_3, %c0_4] : memref<2x128xf32, #tpu.memory_space<vmem>>, vector<1x8xf32>
    %4 = vector.shape_cast %3 : vector<1x8xf32> to vector<1x1x8xf32>
    %5 = vector.broadcast %4 : vector<1x1x8xf32> to vector<8x8x8xf32>
    %6 = arith.mulf %2, %5 : vector<8x8x8xf32>
    %c1 = arith.constant 1 : index
    %c0_5 = arith.constant 0 : index
    %7 = vector.load %arg2[%c1, %c0_5] : memref<2x128xf32, #tpu.memory_space<vmem>>, vector<1x8xf32>
    %8 = vector.shape_cast %7 : vector<1x8xf32> to vector<1x1x8xf32>
    %9 = vector.broadcast %8 : vector<1x1x8xf32> to vector<8x8x8xf32>
    %10 = arith.addf %6, %9 : vector<8x8x8xf32>
    %cst = arith.constant 0.000000e+00 : f32
    %11 = vector.broadcast %cst : f32 to vector<8x8x8xf32>
    %12 = arith.cmpf oge, %10, %11 : vector<8x8x8xf32>
    %cst_6 = arith.constant 0.00999999977 : f32
    %13 = vector.broadcast %cst_6 : f32 to vector<8x8x8xf32>
    %14 = arith.mulf %13, %10 : vector<8x8x8xf32>
    %15 = arith.select %12, %10, %14 : vector<8x8x8xi1>, vector<8x8x8xf32>
    %cst_7 = arith.constant 0.000000e+00 : bf16
    %16 = vector.broadcast %cst_7 : bf16 to vector<1x17x8xbf16>
    %c0_8 = arith.constant 0 : index
    %c0_9 = arith.constant 0 : index
    %c0_10 = arith.constant 0 : index
    %17 = vector.load %arg7[%c0_8, %c0_9, %c0_10] : memref<10x17x8xbf16, #tpu.memory_space<vmem>>, vector<1x17x8xbf16>
    tpu.vector_store %arg7[%c0_8, %c0_9, %c0_10], %16 {strides = array<i32>} : memref<10x17x8xbf16, #tpu.memory_space<vmem>>, vector<1x17x8xbf16>,
    %cst_11 = arith.constant 0.000000e+00 : bf16
    %18 = vector.broadcast %cst_11 : bf16 to vector<1x17x8xbf16>
    %c9 = arith.constant 9 : index
    %c0_12 = arith.constant 0 : index
    %c0_13 = arith.constant 0 : index
    %19 = vector.load %arg7[%c9, %c0_12, %c0_13] : memref<10x17x8xbf16, #tpu.memory_space<vmem>>, vector<1x17x8xbf16>
    tpu.vector_store %arg7[%c9, %c0_12, %c0_13], %18 {strides = array<i32>} : memref<10x17x8xbf16, #tpu.memory_space<vmem>>, vector<1x17x8xbf16>,
    %cst_14 = arith.constant 0.000000e+00 : bf16
    %20 = vector.broadcast %cst_14 : bf16 to vector<8x1x8xbf16>
    %c1_15 = arith.constant 1 : index
    %c7 = arith.constant 7 : index
    %c0_16 = arith.constant 0 : index
    %21 = vector.load %arg7[%c1_15, %c7, %c0_16] : memref<10x17x8xbf16, #tpu.memory_space<vmem>>, vector<8x1x8xbf16>
    tpu.vector_store %arg7[%c1_15, %c7, %c0_16], %20 {strides = array<i32>} : memref<10x17x8xbf16, #tpu.memory_space<vmem>>, vector<8x1x8xbf16>,
    %cst_17 = arith.constant 0.000000e+00 : bf16
    %22 = vector.broadcast %cst_17 : bf16 to vector<8x1x8xbf16>
    %c1_18 = arith.constant 1 : index
    %c16 = arith.constant 16 : index
    %c0_19 = arith.constant 0 : index
    %23 = vector.load %arg7[%c1_18, %c16, %c0_19] : memref<10x17x8xbf16, #tpu.memory_space<vmem>>, vector<8x1x8xbf16>
    tpu.vector_store %arg7[%c1_18, %c16, %c0_19], %22 {strides = array<i32>} : memref<10x17x8xbf16, #tpu.memory_space<vmem>>, vector<8x1x8xbf16>,
    %24 = arith.truncf %15 : vector<8x8x8xf32> to vector<8x8x8xbf16>
    %c1_20 = arith.constant 1 : index
    %c8 = arith.constant 8 : index
    %c0_21 = arith.constant 0 : index
    %25 = vector.load %arg7[%c1_20, %c8, %c0_21] : memref<10x17x8xbf16, #tpu.memory_space<vmem>>, vector<8x8x8xbf16>
    tpu.vector_store %arg7[%c1_20, %c8, %c0_21], %24 {strides = array<i32>} : memref<10x17x8xbf16, #tpu.memory_space<vmem>>, vector<8x8x8xbf16>,
    %c0_22 = arith.constant 0 : index
    %c7_23 = arith.constant 7 : index
    %c0_24 = arith.constant 0 : index
    %26 = vector.load %arg7[%c0_22, %c7_23, %c0_24] : memref<10x17x8xbf16, #tpu.memory_space<vmem>>, vector<8x8x8xbf16>
    %c0_25 = arith.constant 0 : index
    %c8_26 = arith.constant 8 : index
    %c0_27 = arith.constant 0 : index
    %27 = vector.load %arg7[%c0_25, %c8_26, %c0_27] : memref<10x17x8xbf16, #tpu.memory_space<vmem>>, vector<8x8x8xbf16>
    %c0_28 = arith.constant 0 : index
    %c9_29 = arith.constant 9 : index
    %c0_30 = arith.constant 0 : index
    %28 = vector.load %arg7[%c0_28, %c9_29, %c0_30] : memref<10x17x8xbf16, #tpu.memory_space<vmem>>, vector<8x8x8xbf16>
    %c1_31 = arith.constant 1 : index
    %c7_32 = arith.constant 7 : index
    %c0_33 = arith.constant 0 : index
    %29 = vector.load %arg7[%c1_31, %c7_32, %c0_33] : memref<10x17x8xbf16, #tpu.memory_space<vmem>>, vector<8x8x8xbf16>
    %c1_34 = arith.constant 1 : index
    %c8_35 = arith.constant 8 : index
    %c0_36 = arith.constant 0 : index
    %30 = vector.load %arg7[%c1_34, %c8_35, %c0_36] : memref<10x17x8xbf16, #tpu.memory_space<vmem>>, vector<8x8x8xbf16>
    %c1_37 = arith.constant 1 : index
    %c9_38 = arith.constant 9 : index
    %c0_39 = arith.constant 0 : index
    %31 = vector.load %arg7[%c1_37, %c9_38, %c0_39] : memref<10x17x8xbf16, #tpu.memory_space<vmem>>, vector<8x8x8xbf16>
    %c2 = arith.constant 2 : index
    %c7_40 = arith.constant 7 : index
    %c0_41 = arith.constant 0 : index
    %32 = vector.load %arg7[%c2, %c7_40, %c0_41] : memref<10x17x8xbf16, #tpu.memory_space<vmem>>, vector<8x8x8xbf16>
    %c2_42 = arith.constant 2 : index
    %c8_43 = arith.constant 8 : index
    %c0_44 = arith.constant 0 : index
    %33 = vector.load %arg7[%c2_42, %c8_43, %c0_44] : memref<10x17x8xbf16, #tpu.memory_space<vmem>>, vector<8x8x8xbf16>
    %c2_45 = arith.constant 2 : index
    %c9_46 = arith.constant 9 : index
    %c0_47 = arith.constant 0 : index
    %34 = vector.load %arg7[%c2_45, %c9_46, %c0_47] : memref<10x17x8xbf16, #tpu.memory_space<vmem>>, vector<8x8x8xbf16>
    %35 = tpu.concatenate %26, %27, %28, %29, %30, %31, %32, %33, %34 in 2 : vector<8x8x8xbf16>, vector<8x8x8xbf16>, vector<8x8x8xbf16>, vector<8x8x8xbf16>, vector<8x8x8xbf16>, vector<8x8x8xbf16>, vector<8x8x8xbf16>, vector<8x8x8xbf16>, vector<8x8x8xbf16> -> vector<8x8x72xbf16>
    %36 = vector.shape_cast %35 : vector<8x8x72xbf16> to vector<64x72xbf16>
    %c0_48 = arith.constant 0 : index
    %c0_49 = arith.constant 0 : index
    %37 = vector.load %arg3[%c0_48, %c0_49] : memref<72x128xbf16, #tpu.memory_space<vmem>>, vector<72x128xbf16>
    %cst_50 = arith.constant dense<0.000000e+00> : vector<64x128xf32>
    %38 = tpu.matmul %36, %37, %cst_50 {dimension_numbers = #tpu.dot_dimension_numbers<[1], [0], [0], [1], [0, 0, 1, 1], [], []>} : vector<64x72xbf16>, vector<72x128xbf16>, vector<64x128xf32> -> vector<64x128xf32>
    %39 = vector.shape_cast %38 : vector<64x128xf32> to vector<8x8x128xf32>
    %40 = arith.truncf %39 : vector<8x8x128xf32> to vector<8x8x128xbf16>
    %c0_51 = arith.constant 0 : index
    %c0_52 = arith.constant 0 : index
    %c0_53 = arith.constant 0 : index
    %c0_54 = arith.constant 0 : index
    %41 = vector.load %arg4[%c0_51, %c0_52, %c0_53, %c0_54] : memref<1x8x8x128xbf16, #tpu.memory_space<vmem>>, vector<1x8x8x128xbf16>
    %42 = vector.shape_cast %41 : vector<1x8x8x128xbf16> to vector<8x8x128xbf16>
    %43 = vector.shape_cast %40 : vector<8x8x128xbf16> to vector<1x8x8x128xbf16>
    tpu.vector_store %arg4[%c0_51, %c0_52, %c0_53, %c0_54], %43 {strides = array<i32>} : memref<1x8x8x128xbf16, #tpu.memory_space<vmem>>, vector<1x8x8x128xbf16>,
    %cst_55 = arith.constant dense<0.000000e+00> : vector<128xf32>
    %44 = vector.multi_reduction <add>, %38, %cst_55 [0] : vector<64x128xf32> to vector<128xf32>
    %45 = vector.shape_cast %44 : vector<128xf32> to vector<1x128xf32>
    %c0_56 = arith.constant 0 : index
    %c0_57 = arith.constant 0 : index
    %c0_58 = arith.constant 0 : index
    %46 = vector.load %arg5[%c0_56, %c0_57, %c0_58] : memref<1x1x128xf32, #tpu.memory_space<vmem>>, vector<1x1x128xf32>
    %47 = vector.shape_cast %46 : vector<1x1x128xf32> to vector<1x128xf32>
    %48 = vector.shape_cast %45 : vector<1x128xf32> to vector<1x1x128xf32>
    tpu.vector_store %arg5[%c0_56, %c0_57, %c0_58], %48 {strides = array<i32>} : memref<1x1x128xf32, #tpu.memory_space<vmem>>, vector<1x1x128xf32>,
    %49 = arith.mulf %38, %38 : vector<64x128xf32>
    %cst_59 = arith.constant dense<0.000000e+00> : vector<128xf32>
    %50 = vector.multi_reduction <add>, %49, %cst_59 [0] : vector<64x128xf32> to vector<128xf32>
    %51 = vector.shape_cast %50 : vector<128xf32> to vector<1x128xf32>
    %c0_60 = arith.constant 0 : index
    %c0_61 = arith.constant 0 : index
    %c0_62 = arith.constant 0 : index
    %52 = vector.load %arg6[%c0_60, %c0_61, %c0_62] : memref<1x1x128xf32, #tpu.memory_space<vmem>>, vector<1x1x128xf32>
    %53 = vector.shape_cast %52 : vector<1x1x128xf32> to vector<1x128xf32>
    %54 = vector.shape_cast %51 : vector<1x128xf32> to vector<1x1x128xf32>
    tpu.vector_store %arg6[%c0_60, %c0_61, %c0_62], %54 {strides = array<i32>} : memref<1x1x128xf32, #tpu.memory_space<vmem>>, vector<1x1x128xf32>,
    return
  }
  func.func @transform_0(%arg0: i32) -> (i32, i32, i32, i32) {
    %c0_i32 = arith.constant 0 : i32
    %c0_i32_0 = arith.constant 0 : i32
    %c0_i32_1 = arith.constant 0 : i32
    %c0_i32_2 = arith.constant 0 : i32
    return %arg0, %c0_i32, %c0_i32_0, %c0_i32_1 : i32, i32, i32, i32
  }
  func.func @transform_1(%arg0: i32) -> (i32, i32) {
    %c0_i32 = arith.constant 0 : i32
    %c0_i32_0 = arith.constant 0 : i32
    %c0_i32_1 = arith.constant 0 : i32
    return %c0_i32, %c0_i32_0 : i32, i32
  }
  func.func @transform_2(%arg0: i32) -> (i32, i32) {
    %c0_i32 = arith.constant 0 : i32
    %c0_i32_0 = arith.constant 0 : i32
    %c0_i32_1 = arith.constant 0 : i32
    return %c0_i32, %c0_i32_0 : i32, i32
  }
  func.func @transform_3(%arg0: i32) -> (i32, i32, i32, i32) {
    %c0_i32 = arith.constant 0 : i32
    %c0_i32_0 = arith.constant 0 : i32
    %c0_i32_1 = arith.constant 0 : i32
    %c0_i32_2 = arith.constant 0 : i32
    return %arg0, %c0_i32, %c0_i32_0, %c0_i32_1 : i32, i32, i32, i32
  }
  func.func @transform_4(%arg0: i32) -> (i32, i32, i32) {
    %c0_i32 = arith.constant 0 : i32
    %c0_i32_0 = arith.constant 0 : i32
    %c0_i32_1 = arith.constant 0 : i32
    return %arg0, %c0_i32, %c0_i32_0 : i32, i32, i32
  }
  func.func @transform_5(%arg0: i32) -> (i32, i32, i32) {
    %c0_i32 = arith.constant 0 : i32
    %c0_i32_0 = arith.constant 0 : i32
    %c0_i32_1 = arith.constant 0 : i32
    return %arg0, %c0_i32, %c0_i32_0 : i32, i32, i32
  }
}

module attributes {stable_mosaic.version = 11 : i64} {
  func.func @_bn_lrelu_out_kernel(%arg0: i32, %arg1: memref<1x8x8x128xbf16, #tpu.memory_space<vmem>>, %arg2: memref<2x128xf32, #tpu.memory_space<vmem>>, %arg3: memref<1x8x8x8xf32, #tpu.memory_space<vmem>>) attributes {dimension_semantics = [#tpu.dimension_semantics<parallel>], iteration_bounds = array<i64: 2>, scalar_prefetch = 0 : i64, scratch_operands = 0 : i64, tpu.core_type = #tpu.core_type<tc>, window_params = [{transform_indices = @transform_0, window_bounds = array<i64: 1, 8, 8, 128>}, {pipeline_mode = #tpu.pipeline_mode<synchronous>, transform_indices = @transform_1, window_bounds = array<i64: 2, 128>}, {transform_indices = @transform_2, window_bounds = array<i64: 1, 8, 8, 8>}]} {
    %c0 = arith.constant 0 : index
    %c0_0 = arith.constant 0 : index
    %c0_1 = arith.constant 0 : index
    %c0_2 = arith.constant 0 : index
    %0 = vector.load %arg1[%c0, %c0_0, %c0_1, %c0_2] : memref<1x8x8x128xbf16, #tpu.memory_space<vmem>>, vector<1x8x8x8xbf16>
    %1 = vector.shape_cast %0 : vector<1x8x8x8xbf16> to vector<8x8x8xbf16>
    %2 = arith.extf %1 : vector<8x8x8xbf16> to vector<8x8x8xf32>
    %c0_3 = arith.constant 0 : index
    %c0_4 = arith.constant 0 : index
    %3 = vector.load %arg2[%c0_3, %c0_4] : memref<2x128xf32, #tpu.memory_space<vmem>>, vector<1x8xf32>
    %4 = vector.shape_cast %3 : vector<1x8xf32> to vector<1x1x8xf32>
    %5 = vector.broadcast %4 : vector<1x1x8xf32> to vector<8x8x8xf32>
    %6 = arith.mulf %2, %5 : vector<8x8x8xf32>
    %c1 = arith.constant 1 : index
    %c0_5 = arith.constant 0 : index
    %7 = vector.load %arg2[%c1, %c0_5] : memref<2x128xf32, #tpu.memory_space<vmem>>, vector<1x8xf32>
    %8 = vector.shape_cast %7 : vector<1x8xf32> to vector<1x1x8xf32>
    %9 = vector.broadcast %8 : vector<1x1x8xf32> to vector<8x8x8xf32>
    %10 = arith.addf %6, %9 : vector<8x8x8xf32>
    %cst = arith.constant 0.000000e+00 : f32
    %11 = vector.broadcast %cst : f32 to vector<8x8x8xf32>
    %12 = arith.cmpf oge, %10, %11 : vector<8x8x8xf32>
    %cst_6 = arith.constant 0.00999999977 : f32
    %13 = vector.broadcast %cst_6 : f32 to vector<8x8x8xf32>
    %14 = arith.mulf %13, %10 : vector<8x8x8xf32>
    %15 = arith.select %12, %10, %14 : vector<8x8x8xi1>, vector<8x8x8xf32>
    %c0_7 = arith.constant 0 : index
    %c0_8 = arith.constant 0 : index
    %c0_9 = arith.constant 0 : index
    %c0_10 = arith.constant 0 : index
    %16 = vector.load %arg3[%c0_7, %c0_8, %c0_9, %c0_10] : memref<1x8x8x8xf32, #tpu.memory_space<vmem>>, vector<1x8x8x8xf32>
    %17 = vector.shape_cast %16 : vector<1x8x8x8xf32> to vector<8x8x8xf32>
    %18 = vector.shape_cast %15 : vector<8x8x8xf32> to vector<1x8x8x8xf32>
    tpu.vector_store %arg3[%c0_7, %c0_8, %c0_9, %c0_10], %18 {strides = array<i32>} : memref<1x8x8x8xf32, #tpu.memory_space<vmem>>, vector<1x8x8x8xf32>,
    return
  }
  func.func @transform_0(%arg0: i32) -> (i32, i32, i32, i32) {
    %c0_i32 = arith.constant 0 : i32
    %c0_i32_0 = arith.constant 0 : i32
    %c0_i32_1 = arith.constant 0 : i32
    %c0_i32_2 = arith.constant 0 : i32
    return %arg0, %c0_i32, %c0_i32_0, %c0_i32_1 : i32, i32, i32, i32
  }
  func.func @transform_1(%arg0: i32) -> (i32, i32) {
    %c0_i32 = arith.constant 0 : i32
    %c0_i32_0 = arith.constant 0 : i32
    %c0_i32_1 = arith.constant 0 : i32
    return %c0_i32, %c0_i32_0 : i32, i32
  }
  func.func @transform_2(%arg0: i32) -> (i32, i32, i32, i32) {
    %c0_i32 = arith.constant 0 : i32
    %c0_i32_0 = arith.constant 0 : i32
    %c0_i32_1 = arith.constant 0 : i32
    %c0_i32_2 = arith.constant 0 : i32
    return %arg0, %c0_i32, %c0_i32_0, %c0_i32_1 : i32, i32, i32, i32
  }
}

</mosaic_0001>

<bundles_post_ra>
// kernel: _lambda_.5
= control target key start
LH: loop header
LB: loop body
LE: loop exit
PB: predicated region body
PF: predicated region fallthrough
CT: control target
= control target key end

     0   :  { %7 = vsyncpa [#allocation3], 0  ;;  %s806_s0 = inlined_call_operand.hbm [shape: bf16[2,8,8,128], index: 0, kind: input, shape index: {}]   ;;  %s807_s1 = inlined_call_operand.hbm [shape: f32[2,128], index: 1, kind: input, shape index: {}]   ;;  %s808_s2 = inlined_call_operand.hbm [shape: f32[2,8,8,8], index: 2, kind: output, shape index: {}]  }
   0x1   :  { %9 = vsyncpa [#allocation3 + $0x1], 0 }
   0x2   :  { %10 = vsyncpa [#allocation6], 0 }
   0x3   :  { %11 = vsyncpa [#allocation4], 0 }
   0x4   :  { %13 = vsyncpa [#allocation4 + $0x1], 0  ;;  %s599_s9 = smov 0   ;;  %s601_s10 = smov 0  }
   0x5   :  { %s603_s11 = smov 0   ;;  %s605_s12 = smov 0  }
   0x6 LB: > { %s620_s13 = sadd.s32 4294967295, %s575_s12   ;;  %s347_s14 = sadd.s32 4294967294, %s575_s12   ;;  %s575_s12 = sphi %s605_s12, %s833_s12   ;;  %s571_s11 = sphi %s603_s11, %s832_s11   ;;  %s567_s10 = sphi %s601_s10, %s831_s10   ;;  %s563_s9 = sphi %s599_s9, %s830_s9  }
   0x7   : > { %s624_s15 = sadd.s32 1, %s575_s12   ;;  %s26_s16 = sadd.s32 1, %s571_s11 }
   0x8   : > { %s23_s17 = ssub.s32 %s575_s12, %s624_s15  ;;  %p33_p0 = scmp.ne.s32.totalorder %s571_s11, %s567_s10 }
   0x9   : > { %p24_p1 = scmp.eq.s32.totalorder %s23_s17, 0  ;;  %p34_p2 = scmp.eq.s32.totalorder %s575_s12, 0 }
   0xa   : > { %p39_p3 = scmp.ne.s32.totalorder %s567_s10, %s563_s9  ;;  %p809_p4 = scmp.eq.s32.totalorder %s620_s13, 0 }
   0xb   : > { %s636_s18 = scalar_select %p24_p1, %s571_s11, %s26_s16  }
   0xc   : > { %p638_p5 = por %p34_p2, %p33_p0  ;;  %p644_p6 = por %p809_p4, %p39_p3 }
   0xd   : > { %p84_p7 = scmp.eq.s32.totalorder %s620_s13, 1  ;;  %p90_p8 = scmp.eq.s32.totalorder %s347_s14, 1 }
   0xe   : > { %s815_s20 = scalar_select %p644_p6, 1, 0 }
   0xf   : > { %p348_p9 = scmp.ge.s32.totalorder %s575_s12, 1  ;;  %p97_p10 = scmp.lt.s32.totalorder %s575_s12, 3 }
  0x10   : > { %p651_p11 = por %p84_p7, %p33_p0  ;;  %p655_p12 = por %p90_p8, %p39_p3 }
  0x11   : > { %p659_p13 = pnand %p348_p9, %p97_p10  ;;  %s577_s24 = smov [#allocation5]  }
  0x12   : > { %s816_s21 = scalar_select %p651_p11, 1, 0 }
  0x13   : > { %s817_s22 = scalar_select %p655_p12, 1, 0 }
  0x14   : > { %s818_s23 = scalar_select %p659_p13, 1, 0 }
  0x15   : > { %p394_p2 = pneg %p659_p13  ;;  %s110_s25 = sshll.u32 %s577_s24, 4  ;;  %s111_s25 = int_to_ptr.vmem [resolvable:$true] %s110_s25 }
  0x16   : > { %p407_p4 = scmp.lt.s32.totalorder %s575_s12, 2  ;;  %p819_p0 = scmp.eq.s32.totalorder %s620_s13, 0 }
  0x17   : > { %s121_s27 = sand.u32 1, %s571_s11   ;;  %s447_s4 = scalar_lea.hbm %s807_s1, 32 }
  0x18   : > { %p669_p7 = pnand %p394_p2, %p819_p0  ;;  %p676_p3 = pnand %p407_p4, %p638_p5 }
  0x19   : > { %s351_s29 = sshll.u32 %s121_s27, 5  ;;  %p448_p8 = scmp.ne.s32.totalorder %s807_s1, %s447_s4 }
  0x1a   : > { %s821_s28 = scalar_select %p676_p3, 1, 0 }
  0x1b   : > { %p449_p9 = pneg %p669_p7  ;;  %p454_p4 = scmp.lt.u32.totalorder %s447_s4, %s807_s1 }
  0x1d   : > { %p450_p10 = pnand %p449_p9, %p448_p8 }
  0x1f   : > { %p451_p2 = pneg %p450_p10 }
  0x21   : > { %p456_p5 = pnand %p454_p4, %p451_p2 }
  0x23   : > { %459 = shalt.err (!%p456_p5)
}
  0x24   : > { %s460_s14 = scalar_lea.vmem %s111_s25, 32  ;;  %p468_p11 = scmp.lt.s32.totalorder %s111_s25, %s111_s25 }
  0x25   : > { %p461_p0 = scmp.ne.s32.totalorder %s111_s25, %s460_s14  ;;  %p469_p6 = scmp.lt.s32.totalorder %s460_s14, %s460_s14 }
  0x27   : > { %p463_p1 = pnand %p461_p0, %p449_p9  ;;  %p470_p13 = por %p469_p6, %p468_p11 }
  0x29   : > { %p464_p12 = pneg %p463_p1 }
  0x2b   : > { %p471_p3 = pnand %p470_p13, %p464_p12 }
  0x2d   : > { %474 = shalt.err (!%p471_p3)
}
  0x2e   : > { %397 = dma.hbm_to_vmem [thread:$0]  (!%p669_p7), %s807_s1, 32, %s111_s25, [#allocation6]  }
  0x2f   : > { %s365_s19 = sshll.u32 %s575_s12, 9  ;;  %s125_s24 = scalar_lea.vmem [#allocation2], %s351_s29 }
  0x30   : > { %s132_s30 = sshll.u32 %s125_s24, 4  ;;  %s700_s5 = scalar_lea.hbm %s806_s0, %s365_s19  ;;  %s702_s30 = int_to_ptr.vmem [resolvable:$true] %s132_s30 }
  0x31   : > { %s704_s26 = scalar_lea.sflag [#allocation3], %s121_s27  ;;  %s475_s6 = scalar_lea.hbm %s700_s5, 512 }
  0x32   : > { %p476_p6 = scmp.ne.s32.totalorder %s700_s5, %s475_s6  ;;  %p822_p11 = scmp.ne.s32.totalorder %s821_s28, 0 }
  0x33   : > { %s480_s7 = scalar_lea.hbm %s806_s0, 1024  ;;  %p481_p7 = scmp.lt.u32.totalorder %s700_s5, %s806_s0 }
  0x34   : > { %p477_p12 = pneg %p822_p11  ;;  %p482_p3 = scmp.lt.u32.totalorder %s480_s7, %s475_s6 }
  0x35   : > { %p484_p9 = scmp.lt.u32.totalorder %s475_s6, %s700_s5 }
  0x36   : > { %p478_p13 = pnand %p477_p12, %p476_p6  ;;  %p483_p8 = por %p482_p3, %p481_p7 }
  0x38   : > { %p479_p1 = pneg %p478_p13  ;;  %p485_p10 = por %p484_p9, %p483_p8 }
  0x3a   : > { %p486_p2 = pnand %p485_p10, %p479_p1 }
  0x3c   : > { %489 = shalt.err (!%p486_p2)
}
  0x3d   : > { %s490_s27 = scalar_lea.vmem %s702_s30, 512  ;;  %s578_s16 = smov [#allocation2]  }
  0x3e   : > { %p491_p4 = scmp.ne.s32.totalorder %s702_s30, %s490_s27  ;;  %s495_s17 = sshll.u32 %s578_s16, 4  ;;  %s496_s17 = int_to_ptr.vmem [resolvable:$false] %s495_s17 }
  0x3f   : > { %s497_s19 = scalar_lea.vmem %s496_s17, 1024  ;;  %p498_p6 = scmp.lt.s32.totalorder %s702_s30, %s496_s17 }
  0x40   : > { %p493_p5 = pnand %p491_p4, %p477_p12  ;;  %p499_p13 = scmp.lt.s32.totalorder %s497_s19, %s490_s27 }
  0x42   : > { %p494_p0 = pneg %p493_p5  ;;  %p500_p7 = por %p499_p13, %p498_p6 }
  0x44   : > { %p501_p3 = pnand %p500_p7, %p494_p0 }
  0x46   : > { %504 = shalt.err (!%p501_p3)
}
  0x47   : > { %s579_s24 = smov 64   ;;  %s580_s3 = smov 4  }
  0x48   : > { %401 = dma.hbm_to_vmem [thread:$0]  (!%p822_p11), %s700_s5, 512, %s702_s30, %s704_s26, %s579_s24, %s579_s24, %s580_s3  }
  0x49   : > { %p823_p12 = scmp.ne.s32.totalorder %s818_s23, 0 }
  0x4a   : > { %s735_s4 = sand.u32 (!%p823_p12), 1, %s567_s10   ;;  %p824_p1 = scmp.ne.s32.totalorder (!%p823_p12), %s815_s20, 0 }
  0x4b   : > { %144 = sbr.rel (%p823_p12) target bundleno = 116 (0x74), region = 28  ;;  %s355_s6 = sshll.u32 (!%p823_p12), %s735_s4, 5 }
  0x4c   : > { %s147_s25 = scalar_lea.sflag (!%p823_p12), [#allocation3], %s735_s4  ;;  %s150_s29 = scalar_lea.vmem (!%p823_p12), [#allocation2], %s355_s6 }
  0x52   : > { %550 = dma.done.wait (%p824_p1), %s147_s25, 512  }
  0x53   : > { %552 = vsyncadd (%p824_p1), %s147_s25, 4294966784  ;;  %p825_p8 = scmp.eq.s32.totalorder %s620_s13, 0 }
  0x55   : > { %554 = dma.done.wait (%p825_p8), [#allocation6], 32   ;;  %p826_p11 = pmov %p825_p8 }
  0x56   : > { %v368_v0 = vld [vmem:[%s150_s29] sm:$0xff]   ;;  %vm241_vm0 = vcmask 64512   ;;  %v383_v4 = vld [vmem:[%s150_s29 + $0x8] sm:$0xff]   ;;  %v384_v5 = vld [vmem:[%s150_s29 + $0x10] sm:$0xff]   ;;  %s357_s20 = sshll.u32 %s735_s4, 6  ;;  %s366_s30 = sshll.u32 %s620_s13, 10 }
  0x57   : > { %556 = vsyncadd (%p826_p11), [#allocation6], 4294967264  ;;  %v358_v1 = vld [vmem:[#allocation5] ss:$0 sm:$0xff]  ;;  %v369_v2 = vunpack.c.l.bf16 %v368_v0  ;;  %v370_v3 = vunpack.c.h.bf16 %v368_v0  ;;  %v385_v6 = vld [vmem:[%s150_s29 + $0x18] sm:$0xff]   ;;  %v373_v8 = vunpack.c.l.bf16 %v383_v4  ;;  %v374_v9 = vunpack.c.h.bf16 %v383_v4  ;;  %s174_s23 = scalar_lea.vmem [#allocation7], %s357_s20  ;;  %s760_s26 = scalar_lea.hbm %s808_s2, %s366_s30 }
  0x58   : > { %v359_v7 = vld [vmem:[#allocation5 + $0x1] ss:$0 sm:$0xff]  ;;  %v377_v10 = vunpack.c.l.bf16 %v384_v5  ;;  %v378_v11 = vunpack.c.h.bf16 %v384_v5  ;;  %v381_v14 = vunpack.c.l.bf16 %v385_v6  ;;  %v382_v15 = vunpack.c.h.bf16 %v385_v6  ;;  %s264_s28 = sshll.u32 %s174_s23, 4  ;;  %s251_s7 = scalar_lea.sflag [#allocation4], %s735_s4  ;;  %s754_s28 = int_to_ptr.vmem [resolvable:$true] %s264_s28 }
  0x59   : > { %v196_v12 = vmul.f32 %v369_v2, %v358_v1  ;;  %v197_v13 = vmul.f32 %v370_v3, %v358_v1  ;;  %v198_v16 = vmul.f32 %v373_v8, %v358_v1  ;;  %v199_v17 = vmul.f32 %v374_v9, %v358_v1  ;;  %s505_s8 = scalar_lea.vmem %s754_s28, 1024  ;;  %p827_p10 = scmp.ne.s32.totalorder %s816_s21, 0 }
  0x5a   : > { %v200_v18 = vmul.f32 %v377_v10, %v358_v1  ;;  %v201_v19 = vmul.f32 %v378_v11, %v358_v1  ;;  %v202_v22 = vmul.f32 %v381_v14, %v358_v1  ;;  %v203_v23 = vmul.f32 %v382_v15, %v358_v1  ;;  %p506_p9 = scmp.ne.s32.totalorder %s754_s28, %s505_s8  ;;  %s581_s14 = smov [#allocation7]  }
  0x5b   : > { %v209_v20 = vadd.f32 %v359_v7, %v196_v12  ;;  %v210_v21 = vadd.f32 %v359_v7, %v197_v13  ;;  %v211_v24 = vadd.f32 %v359_v7, %v198_v16  ;;  %v212_v25 = vadd.f32 %v359_v7, %v199_v17  ;;  %s509_s27 = sshll.u32 %s581_s14, 4  ;;  %s510_s27 = int_to_ptr.vmem [resolvable:$false] %s509_s27 }
  0x5c   : > { %v213_v26 = vadd.f32 %v359_v7, %v200_v18  ;;  %v214_v27 = vadd.f32 %v359_v7, %v201_v19  ;;  %v215_v39 = vadd.f32 %v359_v7, %v202_v22  ;;  %v216_v40 = vadd.f32 %v359_v7, %v203_v23  ;;  %p507_p2 = pnand %p506_p9, %p827_p10  ;;  %s511_s16 = scalar_lea.vmem %s510_s27, 2048 }
  0x5d   : > { %vm217_vm1 = vcmp.ge.f32.partialorder %v209_v20, 0.0  ;;  %v225_v28 = vmul.f32 0.01, %v209_v20  ;;  %vm218_vm2 = vcmp.ge.f32.partialorder %v210_v21, 0.0  ;;  %v226_v29 = vmul.f32 0.01, %v210_v21  ;;  %p512_p5 = scmp.lt.s32.totalorder %s754_s28, %s510_s27  ;;  %p513_p0 = scmp.lt.s32.totalorder %s511_s16, %s505_s8 }
  0x5e   : > { %vm219_vm3 = vcmp.ge.f32.partialorder %v211_v24, 0.0  ;;  %v227_v30 = vmul.f32 0.01, %v211_v24  ;;  %vm220_vm4 = vcmp.ge.f32.partialorder %v212_v25, 0.0  ;;  %v228_v31 = vmul.f32 0.01, %v212_v25  ;;  %p508_p4 = pneg %p507_p2 }
  0x5f   : > { %v233_v32 = vsel %vm217_vm1, %v209_v20, %v225_v28  ;;  %v234_v33 = vsel %vm218_vm2, %v210_v21, %v226_v29  ;;  %vm221_vm5 = vcmp.ge.f32.partialorder %v213_v26, 0.0  ;;  %v229_v34 = vmul.f32 0.01, %v213_v26  ;;  %p514_p6 = por %p513_p0, %p512_p5 }
  0x60   : > { %242 = vst.msk [vmem:[%s174_s23] sm:$0xff] %vm241_vm0, %v233_v32  ;;  %243 = vst.msk [vmem:[%s174_s23 + $0x8] sm:$0xff] %vm241_vm0, %v234_v33  ;;  %v235_v35 = vsel %vm219_vm3, %v211_v24, %v227_v30  ;;  %v236_v36 = vsel %vm220_vm4, %v212_v25, %v228_v31  ;;  %vm222_vm6 = vcmp.ge.f32.partialorder %v214_v27, 0.0  ;;  %v230_v37 = vmul.f32 0.01, %v214_v27 }
  0x61   : > { %244 = vst.msk [vmem:[%s174_s23 + $0x10] sm:$0xff] %vm241_vm0, %v235_v35  ;;  %245 = vst.msk [vmem:[%s174_s23 + $0x18] sm:$0xff] %vm241_vm0, %v236_v36  ;;  %v237_v38 = vsel %vm221_vm5, %v213_v26, %v229_v34  ;;  %vm223_vm7 = vcmp.ge.f32.partialorder %v215_v39, 0.0  ;;  %v231_v42 = vmul.f32 0.01, %v215_v39  ;;  %vm224_vm8 = vcmp.ge.f32.partialorder %v216_v40, 0.0  ;;  %p515_p13 = pnand %p514_p6, %p508_p4 }
  0x62   : > { %246 = vst.msk [vmem:[%s174_s23 + $0x20] sm:$0xff] %vm241_vm0, %v237_v38  ;;  %v238_v41 = vsel %vm222_vm6, %v214_v27, %v230_v37  ;;  %v232_v43 = vmul.f32 0.01, %v216_v40 }
  0x63   : > { %247 = vst.msk [vmem:[%s174_s23 + $0x28] sm:$0xff] %vm241_vm0, %v238_v41  ;;  %v239_v44 = vsel %vm223_vm7, %v215_v39, %v231_v42 }
  0x64   : > { %v240_v45 = vsel %vm224_vm8, %v216_v40, %v232_v43  ;;  %248 = vst.msk [vmem:[%s174_s23 + $0x30] sm:$0xff] %vm241_vm0, %v239_v44 }
  0x65   : > { %249 = vst.msk [vmem:[%s174_s23 + $0x38] sm:$0xff] %vm241_vm0, %v240_v45 }
  0x66   : > { %518 = shalt.err (!%p515_p13)
}
  0x67   : > { %s519_s17 = scalar_lea.hbm %s760_s26, 1024  ;;  %s523_s3 = scalar_lea.hbm %s808_s2, 2048 }
  0x68   : > { %p520_p7 = scmp.ne.s32.totalorder %s760_s26, %s519_s17  ;;  %p524_p1 = scmp.lt.u32.totalorder %s760_s26, %s808_s2 }
  0x69   : > { %p525_p8 = scmp.lt.u32.totalorder %s523_s3, %s519_s17  ;;  %p527_p9 = scmp.lt.u32.totalorder %s519_s17, %s760_s26 }
  0x6a   : > { %p521_p3 = pnand %p520_p7, %p827_p10 }
  0x6b   : > { %p526_p11 = por %p525_p8, %p524_p1 }
  0x6c   : > { %p522_p12 = pneg %p521_p3 }
  0x6d   : > { %p528_p2 = por %p527_p9, %p526_p11 }
  0x6f   : > { %p529_p4 = pnand %p528_p2, %p522_p12 }
  0x71   : > { %532 = shalt.err (!%p529_p4)
}
  0x72   : > { %s582_s29 = smov 128   ;;  %s583_s20 = smov 8  }
  0x73   : > { %392 = dma.vmem_to_hbm [thread:$0]  (%p827_p10), %s754_s28, 1024, %s760_s26, %s251_s7, %s582_s29, %s582_s29, %s583_s20  }
  0x74 PF: > { %s279_s23 = sand.u32 1, %s563_s9   ;;  %p828_p5 = scmp.ne.s32.totalorder %s817_s22, 0 }
  0x75   : > { %p829_p0 = scmp.ge.s32.totalorder %s575_s12, 2  ;;  %s280_s30 = scalar_lea.sflag [#allocation4], %s279_s23 }
  0x77   : > { %p403_p6 = pnand %p829_p0, %p828_p5 }
  0x79   : > { %558 = dma.done.wait (!%p403_p6), %s280_s30, 1024  }
  0x7a   : > { %560 = vsyncadd (!%p403_p6), %s280_s30, 4294966272  ;;  %p16_p13 = scmp.ge.s32.totalorder %s624_s15, 4   ;;  %s830_s9 = smov %s567_s10 }
  0x7b   : > { %s831_s10 = smov %s571_s11  ;;  %s832_s11 = smov %s636_s18 }
  0x7c   : > { %s833_s12 = smov %s624_s15  ;;  %18 = sbr.rel (!%p16_p13) target bundleno = 6 (0x6), region = 77 }
  0x83   :  { %285 = vsyncpa [#allocation3], 1 }
  0x84   :  { %287 = vsyncpa [#allocation3 + $0x1], 1 }
  0x85   :  { %288 = vsyncpa [#allocation6], 1 }
  0x86   :  { %289 = vsyncpa [#allocation4], 1 }
  0x87   :  { %291 = vsyncpa [#allocation4 + $0x1], 1 }

// kernel: _lambda_.3
= control target key start
LH: loop header
LB: loop body
LE: loop exit
PB: predicated region body
PF: predicated region fallthrough
CT: control target
= control target key end

     0   :  { %10 = vsyncpa [#allocation4], 0  ;;  %s2992_s0 = inlined_call_operand.hbm [shape: bf16[16,2,8,8], index: 0, kind: input, shape index: {}]   ;;  %s2993_s1 = inlined_call_operand.hbm [shape: bf16[36,128], index: 1, kind: input, shape index: {}]   ;;  %s2994_s2 = inlined_call_operand.hbm [shape: bf16[2,8,8,128], index: 2, kind: output, shape index: {0}]   ;;  %s2995_s3 = inlined_call_operand.hbm [shape: f32[2,1,128], index: 3, kind: output, shape index: {1}]   ;;  %s2996_s4 = inlined_call_operand.hbm [shape: f32[2,1,128], index: 4, kind: output, shape index: {2}]  }
   0x1   :  { %12 = vsyncpa [#allocation4 + $0x1], 0 }
   0x2   :  { %13 = vsyncpa [#allocation7], 0 }
   0x3   :  { %14 = vsyncpa [#allocation5], 0 }
   0x4   :  { %16 = vsyncpa [#allocation5 + $0x1], 0 }
   0x5   :  { %17 = vsyncpa [#allocation10], 0 }
   0x6   :  { %19 = vsyncpa [#allocation10 + $0x1], 0  ;;  %s2212_s15 = smov 0   ;;  %s2214_s16 = smov 0  }
   0x7   :  { %s2216_s17 = smov 0   ;;  %s2218_s18 = smov 0  }
   0x8 LB: > { %s2233_s19 = sadd.s32 4294967295, %s2167_s18   ;;  %s1663_s20 = sadd.s32 4294967294, %s2167_s18   ;;  %s2167_s18 = sphi %s2218_s18, %s3022_s18   ;;  %s2163_s17 = sphi %s2216_s17, %s3021_s17   ;;  %s2159_s16 = sphi %s2214_s16, %s3020_s16   ;;  %s2155_s15 = sphi %s2212_s15, %s3019_s15  }
   0x9   : > { %p45_p0 = scmp.ne.s32.totalorder %s2159_s16, %s2155_s15  ;;  %p2997_p1 = scmp.eq.s32.totalorder %s2233_s19, 0 }
   0xa   : > { %p96_p3 = scmp.eq.s32.totalorder %s1663_s20, 1  ;;  %p1664_p5 = scmp.ge.s32.totalorder %s2167_s18, 1 }
   0xb   : > { %p2244_p4 = por %p2997_p1, %p45_p0  ;;  %p155_p7 = scmp.lt.s32.totalorder %s2167_s18, 3 }
   0xc   : > { %p2249_p6 = por %p96_p3, %p45_p0  ;;  %s2169_s24 = smov [#allocation6]  }
   0xd   : > { %s3000_s21 = scalar_select %p2244_p4, 1, 0 }
   0xe   : > { %s3001_s22 = scalar_select %p2249_p6, 1, 0 }
   0xf   : > { %p2254_p8 = pnand %p1664_p5, %p155_p7  ;;  %s167_s25 = sshll.u32 %s2169_s24, 4  ;;  %s2258_s25 = int_to_ptr.vmem [resolvable:$true] %s167_s25 }
  0x10   : > { %s2270_s27 = sadd.s32 1, %s2167_s18   ;;  %s32_s28 = sadd.s32 1, %s2163_s17 }
  0x11   : > { %s3002_s23 = scalar_select %p2254_p8, 1, 0 }
  0x12   : > { %p1864_p9 = pneg %p2254_p8  ;;  %s29_s29 = ssub.s32 %s2167_s18, %s2270_s27 }
  0x13   : > { %s1979_s6 = scalar_lea.hbm %s2993_s1, 320 }
  0x14   : > { %p2265_p11 = pnand %p1864_p9, %p2997_p1  ;;  %p1980_p12 = scmp.ne.s32.totalorder %s2993_s1, %s1979_s6 }
  0x15   : > { %p1986_p5 = scmp.lt.u32.totalorder %s1979_s6, %s2993_s1 }
  0x16   : > { %p1981_p13 = pneg %p2265_p11 }
  0x18   : > { %p1982_p0 = pnand %p1981_p13, %p1980_p12 }
  0x1a   : > { %p1983_p3 = pneg %p1982_p0 }
  0x1c   : > { %p1988_p7 = pnand %p1986_p5, %p1983_p3 }
  0x1e   : > { %1991 = shalt.err (!%p1988_p7)
}
  0x1f   : > { %s1992_s11 = scalar_lea.vmem %s2258_s25, 320  ;;  %p2000_p2 = scmp.lt.s32.totalorder %s2258_s25, %s2258_s25 }
  0x20   : > { %p1993_p9 = scmp.ne.s32.totalorder %s2258_s25, %s1992_s11  ;;  %p2001_p6 = scmp.lt.s32.totalorder %s1992_s11, %s1992_s11 }
  0x22   : > { %p1995_p10 = pnand %p1993_p9, %p1981_p13  ;;  %p2002_p4 = por %p2001_p6, %p2000_p2 }
  0x24   : > { %p1996_p1 = pneg %p1995_p10 }
  0x26   : > { %p2003_p8 = pnand %p2002_p4, %p1996_p1 }
  0x28   : > { %2006 = shalt.err (!%p2003_p8)
}
  0x29   : > { %s2170_s12 = smov 64   ;;  %s2171_s13 = smov 4  }
  0x2a   : > { %1867 = dma.hbm_to_vmem [thread:$0]  (!%p2265_p11), %s2993_s1, 320, %s2258_s25, [#allocation7], %s2170_s12, %s2170_s12, %s2171_s13  }
  0x2b   : > { %p30_p1 = scmp.eq.s32.totalorder %s29_s29, 0  ;;  %p39_p2 = scmp.ne.s32.totalorder %s2163_s17, %s2159_s16 }
  0x2c   : > { %p40_p4 = scmp.eq.s32.totalorder %s2167_s18, 0  ;;  %p1883_p6 = scmp.lt.s32.totalorder %s2167_s18, 2 }
  0x2d   : > { %s2304_s30 = scalar_select %p30_p1, %s2163_s17, %s32_s28  }
  0x2e   : > { %p41_p8 = por %p40_p4, %p39_p2  ;;  %p3004_p10 = scmp.eq.s32.totalorder %s2233_s19, 1 }
  0x2f   : > { %s181_s26 = sand.u32 1, %s2163_s17   ;;  %s1798_s6 = sshll.u32 %s2167_s18, 10 }
  0x30   : > { %p2308_p12 = por %p3004_p10, %p39_p2  ;;  %s1667_s7 = sshll.u32 %s181_s26, 6 }
  0x31   : > { %s2317_s10 = scalar_lea.hbm %s2992_s0, %s1798_s6  ;;  %s185_s25 = scalar_lea.vmem [#allocation3], %s1667_s7 }
  0x32   : > { %s193_s28 = sshll.u32 %s185_s25, 4  ;;  %p2319_p11 = pnand %p1883_p6, %p41_p8  ;;  %s2323_s28 = int_to_ptr.vmem [resolvable:$true] %s193_s28 }
  0x33   : > { %s2325_s11 = scalar_lea.sflag [#allocation4], %s181_s26  ;;  %s2007_s14 = scalar_lea.hbm %s2317_s10, 1024 }
  0x34   : > { %p2008_p13 = scmp.ne.s32.totalorder %s2317_s10, %s2007_s14  ;;  %p2009_p0 = pneg %p2319_p11 }
  0x35   : > { %s2012_s7 = scalar_lea.hbm %s2992_s0, 2048  ;;  %p2013_p7 = scmp.lt.u32.totalorder %s2317_s10, %s2992_s0 }
  0x36   : > { %p2010_p3 = pnand %p2009_p0, %p2008_p13  ;;  %p2014_p9 = scmp.lt.u32.totalorder %s2012_s7, %s2007_s14 }
  0x37   : > { %p2016_p2 = scmp.lt.u32.totalorder %s2007_s14, %s2317_s10 }
  0x38   : > { %p2011_p5 = pneg %p2010_p3  ;;  %p2015_p1 = por %p2014_p9, %p2013_p7 }
  0x3a   : > { %p2017_p4 = por %p2016_p2, %p2015_p1 }
  0x3c   : > { %p2018_p6 = pnand %p2017_p4, %p2011_p5 }
  0x3e   : > { %2021 = shalt.err (!%p2018_p6)
}
  0x3f   : > { %s2022_s26 = scalar_lea.vmem %s2323_s28, 1024  ;;  %s2172_s25 = smov [#allocation3]  }
  0x40   : > { %p2023_p8 = scmp.ne.s32.totalorder %s2323_s28, %s2022_s26  ;;  %s2027_s24 = sshll.u32 %s2172_s25, 4  ;;  %s2028_s24 = int_to_ptr.vmem [resolvable:$false] %s2027_s24 }
  0x41   : > { %s2029_s6 = scalar_lea.vmem %s2028_s24, 2048  ;;  %p2030_p3 = scmp.lt.s32.totalorder %s2323_s28, %s2028_s24 }
  0x42   : > { %p2025_p10 = pnand %p2023_p8, %p2009_p0  ;;  %p2031_p7 = scmp.lt.s32.totalorder %s2029_s6, %s2022_s26 }
  0x44   : > { %p2026_p13 = pneg %p2025_p10  ;;  %p2032_p9 = por %p2031_p7, %p2030_p3 }
  0x46   : > { %p2033_p1 = pnand %p2032_p9, %p2026_p13 }
  0x48   : > { %2036 = shalt.err (!%p2033_p1)
}
  0x49   : > { %1871 = dma.hbm_to_vmem [thread:$0]  (!%p2319_p11), %s2317_s10, 1024, %s2323_s28, %s2325_s11, %s2170_s12, %s2170_s12, %s2171_s13  }
  0x4a   : > { %p3007_p0 = scmp.ne.s32.totalorder %s3002_s23, 0 }
  0x4b   : > { %s2359_s14 = sand.u32 (!%p3007_p0), 1, %s2159_s16   ;;  %p3008_p5 = scmp.ne.s32.totalorder (!%p3007_p0), %s3000_s21, 0 }
  0x4c   : > { %205 = sbr.rel (%p3007_p0) target bundleno = 747 (0x2eb), region = 28  ;;  %s1672_s7 = sshll.u32 (!%p3007_p0), %s2359_s14, 6 }
  0x4d   : > { %s208_s8 = scalar_lea.sflag (!%p3007_p0), [#allocation4], %s2359_s14  ;;  %s2363_s9 = scalar_lea.vmem (!%p3007_p0), [#allocation3], %s1672_s7 }
  0x53   : > { %2138 = dma.done.wait (%p3008_p5), %s208_s8, 1024  }
  0x54   : > { %2140 = vsyncadd (%p3008_p5), %s208_s8, 4294966272  ;;  %p3009_p11 = scmp.eq.s32.totalorder %s2233_s19, 0 }
  0x56   : > { %2142 = dma.done.wait (%p3009_p11), [#allocation7], 320   ;;  %p3010_p2 = pmov %p3009_p11 }
  0x57   : > { %vm315_vm0 = vcmask 27648   ;;  %v2173_v0 = vmov 0   ;;  %vm318_vm1 = vcmask 24576   ;;  %vm319_vm2 = vsmask.f32 256  ;;  %s2174_s21 = smov 124  }
  0x58   : > { %2144 = vsyncadd (%p3010_p2), [#allocation7], 4294966976  ;;  %317 = vst.msk [vmem:[#allocation2 + $0x4] sm:$0xf] %vm315_vm0, %v2173_v0  ;;  %vm331_vm3 = vcmask 27651   ;;  %s2175_s23 = smov 4  }
  0x59   : > { %316 = vst.msk [vmem:[#allocation2] sm:$0xf] %vm315_vm0, %v2173_v0  ;;  %325 = vst.msk [vmem:[#allocation2 + $0x6c] sm:$0xf] %vm315_vm0, %v2173_v0  ;;  %vm332_vm4 = vsmask.f32 7950 }
  0x5a   : > { %326 = vst.msk [vmem:[#allocation2 + $0x70] sm:$0xf] %vm315_vm0, %v2173_v0  ;;  %v250_v1 = vld [vmem:[%s2363_s9] sm:$0xf]  ;;  %v1675_v2 = vld [vmem:[%s2363_s9 + $0x4] sm:$0xf]  ;;  %vm2390_vm5 = vmand %vm318_vm1, %vm319_vm2 }
  0x5b   : > { %v252_v3 = vld [vmem:[%s2363_s9 + $0x10] sm:$0xf]  ;;  %v2380_v4 = vmax.bf16 %v1675_v2, %v250_v1  ;;  %v1677_v5 = vld [vmem:[%s2363_s9 + $0x14] sm:$0xf]  ;;  %v251_v6 = vld [vmem:[%s2363_s9 + $0x8] sm:$0xf] }
  0x5c   : > { %v1676_v7 = vld [vmem:[%s2363_s9 + $0xc] sm:$0xf]  ;;  %v2385_v8 = vmax.bf16 %v1677_v5, %v252_v3  ;;  %v253_v9 = vld [vmem:[%s2363_s9 + $0x18] sm:$0xf]  ;;  %v1678_v10 = vld [vmem:[%s2363_s9 + $0x1c] sm:$0xf] }
  0x5d   : > { %283 = vrot.lane.b32.xlu0 %v2380_v4, %s2174_s21  ;;  %v2396_v12 = vmax.bf16 %v1676_v7, %v251_v6  ;;  %v254_v13 = vld [vmem:[%s2363_s9 + $0x20] sm:$0xf]  ;;  %vm2401_vm6 = vmand %vm331_vm3, %vm332_vm4  ;;  %v2407_v15 = vmax.bf16 %v1678_v10, %v253_v9  ;;  %v1679_v16 = vld [vmem:[%s2363_s9 + $0x24] sm:$0xf]  ;;  %s2176_s12 = smov 24   ;;  %s2177_s13 = smov 8  }
  0x5e   : > { %287 = vrot.lane.b32.xlu1 %v2385_v8, %s2174_s21  ;;  %v255_v17 = vld [vmem:[%s2363_s9 + $0x28] sm:$0xf]  ;;  %v1680_v18 = vld [vmem:[%s2363_s9 + $0x2c] sm:$0xf]  ;;  %v256_v19 = vld [vmem:[%s2363_s9 + $0x30] sm:$0xf]  ;;  %v2422_v26 = vmax.bf16 %v1679_v16, %v254_v13 }
  0x5f   : > { %v1681_v20 = vld [vmem:[%s2363_s9 + $0x34] sm:$0xf]  ;;  %v2414_v21 = vld [vmem:[#allocation2 + $0x4] sm:$0xf]  ;;  %v321_v24 = vld [vmem:[#allocation2 + $0x8] sm:$0x1]  ;;  %v2433_v32 = vmax.bf16 %v1680_v18, %v255_v17 }
  0x60   : > { %v1691_v22 = vcombine.low %v2414_v21, %v2414_v21  ;;  %v334_v25 = vld [vmem:[#allocation2 + $0xc] sm:$0x8]  ;;  %v257_v27 = vld [vmem:[%s2363_s9 + $0x38] sm:$0xf]  ;;  %v322_v28 = vsel %vm2390_vm5, 0, %v321_v24  ;;  %v2440_v40 = vmax.bf16 %v1681_v20, %v256_v19  ;;  %s2178_s10 = smov 28  }
  0x61   : > { %v2418_v23 = vld [vmem:[#allocation2 + $0x70] sm:$0xf]  ;;  %285 = vrot.lane.b32.xlu0 %v2396_v12, %s2174_s21  ;;  %v335_v30 = vsel %vm2401_vm6, 0, %v334_v25  ;;  %v340_v31 = vld [vmem:[#allocation2 + $0x24] sm:$0x8]  ;;  %s2179_s28 = smov 12  }
  0x62   : > { %v1746_v29 = vcombine.low %v2418_v23, %v2418_v23  ;;  %289 = vrot.lane.b32.xlu1 %v2407_v15, %s2174_s21  ;;  %v512_v33 = vshrl.u32 %v1691_v22, 16  ;;  %v515_v34 = vshll.u32 %v1691_v22, 16  ;;  %323 = vst [vmem:[#allocation2 + $0x8] sm:$0x1] %v322_v28  ;;  %336 = vst [vmem:[#allocation2 + $0xc] sm:$0x8] %v335_v30 }
  0x63   : > { %v341_v35 = vsel %vm2401_vm6, 0, %v340_v31  ;;  %v337_v36 = vld [vmem:[#allocation2 + $0x18] sm:$0x8]  ;;  %v1682_v37 = vld [vmem:[%s2363_s9 + $0x3c] sm:$0xf]  ;;  %s2180_s29 = smov 20  }
  0x64   : > { %342 = vst [vmem:[#allocation2 + $0x24] sm:$0x8] %v341_v35  ;;  %v338_v38 = vsel %vm2401_vm6, 0, %v337_v36  ;;  %v343_v39 = vld [vmem:[#allocation2 + $0x30] sm:$0x8]  ;;  %v514_v43 = vrot.slane %v512_v33, 4  ;;  %v2450_v49 = vmax.bf16 %v1682_v37, %v257_v27 }
  0x65   : > { %339 = vst [vmem:[#allocation2 + $0x18] sm:$0x8] %v338_v38  ;;  %v344_v41 = vsel %vm2401_vm6, 0, %v343_v39  ;;  %v346_v42 = vld [vmem:[#allocation2 + $0x3c] sm:$0x8]  ;;  %291 = vrot.lane.b32.xlu0 %v2422_v26, %s2174_s21  ;;  %v517_v44 = vrot.slane %v515_v34, 5 }
  0x66   : > { %v453_v45 = vld [vmem:[#allocation2 + $0x6c] sm:$0x8]  ;;  %v952_v46 = vshrl.u32 %v1746_v29, 16  ;;  %345 = vst [vmem:[#allocation2 + $0x30] sm:$0x8] %v344_v41  ;;  %v347_v47 = vsel %vm2401_vm6, 0, %v346_v42  ;;  %293 = vrot.lane.b32.xlu1 %v2433_v32, %s2174_s21 }
  0x67   : > { %v349_v48 = vld [vmem:[#allocation2 + $0x48] sm:$0x8]  ;;  %v955_v50 = vshll.u32 %v1746_v29, 16  ;;  %348 = vst [vmem:[#allocation2 + $0x3c] sm:$0x8] %v347_v47  ;;  %v518_v62 = vor.u32 %v517_v44, %v514_v43  ;;  %v1738_v2 = vcombine.low %v453_v45, %v2418_v23  ;;  %s2181_s11 = smov 32  }
  0x68   : > { %v350_v51 = vsel %vm2401_vm6, 0, %v349_v48  ;;  %v352_v52 = vld [vmem:[#allocation2 + $0x54] sm:$0x8]  ;;  %v358_v53 = vld [vmem:[#allocation2 + $0x14] sm:$0x1]  ;;  %v954_v5 = vrot.slane %v952_v46, 4 }
  0x69   : > { %351 = vst [vmem:[#allocation2 + $0x48] sm:$0x8] %v350_v51  ;;  %v353_v54 = vsel %vm2401_vm6, 0, %v352_v52  ;;  %v359_v55 = vsel %vm2390_vm5, 0, %v358_v53  ;;  %v361_v56 = vld [vmem:[#allocation2 + $0x20] sm:$0x1]  ;;  %295 = vrot.lane.b32.xlu0 %v2440_v40, %s2174_s21 }
  0x6a   : > { %v364_v57 = vld [vmem:[#allocation2 + $0x2c] sm:$0x1]  ;;  %354 = vst [vmem:[#allocation2 + $0x54] sm:$0x8] %v353_v54  ;;  %v355_v58 = vld [vmem:[#allocation2 + $0x60] sm:$0x8]  ;;  %297 = vrot.lane.b32.xlu1 %v2450_v49, %s2174_s21 }
  0x6b   : > { %360 = vst [vmem:[#allocation2 + $0x14] sm:$0x1] %v359_v55  ;;  %v362_v59 = vsel %vm2390_vm5, 0, %v361_v56  ;;  %v365_v60 = vsel %vm2390_vm5, 0, %v364_v57  ;;  %v367_v61 = vld [vmem:[#allocation2 + $0x38] sm:$0x1] }
  0x6c   : > { %v406_v63 = vld [vmem:[#allocation2 + $0x8] sm:$0x1]  ;;  %v356_v0 = vsel %vm2401_vm6, 0, %v355_v58  ;;  %363 = vst [vmem:[#allocation2 + $0x20] sm:$0x1] %v362_v59  ;;  %v368_v1 = vsel %vm2390_vm5, 0, %v367_v61 }
  0x6d   : > { %366 = vst [vmem:[#allocation2 + $0x2c] sm:$0x1] %v365_v60  ;;  %v1699_v3 = vcombine.low %v2414_v21, %v406_v63  ;;  %v957_v6 = vrot.slane %v955_v50, 5  ;;  %357 = vst [vmem:[#allocation2 + $0x60] sm:$0x8] %v356_v0  ;;  %575 = vrot.lane.b32.xlu0 %v518_v62, %s2175_s23  ;;  %s2182_s26 = smov 16  }
  0x6e   : > { %369 = vst [vmem:[#allocation2 + $0x38] sm:$0x1] %v368_v1  ;;  %v370_v7 = vld [vmem:[#allocation2 + $0x44] sm:$0x1]  ;;  %v373_v13 = vld [vmem:[#allocation2 + $0x50] sm:$0x1]  ;;  %885 = vrot.lane.b32.xlu1 %v1738_v2, %s2176_s12 }
  0x6f   : > { %v371_v9 = vsel %vm2390_vm5, 0, %v370_v7  ;;  %v615_v10 = vrot.slane %v1699_v3, 5  ;;  %v958_v14 = vor.u32 %v957_v6, %v954_v5  ;;  %v374_v16 = vsel %vm2390_vm5, 0, %v373_v13  ;;  %v376_v17 = vld [vmem:[#allocation2 + $0x5c] sm:$0x1]  ;;  %s1674_s25 = sshll.u32 %s2359_s14, 5 }
  0x70   : > { %372 = vst [vmem:[#allocation2 + $0x44] sm:$0x1] %v371_v9  ;;  %375 = vst [vmem:[#allocation2 + $0x50] sm:$0x1] %v374_v16  ;;  %v379_v18 = vld [vmem:[#allocation2 + $0x68] sm:$0x1] }
  0x71   : > { %623 = vrot.lane.b32.xlu0 %v615_v10, %s2177_s13  ;;  %v377_v19 = vsel %vm2390_vm5, 0, %v376_v17  ;;  %v380_v20 = vsel %vm2390_vm5, 0, %v379_v18  ;;  %v327_v28 = vld [vmem:[#allocation2 + $0x74] sm:$0x1]  ;;  %v418_v38 = vld [vmem:[#allocation2 + $0x24] sm:$0x8] }
  0x72   : > { %973 = vrot.lane.b32.xlu1 %v958_v14, %s2178_s10  ;;  %378 = vst [vmem:[#allocation2 + $0x5c] sm:$0x1] %v377_v19  ;;  %381 = vst [vmem:[#allocation2 + $0x68] sm:$0x1] %v380_v20  ;;  %v328_v30 = vsel %vm2390_vm5, 0, %v327_v28  ;;  %vm1358_vm7 = vcmask 1041408  }
  0x73   : > { %329 = vst [vmem:[#allocation2 + $0x74] sm:$0x1] %v328_v30  ;;  %v439_v48 = vld [vmem:[#allocation2 + $0x18] sm:$0x8]  ;;  %v443_v52 = vld [vmem:[#allocation2 + $0x30] sm:$0x8] }
  0x74   : > { %v445_v55 = vld [vmem:[#allocation2 + $0x3c] sm:$0x8]  ;;  %v424_v63 = vld [vmem:[#allocation2 + $0x48] sm:$0x8]  ;;  %v426_v1 = vld [vmem:[#allocation2 + $0x54] sm:$0x8] }
  0x75   : > { %v422_v57 = vld [vmem:[#allocation2 + $0x3c] sm:$0x8]  ;;  %v428_v6 = vld [vmem:[#allocation2 + $0x60] sm:$0x8]  ;;  %v447_v9 = vld [vmem:[#allocation2 + $0x48] sm:$0x8] }
  0x76   : > { %v407_v14 = vld [vmem:[#allocation2 + $0x14] sm:$0x1]  ;;  %v408_v16 = vld [vmem:[#allocation2 + $0x20] sm:$0x1]  ;;  %v449_v18 = vld [vmem:[#allocation2 + $0x54] sm:$0x8] }
  0x77   : > { %v451_v19 = vld [vmem:[#allocation2 + $0x60] sm:$0x8]  ;;  %vm1023_vm8 = vcmask 31744   ;;  %vm1048_vm9 = vcmask 64512   ;;  %vm1065_vm10 = vcmask 97280   ;;  %vm1082_vm11 = vcmask 130048  }
  0x78   : > { %vm1099_vm12 = vcmask 162816   ;;  %vm1116_vm13 = vcmask 195584   ;;  %vm1133_vm14 = vcmask 228352   ;;  %vm1150_vm15 = vcmask 261120   ;;  %s235_s24 = scalar_lea.vmem [#allocation8], %s1674_s25  ;;  %s1799_s7 = sshll.u32 %s2233_s19, 9 }
  0x79   : > { %vm1345_vm1 = vcmask 293888   ;;  %s1501_s6 = sshll.u32 %s235_s24, 4  ;;  %s2877_s21 = scalar_lea.hbm %s2994_s2, %s1799_s7  ;;  %s2872_s6 = int_to_ptr.vmem [resolvable:$true] %s1501_s6 }
  0xcf   : > { %v284_v22 = vpop.permute.xlu0 %283 }
  0xd0   : > { %v307_v24 = vmax.bf16 %v284_v22, %v2380_v4  ;;  %v288_v25 = vpop.permute.xlu1 %287  ;;  %v414_v4 = vld [vmem:[#allocation2 + $0xc] sm:$0x8] }
  0xd1   : > { %v309_v27 = vmax.bf16 %v288_v25, %v2385_v8 }
  0xd2   : > { %382 = vst.msk [vmem:[#allocation2 + $0x10] sm:$0xf] %vm315_vm0, %v307_v24 }
  0xd3   : > { %384 = vst.msk [vmem:[#allocation2 + $0x28] sm:$0xf] %vm315_vm0, %v309_v27  ;;  %v286_v29 = vpop.permute.xlu0 %285 }
  0xd4   : > { %v308_v31 = vmax.bf16 %v286_v29, %v2396_v12  ;;  %v290_v33 = vpop.permute.xlu1 %289 }
  0xd5   : > { %v310_v34 = vmax.bf16 %v290_v33, %v2407_v15  ;;  %v416_v15 = vld [vmem:[#allocation2 + $0x18] sm:$0x8]  ;;  %v409_v33 = vld [vmem:[#allocation2 + $0x2c] sm:$0x1] }
  0xd6   : > { %383 = vst.msk [vmem:[#allocation2 + $0x1c] sm:$0xf] %vm315_vm0, %v308_v31 }
  0xd7   : > { %385 = vst.msk [vmem:[#allocation2 + $0x34] sm:$0xf] %vm315_vm0, %v310_v34  ;;  %v292_v8 = vpop.permute.xlu0 %291  ;;  %v430_v34 = vld [vmem:[#allocation2 + $0x14] sm:$0x1] }
  0xd8   : > { %v311_v35 = vmax.bf16 %v292_v8, %v2422_v26  ;;  %v294_v36 = vpop.permute.xlu1 %293 }
  0xd9   : > { %v2495_v37 = vld [vmem:[#allocation2 + $0x10] sm:$0xf]  ;;  %v312_v11 = vmax.bf16 %v294_v36, %v2433_v32 }
  0xda   : > { %v1707_v12 = vcombine.low %v414_v4, %v2495_v37  ;;  %386 = vst.msk [vmem:[#allocation2 + $0x40] sm:$0xf] %vm315_vm0, %v311_v35  ;;  %v2500_v39 = vld [vmem:[#allocation2 + $0x28] sm:$0xf]  ;;  %v420_v32 = vld [vmem:[#allocation2 + $0x30] sm:$0x8]  ;;  %v1723_v36 = vcombine.low %v2495_v37, %v430_v34 }
  0xdb   : > { %387 = vst.msk [vmem:[#allocation2 + $0x4c] sm:$0xf] %vm315_vm0, %v312_v11  ;;  %v296_v41 = vpop.permute.xlu0 %295  ;;  %v1709_v26 = vcombine.low %v418_v38, %v2500_v39  ;;  %v2522_v54 = vld [vmem:[#allocation2 + $0x28] sm:$0xf]  ;;  %v2552_v20 = vld [vmem:[#allocation2 + $0x10] sm:$0xf] }
  0xdc   : > { %679 = vrot.lane.b32.xlu0 %v1707_v12, %s2179_s28  ;;  %v313_v42 = vmax.bf16 %v296_v41, %v2440_v40  ;;  %v298_v43 = vpop.permute.xlu1 %297  ;;  %v1700_v29 = vcombine.low %v2552_v20, %v407_v14  ;;  %v2566_v31 = vld [vmem:[#allocation2 + $0x28] sm:$0xf]  ;;  %v431_v38 = vld [vmem:[#allocation2 + $0x20] sm:$0x1]  ;;  %v432_v11 = vld [vmem:[#allocation2 + $0x2c] sm:$0x1] }
  0xdd   : > { %v2506_v44 = vld [vmem:[#allocation2 + $0x1c] sm:$0xf]  ;;  %v314_v45 = vmax.bf16 %v298_v43, %v2450_v49  ;;  %v441_v49 = vld [vmem:[#allocation2 + $0x24] sm:$0x8]  ;;  %v1702_v35 = vcombine.low %v2566_v31, %v409_v33  ;;  %v455_v43 = vld [vmem:[#allocation2 + $0x20] sm:$0x1] }
  0xde   : > { %v1708_v46 = vcombine.low %v416_v15, %v2506_v44  ;;  %388 = vst.msk [vmem:[#allocation2 + $0x58] sm:$0xf] %vm315_vm0, %v313_v42  ;;  %v2511_v47 = vld [vmem:[#allocation2 + $0x34] sm:$0xf]  ;;  %v2513_v50 = vld [vmem:[#allocation2 + $0x1c] sm:$0xf]  ;;  %v1732_v60 = vcombine.low %v441_v49, %v2522_v54  ;;  %v1724_v41 = vcombine.low %v2506_v44, %v431_v38 }
  0xdf   : > { %389 = vst.msk [vmem:[#allocation2 + $0x64] sm:$0xf] %vm315_vm0, %v314_v45  ;;  %v1710_v40 = vcombine.low %v420_v32, %v2511_v47  ;;  %v1731_v51 = vcombine.low %v439_v48, %v2513_v50  ;;  %v2520_v53 = vld [vmem:[#allocation2 + $0x34] sm:$0xf]  ;;  %v2558_v25 = vld [vmem:[#allocation2 + $0x1c] sm:$0xf]  ;;  %v1747_v48 = vcombine.low %v2513_v50, %v455_v43  ;;  %v1715_v43 = vcombine.low %v2495_v37, %v2495_v37 }
  0xe0   : > { %683 = vrot.lane.b32.xlu0 %v1709_v26, %s2179_s28  ;;  %681 = vrot.lane.b32.xlu1 %v1708_v46, %s2179_s28  ;;  %v1733_v59 = vcombine.low %v443_v52, %v2520_v53  ;;  %v1701_v30 = vcombine.low %v2558_v25, %v408_v16  ;;  %v616_v4 = vrot.slane %v1700_v29, 5  ;;  %v618_v12 = vrot.slane %v1702_v35, 5  ;;  %v433_v42 = vld [vmem:[#allocation2 + $0x38] sm:$0x1]  ;;  %v459_v35 = vld [vmem:[#allocation2 + $0x50] sm:$0x1] }
  0xe1   : > { %v2526_v56 = vld [vmem:[#allocation2 + $0x40] sm:$0xf]  ;;  %v807_v15 = vrot.slane %v1723_v36, 5  ;;  %v1725_v26 = vcombine.low %v2500_v39, %v432_v11  ;;  %v808_v32 = vrot.slane %v1724_v41, 5  ;;  %v1726_v46 = vcombine.low %v2511_v47, %v433_v42  ;;  %v437_v41 = vld [vmem:[#allocation2 + $0x68] sm:$0x1] }
  0xe2   : > { %v2528_v58 = vld [vmem:[#allocation2 + $0x40] sm:$0xf]  ;;  %v1734_v61 = vcombine.low %v445_v55, %v2526_v56  ;;  %v2536_v0 = vld [vmem:[#allocation2 + $0x4c] sm:$0xf]  ;;  %v617_v8 = vrot.slane %v1701_v30, 5  ;;  %v999_v52 = vrot.slane %v1747_v48, 5  ;;  %v1693_v36 = vcombine.low %v2558_v25, %v2558_v25 }
  0xe3   : > { %v1711_v62 = vcombine.low %v422_v57, %v2528_v58  ;;  %v1712_v3 = vcombine.low %v424_v63, %v2536_v0  ;;  %v2546_v10 = vld [vmem:[#allocation2 + $0x4c] sm:$0xf]  ;;  %v809_v45 = vrot.slane %v1725_v26, 5  ;;  %v810_v49 = vrot.slane %v1726_v46, 5 }
  0xe4   : > { %871 = vrot.lane.b32.xlu0 %v1731_v51, %s2176_s12  ;;  %685 = vrot.lane.b32.xlu1 %v1710_v40, %s2179_s28  ;;  %v1735_v17 = vcombine.low %v447_v9, %v2546_v10  ;;  %v456_v40 = vld [vmem:[#allocation2 + $0x2c] sm:$0x1]  ;;  %v457_v51 = vld [vmem:[#allocation2 + $0x38] sm:$0x1]  ;;  %v1751_v26 = vcombine.low %v2546_v10, %v459_v35  ;;  %v528_v42 = vshrl.u32 %v1693_v36, 16  ;;  %v1694_v37 = vcombine.low %v2566_v31, %v2566_v31 }
  0xe5   : > { %v2538_v2 = vld [vmem:[#allocation2 + $0x58] sm:$0xf]  ;;  %v1748_v55 = vcombine.low %v2522_v54, %v456_v40  ;;  %v1749_v57 = vcombine.low %v2520_v53, %v457_v51  ;;  %v2592_v9 = vld [vmem:[#allocation2 + $0x4c] sm:$0xf]  ;;  %v531_v40 = vshll.u32 %v1693_v36, 16  ;;  %v1741_v36 = vcombine.low %v2520_v53, %v2520_v53 }
  0xe6   : > { %v1713_v5 = vcombine.low %v426_v1, %v2538_v2  ;;  %v2544_v7 = vld [vmem:[#allocation2 + $0x64] sm:$0xf]  ;;  %v2554_v22 = vld [vmem:[#allocation2 + $0x58] sm:$0xf]  ;;  %v460_v51 = vld [vmem:[#allocation2 + $0x5c] sm:$0x1] }
  0xe7   : > { %v1714_v13 = vcombine.low %v428_v6, %v2544_v7  ;;  %v2556_v24 = vld [vmem:[#allocation2 + $0x64] sm:$0xf]  ;;  %v1736_v27 = vcombine.low %v449_v18, %v2554_v22  ;;  %v1001_v63 = vrot.slane %v1749_v57, 5  ;;  %v2590_v6 = vld [vmem:[#allocation2 + $0x40] sm:$0xf]  ;;  %v1730_v48 = vcombine.low %v2544_v7, %v437_v41 }
  0xe8   : > { %875 = vrot.lane.b32.xlu0 %v1733_v59, %s2176_s12  ;;  %873 = vrot.lane.b32.xlu1 %v1732_v60, %s2176_s12  ;;  %v1737_v28 = vcombine.low %v451_v19, %v2556_v24  ;;  %v458_v59 = vld [vmem:[#allocation2 + $0x44] sm:$0x1]  ;;  %v2584_v60 = vld [vmem:[#allocation2 + $0x34] sm:$0xf]  ;;  %v1752_v57 = vcombine.low %v2554_v22, %v460_v51  ;;  %vm1207_vm0 = vsmask.f32 4368 }
  0xe9   : > { %v1750_v1 = vcombine.low %v2526_v56, %v458_v59  ;;  %v434_v19 = vld [vmem:[#allocation2 + $0x44] sm:$0x1]  ;;  %v704_v59 = vshrl.u32 %v1715_v43, 16  ;;  %vm2801_vm3 = vmor %vm319_vm2, %vm1207_vm0 }
  0xea   : > { %v1727_v33 = vcombine.low %v2528_v58, %v434_v19  ;;  %v1739_v19 = vcombine.low %v2513_v50, %v2513_v50  ;;  %v1718_v50 = vcombine.low %v2511_v47, %v2511_v47 }
  0xeb   : > { %v1002_v14 = vrot.slane %v1750_v1, 5 }
  0xec   : > { %877 = vrot.lane.b32.xlu1 %v1734_v61, %s2176_s12  ;;  %687 = vrot.lane.b32.xlu0 %v1711_v62, %s2179_s28  ;;  %v410_v61 = vld [vmem:[#allocation2 + $0x38] sm:$0x1]  ;;  %v1000_v62 = vrot.slane %v1748_v55, 5  ;;  %v811_v38 = vrot.slane %v1727_v33, 5  ;;  %v530_v55 = vrot.slane %v528_v42, 4  ;;  %v1716_v33 = vcombine.low %v2506_v44, %v2506_v44 }
  0xed   : > { %v731_v51 = vshll.u32 %v1718_v50, 16 }
  0xee   : > { %v712_v41 = vshrl.u32 %v1716_v33, 16  ;;  %v715_v44 = vshll.u32 %v1716_v33, 16  ;;  %v1696_v33 = vcombine.low %v2590_v6, %v2590_v6 }
  0xf0   : > { %689 = vrot.lane.b32.xlu1 %v1712_v3, %s2179_s28  ;;  %691 = vrot.lane.b32.xlu0 %v1713_v5, %s2179_s28  ;;  %v1703_v3 = vcombine.low %v2584_v60, %v410_v61  ;;  %v411_v5 = vld [vmem:[#allocation2 + $0x44] sm:$0x1]  ;;  %v707_v61 = vshll.u32 %v1715_v43, 16  ;;  %v912_v43 = vshrl.u32 %v1741_v36, 16  ;;  %v714_v47 = vrot.slane %v712_v41, 4 }
  0xf1   : > { %v555_v41 = vshll.u32 %v1696_v33, 16 }
  0xf2   : > { %v619_v16 = vrot.slane %v1703_v3, 5 }
  0xf4   : > { %693 = vrot.lane.b32.xlu1 %v1714_v13, %s2179_s28  ;;  %879 = vrot.lane.b32.xlu0 %v1735_v17, %s2176_s12  ;;  %v412_v13 = vld [vmem:[#allocation2 + $0x50] sm:$0x1]  ;;  %v1704_v17 = vcombine.low %v2590_v6, %v411_v5 }
  0xf5   : > { %v1705_v18 = vcombine.low %v2592_v9, %v412_v13  ;;  %v536_v13 = vshrl.u32 %v1694_v37, 16 }
  0xf6   : > { %v620_v29 = vrot.slane %v1704_v17, 5  ;;  %v706_v17 = vrot.slane %v704_v59, 4 }
  0xf7   : > { %v621_v30 = vrot.slane %v1705_v18, 5  ;;  %v709_v18 = vrot.slane %v707_v61, 5 }
  0xf8   : > { %881 = vrot.lane.b32.xlu1 %v1736_v27, %s2176_s12  ;;  %883 = vrot.lane.b32.xlu0 %v1737_v28, %s2176_s12  ;;  %v2598_v27 = vld [vmem:[#allocation2 + $0x58] sm:$0xf]  ;;  %v413_v28 = vld [vmem:[#allocation2 + $0x5c] sm:$0x1]  ;;  %s1480_s12 = scalar_lea.sflag [#allocation5], %s2359_s14 }
  0xf9   : > { %v1706_v34 = vcombine.low %v2598_v27, %v413_v28 }
  0xfb   : > { %v622_v11 = vrot.slane %v1706_v34, 5 }
  0xfc   : > { %625 = vrot.lane.b32.xlu1 %v616_v4, %s2177_s13  ;;  %627 = vrot.lane.b32.xlu0 %v617_v8, %s2177_s13  ;;  %v436_v4 = vld [vmem:[#allocation2 + $0x5c] sm:$0x1]  ;;  %v435_v8 = vld [vmem:[#allocation2 + $0x50] sm:$0x1] }
 0x100   : > { %629 = vrot.lane.b32.xlu1 %v618_v12, %s2177_s13  ;;  %815 = vrot.lane.b32.xlu0 %v807_v15, %s2180_s29  ;;  %v1729_v12 = vcombine.low %v2538_v2, %v436_v4  ;;  %v1728_v15 = vcombine.low %v2536_v0, %v435_v8  ;;  %v538_v8 = vrot.slane %v536_v13, 4 }
 0x102   : > { %v812_v46 = vrot.slane %v1728_v15, 5 }
 0x104   : > { %817 = vrot.lane.b32.xlu1 %v808_v32, %s2180_s29  ;;  %819 = vrot.lane.b32.xlu0 %v809_v45, %s2180_s29  ;;  %v1692_v32 = vcombine.low %v2552_v20, %v2552_v20  ;;  %v813_v45 = vrot.slane %v1729_v12, 5  ;;  %v710_v12 = vor.u32 %v709_v18, %v706_v17 }
 0x106   : > { %v520_v1 = vshrl.u32 %v1692_v32, 16  ;;  %v523_v3 = vshll.u32 %v1692_v32, 16  ;;  %v915_v32 = vshll.u32 %v1741_v36, 16 }
 0x108   : > { %821 = vrot.lane.b32.xlu1 %v810_v49, %s2180_s29  ;;  %1007 = vrot.lane.b32.xlu0 %v999_v52, %s2181_s11  ;;  %v1717_v49 = vcombine.low %v2500_v39, %v2500_v39  ;;  %v1003_v52 = vrot.slane %v1751_v26, 5 }
 0x10a   : > { %v720_v5 = vshrl.u32 %v1717_v49, 16  ;;  %v723_v39 = vshll.u32 %v1717_v49, 16  ;;  %v1740_v49 = vcombine.low %v2522_v54, %v2522_v54 }
 0x10c   : > { %1009 = vrot.lane.b32.xlu1 %v1000_v62, %s2181_s11  ;;  %1011 = vrot.lane.b32.xlu0 %v1001_v63, %s2181_s11  ;;  %v814_v62 = vrot.slane %v1730_v48, 5  ;;  %v533_v63 = vrot.slane %v531_v40, 5  ;;  %v722_v34 = vrot.slane %v720_v5, 4  ;;  %v725_v4 = vrot.slane %v723_v39, 5 }
 0x10d   : > { %v1695_v48 = vcombine.low %v2584_v60, %v2584_v60  ;;  %v717_v40 = vrot.slane %v715_v44, 5  ;;  %v904_v5 = vshrl.u32 %v1740_v49, 16  ;;  %v907_v54 = vshll.u32 %v1740_v49, 16 }
 0x10e   : > { %v534_v28 = vor.u32 %v533_v63, %v530_v55  ;;  %v726_v26 = vor.u32 %v725_v4, %v722_v34  ;;  %v1697_v55 = vcombine.low %v2592_v9, %v2592_v9  ;;  %v1721_v34 = vcombine.low %v2538_v2, %v2538_v2  ;;  %v1976_v2 = vld [vmem:[#allocation6 + $0x8] sm:$0xff]  }
 0x10f   : > { %v547_v63 = vshll.u32 %v1695_v48, 16 }
 0x110   : > { %1013 = vrot.lane.b32.xlu1 %v1002_v14, %s2181_s11  ;;  %631 = vrot.lane.b32.xlu0 %v619_v16, %s2177_s13  ;;  %v539_v14 = vshll.u32 %v1694_v37, 16  ;;  %v1004_v16 = vrot.slane %v1752_v57, 5  ;;  %v917_v37 = vrot.slane %v915_v32, 5  ;;  %v1742_v57 = vcombine.low %v2526_v56, %v2526_v56 }
 0x111   : > { %v560_v13 = vshrl.u32 %v1697_v55, 16  ;;  %v549_v18 = vrot.slane %v547_v63, 5  ;;  %v1719_v56 = vcombine.low %v2528_v58, %v2528_v58  ;;  %v1698_v58 = vcombine.low %v2598_v27, %v2598_v27 }
 0x112   : > { %v541_v35 = vrot.slane %v539_v14, 5  ;;  %v563_v14 = vshll.u32 %v1697_v55, 16  ;;  %v752_v44 = vshrl.u32 %v1721_v34, 16  ;;  %v1743_v32 = vcombine.low %v2546_v10, %v2546_v10 }
 0x113   : > { %v562_v4 = vrot.slane %v560_v13, 4  ;;  %v571_v49 = vshll.u32 %v1698_v58, 16 }
 0x114   : > { %633 = vrot.lane.b32.xlu1 %v620_v29, %s2177_s13  ;;  %635 = vrot.lane.b32.xlu0 %v621_v30, %s2177_s13  ;;  %v522_v29 = vrot.slane %v520_v1, 4  ;;  %v525_v30 = vrot.slane %v523_v3, 5  ;;  %v542_v42 = vor.u32 %v541_v35, %v538_v8  ;;  %v718_v1 = vor.u32 %v717_v40, %v714_v47 }
 0x115   : > { %v733_v3 = vrot.slane %v731_v51, 5  ;;  %v565_v8 = vrot.slane %v563_v14, 5  ;;  %v557_v51 = vrot.slane %v555_v41, 5  ;;  %v928_v55 = vshrl.u32 %v1743_v32, 16 }
 0x116   : > { %v526_v15 = vor.u32 %v525_v30, %v522_v29  ;;  %v906_v29 = vrot.slane %v904_v5, 4  ;;  %v909_v30 = vrot.slane %v907_v54, 5  ;;  %v1722_v5 = vcombine.low %v2544_v7, %v2544_v7 }
 0x117   : > { %v930_v13 = vrot.slane %v928_v55, 4 }
 0x118   : > { %823 = vrot.lane.b32.xlu0 %v811_v38, %s2180_s29  ;;  %637 = vrot.lane.b32.xlu1 %v622_v11, %s2177_s13  ;;  %v896_v38 = vshrl.u32 %v1739_v19, 16  ;;  %v899_v11 = vshll.u32 %v1739_v19, 16  ;;  %v923_v19 = vshll.u32 %v1742_v57, 16  ;;  %v763_v7 = vshll.u32 %v1722_v5, 16  ;;  %s2037_s13 = scalar_lea.vmem %s2872_s6, 512 }
 0x119   : > { %p2038_p4 = scmp.ne.s32.totalorder %s2872_s6, %s2037_s13 }
 0x11a   : > { %v901_v53 = vrot.slane %v899_v11, 5  ;;  %v736_v11 = vshrl.u32 %v1719_v56, 16 }
 0x11b   : > { %p2039_p6 = pnand %p2038_p4, %p2308_p12 }
 0x11c   : > { %827 = vrot.lane.b32.xlu0 %v813_v45, %s2180_s29  ;;  %825 = vrot.lane.b32.xlu1 %v812_v46, %s2180_s29  ;;  %v898_v45 = vrot.slane %v896_v38, 4  ;;  %v728_v46 = vshrl.u32 %v1718_v50, 16  ;;  %v925_v38 = vrot.slane %v923_v19, 5  ;;  %v910_v50 = vor.u32 %v909_v30, %v906_v29 }
 0x11d   : > { %v760_v29 = vshrl.u32 %v1722_v5, 16  ;;  %v1744_v30 = vcombine.low %v2554_v22, %v2554_v22  ;;  %p2040_p8 = pneg %p2039_p6 }
 0x11e   : > { %v902_v59 = vor.u32 %v901_v53, %v898_v45  ;;  %v730_v61 = vrot.slane %v728_v46, 4  ;;  %v738_v53 = vrot.slane %v736_v11, 4  ;;  %v568_v46 = vshrl.u32 %v1698_v58, 16  ;;  %v461_v58 = vld [vmem:[#allocation2 + $0x68] sm:$0x1] }
 0x11f   : > { %v765_v11 = vrot.slane %v763_v7, 5  ;;  %v1753_v41 = vcombine.low %v2556_v24, %v461_v58 }
 0x120   : > { %1015 = vrot.lane.b32.xlu0 %v1003_v52, %s2181_s11  ;;  %829 = vrot.lane.b32.xlu1 %v814_v62, %s2180_s29  ;;  %v914_v52 = vrot.slane %v912_v43, 4  ;;  %v544_v62 = vshrl.u32 %v1695_v48, 16  ;;  %v755_v43 = vshll.u32 %v1721_v34, 16  ;;  %v1720_v48 = vcombine.low %v2536_v0, %v2536_v0 }
 0x121   : > { %v570_v0 = vrot.slane %v568_v46, 4  ;;  %v1005_v46 = vrot.slane %v1753_v41, 5 }
 0x122   : > { %v918_v39 = vor.u32 %v917_v37, %v914_v52  ;;  %v546_v17 = vrot.slane %v544_v62, 4  ;;  %v754_v52 = vrot.slane %v752_v44, 4  ;;  %v1978_v37 = vld [vmem:[#allocation6 + $0x10] ss:$0 sps:$4 sm:$0x33]   ;;  %v757_v10 = vrot.slane %v755_v43, 5 }
 0x123   : > { %v1745_v62 = vcombine.low %v2556_v24, %v2556_v24  ;;  %v1360_v54 = vsel %vm1358_vm7, %v1978_v37, 0  ;;  %v462_v44 = vld [vmem:[#allocation2 + $0x74] sm:$0x1] }
 0x124   : > { %579 = vrot.lane.b32.xlu0 %v534_v28, %s2175_s23  ;;  %1017 = vrot.lane.b32.xlu1 %v1004_v16, %s2181_s11  ;;  %v920_v16 = vshrl.u32 %v1742_v57, 16  ;;  %v734_v28 = vor.u32 %v733_v3, %v730_v61  ;;  %v550_v36 = vor.u32 %v549_v18, %v546_v17  ;;  %v931_v57 = vshll.u32 %v1743_v32, 16 }
 0x125   : > { %v747_v61 = vshll.u32 %v1720_v48, 16  ;;  %v573_v3 = vrot.slane %v571_v49, 5  ;;  %v944_v18 = vshrl.u32 %v1745_v62, 16  ;;  %v947_v19 = vshll.u32 %v1745_v62, 16 }
 0x126   : > { %v922_v35 = vrot.slane %v920_v16, 4  ;;  %v933_v14 = vrot.slane %v931_v57, 5 }
 0x127   : > { %v749_v17 = vrot.slane %v747_v61, 5 }
 0x128   : > { %767 = vrot.lane.b32.xlu0 %v710_v12, %s2182_s26  ;;  %577 = vrot.lane.b32.xlu1 %v526_v15, %s2175_s23  ;;  %v739_v12 = vshll.u32 %v1719_v56, 16  ;;  %v552_v15 = vshrl.u32 %v1696_v33, 16  ;;  %v926_v45 = vor.u32 %v925_v38, %v922_v35  ;;  %v574_v56 = vor.u32 %v573_v3, %v570_v0  ;;  %v390_v33 = vld [vmem:[#allocation2] sm:$0x8] }
 0x129   : > { %v934_v34 = vor.u32 %v933_v14, %v930_v13  ;;  %v949_v35 = vrot.slane %v947_v19, 5  ;;  %v762_v38 = vrot.slane %v760_v29, 4  ;;  %v1683_v22 = vcombine.low %v390_v33, %v2414_v21 }
 0x12a   : > { %v741_v47 = vrot.slane %v739_v12, 5  ;;  %v554_v40 = vrot.slane %v552_v15, 4  ;;  %v939_v12 = vshll.u32 %v1744_v30, 16 }
 0x12c   : > { %771 = vrot.lane.b32.xlu0 %v726_v26, %s2182_s26  ;;  %581 = vrot.lane.b32.xlu1 %v542_v42, %s2175_s23  ;;  %v1974_v26 = vld [vmem:[#allocation6] sm:$0xff]   ;;  %v566_v42 = vor.u32 %v565_v8, %v562_v4  ;;  %v742_v63 = vor.u32 %v741_v47, %v738_v53  ;;  %v946_v8 = vrot.slane %v944_v18, 4  ;;  %v941_v43 = vrot.slane %v939_v12, 5  ;;  %v392_v12 = vld [vmem:[#allocation2 + $0xc] sm:$0x8] }
 0x12d   : > { %1830 = vmatprep.subr.bf16.mxu0 %v1974_v26  ;;  %1844 = vmatprep.subr.bf16.mxu1 %v1974_v26 }
 0x12e   : > { %1831 = vmatpush3.bf16.msra.mxu0 %v1974_v26  ;;  %1847 = vmatpush3.bf16.msra.mxu1 %v1974_v26  ;;  %v950_v26 = vor.u32 %v949_v35, %v946_v8 }
 0x12f   : > { %1832 = vmatprep.subr.bf16.mxu0 %v1976_v2  ;;  %1845 = vmatprep.subr.bf16.mxu1 %v1976_v2 }
 0x130   : > { %959 = vrot.lane.b32.xlu0 %v902_v59, %s2178_s10  ;;  %769 = vrot.lane.b32.xlu1 %v718_v1, %s2182_s26  ;;  %v744_v59 = vshrl.u32 %v1720_v48, 16  ;;  %v558_v1 = vor.u32 %v557_v51, %v554_v40 }
 0x132   : > { %1833 = vmatpush3.bf16.msra.mxu0 %v1976_v2  ;;  %1848 = vmatpush3.bf16.msra.mxu1 %v1976_v2  ;;  %v746_v16 = vrot.slane %v744_v59, 4  ;;  %v766_v2 = vor.u32 %v765_v11, %v762_v38  ;;  %v394_v38 = vld [vmem:[#allocation2 + $0x18] sm:$0x8] }
 0x133   : > { %1850 = vmatprep.subr.msk.bf16.mxu0 %vm1358_vm7, %v1978_v37  ;;  %1851 = vmatprep.subr.msk.bf16.mxu1 %vm1358_vm7, %v1978_v37 }
 0x134   : > { %963 = vrot.lane.b32.xlu0 %v918_v39, %s2178_s10  ;;  %773 = vrot.lane.b32.xlu1 %v734_v28, %s2182_s26  ;;  %v758_v39 = vor.u32 %v757_v10, %v754_v52  ;;  %v576_v28 = vpop.permute.xlu0 %575  ;;  %v750_v4 = vor.u32 %v749_v17, %v746_v16 }
 0x135   : > { %v1026_v32 = vsel %vm1023_vm8, %v1683_v22, %v576_v28 }
 0x136   : > { %1835 = vmatpush3.bf16.msra.mxu0 %v1360_v54  ;;  %1849 = vmatpush3.bf16.msra.mxu1 %v1360_v54 }
 0x138   : > { %583 = vrot.lane.b32.xlu0 %v550_v36, %s2175_s23  ;;  %961 = vrot.lane.b32.xlu1 %v910_v50, %s2178_s10  ;;  %v2679_v36 = vpop.permute.xlu1 %885  ;;  %v936_v50 = vshrl.u32 %v1744_v30, 16  ;;  %v624_v15 = vpop.permute.xlu0 %623 }
 0x139   : > { %v1050_v53 = vsel %vm1048_vm9, %v1026_v32, %v624_v15 }
 0x13c   : > { %587 = vrot.lane.b32.xlu0 %v566_v42, %s2175_s23  ;;  %965 = vrot.lane.b32.xlu1 %v926_v45, %s2178_s10  ;;  %v938_v42 = vrot.slane %v936_v50, 4  ;;  %v2688_v21 = vpop.permute.xlu1 %973  ;;  %v1754_v45 = vcombine.low %v2418_v23, %v462_v44  ;;  %v1685_v50 = vcombine.low %v394_v38, %v2558_v25  ;;  %v1684_v44 = vcombine.low %v392_v12, %v2552_v20 }
 0x13e   : > { %v942_v48 = vor.u32 %v941_v43, %v938_v42  ;;  %v1006_v40 = vrot.slane %v1754_v45, 5 }
 0x140   : > { %775 = vrot.lane.b32.xlu0 %v742_v63, %s2182_s26  ;;  %585 = vrot.lane.b32.xlu1 %v558_v1, %s2175_s23 }
 0x144   : > { %779 = vrot.lane.b32.xlu0 %v758_v39, %s2182_s26  ;;  %589 = vrot.lane.b32.xlu1 %v574_v56, %s2175_s23 }
 0x148   : > { %967 = vrot.lane.b32.xlu0 %v934_v34, %s2178_s10  ;;  %777 = vrot.lane.b32.xlu1 %v750_v4, %s2182_s26 }
 0x14c   : > { %971 = vrot.lane.b32.xlu0 %v950_v26, %s2178_s10  ;;  %781 = vrot.lane.b32.xlu1 %v766_v2, %s2182_s26  ;;  %v396_v2 = vld [vmem:[#allocation2 + $0x24] sm:$0x8] }
 0x14e   : > { %v680_v24 = vpop.permute.xlu0 %679 }
 0x14f   : > { %v1067_v47 = vsel %vm1065_vm10, %v1050_v53, %v680_v24  ;;  %v1686_v53 = vcombine.low %v396_v2, %v2566_v31  ;;  %v2774_v2 = vld [vmem:[#allocation2 + $0x54] sm:$0x8] }
 0x150   : > { %1019 = vrot.lane.b32.xlu0 %v1005_v46, %s2181_s11  ;;  %969 = vrot.lane.b32.xlu1 %v942_v48, %s2178_s10  ;;  %s2183_s10 = smov [#allocation8]  }
 0x151   : > { %s2041_s28 = sshll.u32 %s2183_s10, 4  ;;  %s2042_s28 = int_to_ptr.vmem [resolvable:$false] %s2041_s28 }
 0x152   : > { %v2695_v51 = vpop.permute.xlu1 %681  ;;  %v684_v49 = vpop.permute.xlu0 %683  ;;  %s2043_s29 = scalar_lea.vmem %s2042_s28, 1024  ;;  %p2044_p10 = scmp.lt.s32.totalorder %s2872_s6, %s2042_s28 }
 0x153   : > { %p2045_p13 = scmp.lt.s32.totalorder %s2043_s29, %s2037_s13 }
 0x154   : > { %1021 = vrot.lane.b32.xlu1 %v1006_v40, %s2181_s11 }
 0x155   : > { %p2046_p3 = por %p2045_p13, %p2044_p10 }
 0x156   : > { %v2698_v52 = vpop.permute.xlu1 %685  ;;  %v872_v23 = vpop.permute.xlu0 %871 }
 0x157   : > { %p2047_p7 = pnand %p2046_p3, %p2040_p8 }
 0x15a   : > { %v2700_v37 = vpop.permute.xlu1 %873  ;;  %v2702_v10 = vpop.permute.xlu0 %875 }
 0x15e   : > { %v2704_v55 = vpop.permute.xlu1 %877  ;;  %v2706_v57 = vpop.permute.xlu0 %687 }
 0x162   : > { %v2708_v0 = vpop.permute.xlu1 %689  ;;  %v2710_v59 = vpop.permute.xlu0 %691 }
 0x166   : > { %v2712_v61 = vpop.permute.xlu1 %693  ;;  %v2714_v62 = vpop.permute.xlu0 %879 }
 0x16a   : > { %v2716_v63 = vpop.permute.xlu1 %881  ;;  %v2718_v1 = vpop.permute.xlu0 %883 }
 0x16e   : > { %v626_v3 = vpop.permute.xlu1 %625  ;;  %v628_v5 = vpop.permute.xlu0 %627 }
 0x172   : > { %v630_v54 = vpop.permute.xlu1 %629  ;;  %v816_v39 = vpop.permute.xlu0 %815 }
 0x176   : > { %v818_v13 = vpop.permute.xlu1 %817  ;;  %v820_v14 = vpop.permute.xlu0 %819 }
 0x17a   : > { %v2720_v16 = vpop.permute.xlu1 %821  ;;  %v1008_v17 = vpop.permute.xlu0 %1007 }
 0x17e   : > { %v2722_v18 = vpop.permute.xlu1 %1009  ;;  %v1012_v19 = vpop.permute.xlu0 %1011 }
 0x182   : > { %v2724_v56 = vpop.permute.xlu1 %1013  ;;  %v2726_v28 = vpop.permute.xlu0 %631 }
 0x186   : > { %v2728_v29 = vpop.permute.xlu1 %633  ;;  %v2730_v7 = vpop.permute.xlu0 %635 }
 0x18a   : > { %v2732_v30 = vpop.permute.xlu1 %637  ;;  %v2734_v33 = vpop.permute.xlu0 %823 }
 0x18e   : > { %v2736_v34 = vpop.permute.xlu1 %825  ;;  %v2738_v4 = vpop.permute.xlu0 %827 }
 0x192   : > { %v2740_v8 = vpop.permute.xlu1 %829  ;;  %v2742_v35 = vpop.permute.xlu0 %1015 }
 0x196   : > { %v2744_v11 = vpop.permute.xlu1 %1017  ;;  %v580_v58 = vpop.permute.xlu0 %579 }
 0x197   : > { %v1032_v22 = vsel %vm1023_vm8, %v1685_v50, %v580_v58 }
 0x198   : > { %v1054_v42 = vsel %vm1048_vm9, %v1032_v22, %v628_v5 }
 0x199   : > { %v1071_v46 = vsel %vm1065_vm10, %v1054_v42, %v684_v49 }
 0x19a   : > { %v578_v15 = vpop.permute.xlu1 %577  ;;  %v768_v41 = vpop.permute.xlu0 %767 }
 0x19b   : > { %v1084_v26 = vsel %vm1082_vm11, %v1067_v47, %v768_v41  ;;  %v1029_v43 = vsel %vm1023_vm8, %v1684_v44, %v578_v15 }
 0x19c   : > { %v1101_v25 = vsel %vm1099_vm12, %v1084_v26, %v816_v39  ;;  %v1052_v24 = vsel %vm1048_vm9, %v1029_v43, %v626_v3  ;;  %v402_v26 = vld [vmem:[#allocation2 + $0x48] sm:$0x8] }
 0x19d   : > { %v1118_v40 = vsel %vm1116_vm13, %v1101_v25, %v872_v23  ;;  %v1069_v39 = vsel %vm1065_vm10, %v1052_v24, %v2695_v51  ;;  %v1689_v24 = vcombine.low %v402_v26, %v2592_v9 }
 0x19e   : > { %v582_v32 = vpop.permute.xlu1 %581  ;;  %v772_v45 = vpop.permute.xlu0 %771 }
 0x19f   : > { %v1035_v20 = vsel %vm1023_vm8, %v1686_v53, %v582_v32  ;;  %v1088_v48 = vsel %vm1082_vm11, %v1071_v46, %v772_v45 }
 0x1a0   : > { %v1056_v38 = vsel %vm1048_vm9, %v1035_v20, %v630_v54  ;;  %v1105_v3 = vsel %vm1099_vm12, %v1088_v48, %v820_v14  ;;  %v398_v14 = vld [vmem:[#allocation2 + $0x30] sm:$0x8] }
 0x1a1   : > { %v1073_v23 = vsel %vm1065_vm10, %v1056_v38, %v2698_v52  ;;  %v1122_v51 = vsel %vm1116_vm13, %v1105_v3, %v2702_v10  ;;  %v1687_v53 = vcombine.low %v398_v14, %v2584_v60 }
 0x1a2   : > { %v770_v47 = vpop.permute.xlu1 %769  ;;  %v960_v5 = vpop.permute.xlu0 %959 }
 0x1a3   : > { %v1135_v31 = vsel %vm1133_vm14, %v1118_v40, %v960_v5  ;;  %v1086_v49 = vsel %vm1082_vm11, %v1069_v39, %v770_v47 }
 0x1a4   : > { %v1152_v58 = vsel %vm1150_vm15, %v1135_v31, %v1008_v17  ;;  %v1103_v15 = vsel %vm1099_vm12, %v1086_v49, %v818_v13  ;;  %v400_v17 = vld [vmem:[#allocation2 + $0x3c] sm:$0x8] }
 0x1a5   : > { %v1756_v50 = vcombine.high %v1152_v58, %v1152_v58  ;;  %v1120_v13 = vsel %vm1116_vm13, %v1103_v15, %v2700_v37  ;;  %v1755_v45 = vcombine.low %v1152_v58, %v1152_v58  ;;  %v1688_v46 = vcombine.low %v400_v17, %v2590_v6 }
 0x1a6   : > { %v774_v12 = vpop.permute.xlu1 %773  ;;  %v964_v22 = vpop.permute.xlu0 %963  ;;  %v1690_v37 = vcombine.low %v2774_v2, %v2598_v27 }
 0x1a7   : > { %v1090_v41 = vsel %vm1082_vm11, %v1073_v23, %v774_v12  ;;  %v1139_v54 = vsel %vm1133_vm14, %v1122_v51, %v964_v22  ;;  %v1215_v42 = vshrl.u32 %v1756_v50, 16  ;;  %v1218_v38 = vshll.u32 %v1756_v50, 16 }
 0x1a8   : > { %v1156_v44 = vsel %vm1150_vm15, %v1139_v54, %v1012_v19  ;;  %v1107_v10 = vsel %vm1099_vm12, %v1090_v41, %v2720_v16 }
 0x1a9   : > { %v1760_v43 = vcombine.high %v1156_v44, %v1156_v44  ;;  %v1217_v16 = vrot.slane %v1215_v42, 7  ;;  %v1759_v5 = vcombine.low %v1156_v44, %v1156_v44  ;;  %v1124_v60 = vsel %vm1116_vm13, %v1107_v10, %v2704_v55 }
 0x1aa   : > { %v962_v52 = vpop.permute.xlu1 %961  ;;  %v584_v32 = vpop.permute.xlu0 %583 }
 0x1ab   : > { %v1137_v25 = vsel %vm1133_vm14, %v1120_v13, %v962_v52  ;;  %v1241_v20 = vshrl.u32 %v1760_v43, 16  ;;  %v1038_v40 = vsel %vm1023_vm8, %v1687_v53, %v584_v32  ;;  %v1236_v15 = vshrl.u32 %v1759_v5, 16 }
 0x1ac   : > { %v1154_v19 = vsel %vm1150_vm15, %v1137_v25, %v2722_v18  ;;  %v1210_v18 = vshrl.u32 %v1755_v45, 16  ;;  %v1058_v3 = vsel %vm1048_vm9, %v1038_v40, %v2726_v28  ;;  %v1244_v23 = vshll.u32 %v1760_v43, 16 }
 0x1ad   : > { %v1757_v48 = vcombine.low %v1154_v19, %v1154_v19  ;;  %v1758_v47 = vcombine.high %v1154_v19, %v1154_v19  ;;  %v1243_v58 = vrot.slane %v1241_v20, 7  ;;  %v1220_v14 = vor.u32 %v1218_v38, %v1217_v16 }
 0x1ae   : > { %v966_v39 = vpop.permute.xlu1 %965  ;;  %v588_v31 = vpop.permute.xlu0 %587  ;;  %v1075_v28 = vsel %vm1065_vm10, %v1058_v3, %v2706_v57  ;;  %v1771_v17 = vrot.slane %v1210_v18, 11  ;;  %v1773_v10 = vrot.slane %v1236_v15, 11 }
 0x1af   : > { %v1228_v9 = vshrl.u32 %v1758_v47, 16  ;;  %v1141_v6 = vsel %vm1133_vm14, %v1124_v60, %v966_v39  ;;  %v1223_v27 = vshrl.u32 %v1757_v48, 16  ;;  %v1231_v51 = vshll.u32 %v1758_v47, 16 }
 0x1b0   : > { %v1158_v49 = vsel %vm1150_vm15, %v1141_v6, %v2724_v56  ;;  %v1044_v50 = vsel %vm1023_vm8, %v1689_v24, %v588_v31  ;;  %v1246_v13 = vor.u32 %v1244_v23, %v1243_v58  ;;  %v1221_v19 = vsel %vm2801_vm3, %v1771_v17, %v1220_v14 }
 0x1b1   : > { %v1230_v12 = vrot.slane %v1228_v9, 7  ;;  %v1761_v22 = vcombine.low %v1158_v49, %v1158_v49  ;;  %v1762_v55 = vcombine.high %v1158_v49, %v1158_v49  ;;  %v1772_v2 = vrot.slane %v1223_v27, 11 }
 0x1b2   : > { %v586_v41 = vpop.permute.xlu1 %585  ;;  %v776_v54 = vpop.permute.xlu0 %775  ;;  %v1062_v57 = vsel %vm1048_vm9, %v1044_v50, %v2730_v7  ;;  %v1247_v7 = vsel %vm2801_vm3, %v1773_v10, %v1246_v13 }
 0x1b3   : > { %v1249_v44 = vshrl.u32 %v1761_v22, 16  ;;  %v1254_v26 = vshrl.u32 %v1762_v55, 16  ;;  %v1092_v42 = vsel %vm1082_vm11, %v1075_v28, %v776_v54  ;;  %v1233_v43 = vor.u32 %v1231_v51, %v1230_v12 }
 0x1b4   : > { %v1257_v32 = vshll.u32 %v1762_v55, 16  ;;  %v1041_v45 = vsel %vm1023_vm8, %v1688_v46, %v586_v41  ;;  %v1109_v47 = vsel %vm1099_vm12, %v1092_v42, %v2734_v33  ;;  %v1079_v60 = vsel %vm1065_vm10, %v1062_v57, %v2710_v59 }
 0x1b5   : > { %v1256_v52 = vrot.slane %v1254_v26, 7  ;;  %v1234_v24 = vsel %vm2801_vm3, %v1772_v2, %v1233_v43  ;;  %v1774_v20 = vrot.slane %v1249_v44, 11  ;;  %v1060_v46 = vsel %vm1048_vm9, %v1041_v45, %v2728_v29 }
 0x1b6   : > { %v590_v25 = vpop.permute.xlu1 %589  ;;  %v780_v53 = vpop.permute.xlu0 %779  ;;  %v1779_v40 = vcombine.low %v1221_v19, %v1234_v24  ;;  %v1126_v33 = vsel %vm1116_vm13, %v1109_v47, %v2714_v62  ;;  %v1077_v9 = vsel %vm1065_vm10, %v1060_v46, %v2708_v0 }
 0x1b7   : > { %v1259_v48 = vor.u32 %v1257_v32, %v1256_v52  ;;  %v1047_v16 = vsel %vm1023_vm8, %v1690_v37, %v590_v25  ;;  %v1096_v37 = vsel %vm1082_vm11, %v1079_v60, %v780_v53 }
 0x1b8   : > { %1836 = vmatprep.mubr.msk.bf16.mxu0 %vm1345_vm1, %v1779_v40  ;;  %v1064_v29 = vsel %vm1048_vm9, %v1047_v16, %v2732_v30  ;;  %v1113_v27 = vsel %vm1099_vm12, %v1096_v37, %v2738_v4 }
 0x1b9   : > { %v1260_v5 = vsel %vm2801_vm3, %v1774_v20, %v1259_v48  ;;  %v1081_v30 = vsel %vm1065_vm10, %v1064_v29, %v2712_v61  ;;  %v1130_v22 = vsel %vm1116_vm13, %v1113_v27, %v2718_v1 }
 0x1ba   : > { %v778_v39 = vpop.permute.xlu1 %777  ;;  %v968_v31 = vpop.permute.xlu0 %967  ;;  %v1780_v18 = vcombine.low %v1247_v7, %v1260_v5 }
 0x1bb   : > { %v1143_v6 = vsel %vm1133_vm14, %v1126_v33, %v968_v31  ;;  %v1094_v38 = vsel %vm1082_vm11, %v1077_v9, %v778_v39 }
 0x1bc   : > { %v1160_v59 = vsel %vm1150_vm15, %v1143_v6, %v2742_v35  ;;  %1837 = vmatmul.mubr.msk.bf16.vlgmr.msra.gmra.mrb[0].mxu0 %vm1345_vm1, %v1780_v18  ;;  %v1111_v0 = vsel %vm1099_vm12, %v1094_v38, %v2736_v34 }
 0x1bd   : > { %v1764_v62 = vcombine.high %v1160_v59, %v1160_v59  ;;  %v1763_v55 = vcombine.low %v1160_v59, %v1160_v59  ;;  %v1128_v15 = vsel %vm1116_vm13, %v1111_v0, %v2716_v63 }
 0x1be   : > { %v782_v3 = vpop.permute.xlu1 %781  ;;  %v972_v49 = vpop.permute.xlu0 %971 }
 0x1bf   : > { %v1098_v58 = vsel %vm1082_vm11, %v1081_v30, %v782_v3  ;;  %v1267_v35 = vshrl.u32 %v1764_v62, 16  ;;  %v1147_v4 = vsel %vm1133_vm14, %v1130_v22, %v972_v49  ;;  %v1262_v26 = vshrl.u32 %v1763_v55, 16 }
 0x1c0   : > { %v1115_v12 = vsel %vm1099_vm12, %v1098_v58, %v2740_v8  ;;  %v1270_v2 = vshll.u32 %v1764_v62, 16 }
 0x1c1   : > { %v1132_v41 = vsel %vm1116_vm13, %v1115_v12, %v2679_v36  ;;  %v1269_v1 = vrot.slane %v1267_v35, 7  ;;  %v1775_v24 = vrot.slane %v1262_v26, 11 }
 0x1c2   : > { %v970_v61 = vpop.permute.xlu1 %969  ;;  %v1020_v23 = vpop.permute.xlu0 %1019  ;;  %v1149_v17 = vsel %vm1133_vm14, %v1132_v41, %v2688_v21 }
 0x1c3   : > { %v1145_v51 = vsel %vm1133_vm14, %v1128_v15, %v970_v61  ;;  %v1164_v34 = vsel %vm1150_vm15, %v1147_v4, %v1020_v23  ;;  %v1272_v10 = vor.u32 %v1270_v2, %v1269_v1 }
 0x1c4   : > { %v1162_v8 = vsel %vm1150_vm15, %v1145_v51, %v2744_v11  ;;  %v1768_v54 = vcombine.high %v1164_v34, %v1164_v34  ;;  %v1767_v50 = vcombine.low %v1164_v34, %v1164_v34 }
 0x1c5   : > { %v1765_v14 = vcombine.low %v1162_v8, %v1162_v8  ;;  %v1766_v44 = vcombine.high %v1162_v8, %v1162_v8  ;;  %v1273_v46 = vsel %vm2801_vm3, %v1775_v24, %v1272_v10 }
 0x1c6   : > { %v1293_v28 = vshrl.u32 %v1768_v54, 16  ;;  %v1022_v63 = vpop.permute.xlu1 %1021  ;;  %v1288_v57 = vshrl.u32 %v1767_v50, 16  ;;  %v1296_v25 = vshll.u32 %v1768_v54, 16 }
 0x1c7   : > { %v1275_v42 = vshrl.u32 %v1765_v14, 16  ;;  %v1280_v43 = vshrl.u32 %v1766_v44, 16  ;;  %v1166_v13 = vsel %vm1150_vm15, %v1149_v17, %v1022_v63  ;;  %v1283_v45 = vshll.u32 %v1766_v44, 16 }
 0x1c8   : > { %v1295_v36 = vrot.slane %v1293_v28, 7  ;;  %v1769_v52 = vcombine.low %v1166_v13, %v1166_v13  ;;  %v1770_v32 = vcombine.high %v1166_v13, %v1166_v13  ;;  %v1777_v7 = vrot.slane %v1288_v57, 11 }
 0x1c9   : > { %v1282_v11 = vrot.slane %v1280_v43, 7  ;;  %v1776_v20 = vrot.slane %v1275_v42, 11 }
 0x1ca   : > { %v1301_v53 = vshrl.u32 %v1769_v52, 16  ;;  %v1306_v19 = vshrl.u32 %v1770_v32, 16  ;;  %v1298_v21 = vor.u32 %v1296_v25, %v1295_v36  ;;  %v1309_v40 = vshll.u32 %v1770_v32, 16 }
 0x1cb   : > { %v1285_v48 = vor.u32 %v1283_v45, %v1282_v11 }
 0x1cc   : > { %v1308_v47 = vrot.slane %v1306_v19, 7  ;;  %v1778_v5 = vrot.slane %v1301_v53, 11  ;;  %v1299_v33 = vsel %vm2801_vm3, %v1777_v7, %v1298_v21 }
 0x1cd   : > { %v1286_v16 = vsel %vm2801_vm3, %v1776_v20, %v1285_v48 }
 0x1ce   : > { %v1311_v60 = vor.u32 %v1309_v40, %v1308_v47  ;;  %v1781_v39 = vcombine.low %v1273_v46, %v1286_v16 }
 0x1d0   : > { %v1312_v31 = vsel %vm2801_vm3, %v1778_v5, %v1311_v60  ;;  %1840 = vmatprep.mubr.msk.bf16.mxu1 %vm1345_vm1, %v1781_v39 }
 0x1d1   : > { %v1782_v18 = vcombine.low %v1299_v33, %v1312_v31 }
 0x1d3   : > { %1841 = vmatmul.mubr.msk.bf16.vlgmr.msra.gmra.mrb[0].mxu1 %vm1345_vm1, %v1782_v18 }
 0x28f   : > { %v1838_v29 = vpop.f32.mrb[0].mxu0 }
 0x290   : > { %v1396_v37 = vpop.f32.mrb[1].mxu0  ;;  %v1459_v56 = vmul.f32 %v1838_v29, %v1838_v29 }
 0x291   : > { %v1839_v9 = vpop.f32.mrb[2].mxu0  ;;  %v1457_v59 = vmul.f32 %v1396_v37, %v1396_v37 }
 0x292   : > { %v1808_v6 = vpack.c.bf16 %v1839_v9, %v1838_v29  ;;  %v1399_v38 = vpop.f32.mrb[3].mxu0  ;;  %v1460_v0 = vmul.f32 %v1839_v9, %v1839_v9 }
 0x293   : > { %v1803_v62 = vpack.c.bf16 %v1399_v38, %v1396_v37  ;;  %v1443_v27 = vadd.f32 %v1399_v38, %v1396_v37  ;;  %v1458_v3 = vmul.f32 %v1399_v38, %v1399_v38 }
 0x294   : > { %1820 = vst [vmem:[%s235_s24 + $0x8] sm:$0xff] %v1808_v6  }
 0x295   : > { %1804 = vst [vmem:[%s235_s24] sm:$0xff] %v1803_v62   ;;  %v1444_v30 = vadd.f32 %v1838_v29, %v1443_v27  ;;  %v1465_v49 = vadd.f32 %v1458_v3, %v1457_v59 }
 0x297   : > { %v1466_v58 = vadd.f32 %v1465_v49, %v1459_v56  ;;  %v1445_v12 = vadd.f32 %v1839_v9, %v1444_v30 }
 0x299   : > { %v1467_v35 = vadd.f32 %v1466_v58, %v1460_v0 }
 0x2a6   : > { %v1842_v22 = vpop.f32.mrb[0].mxu1 }
 0x2a7   : > { %v1412_v55 = vpop.f32.mrb[1].mxu1  ;;  %v1463_v1 = vmul.f32 %v1842_v22, %v1842_v22 }
 0x2a8   : > { %v1446_v4 = vadd.f32 %v1445_v12, %v1412_v55  ;;  %v1461_v15 = vmul.f32 %v1412_v55, %v1412_v55  ;;  %v1843_v61 = vpop.f32.mrb[2].mxu1 }
 0x2a9   : > { %v1818_v23 = vpack.c.bf16 %v1843_v61, %v1842_v22  ;;  %v1415_v51 = vpop.f32.mrb[3].mxu1 }
 0x2aa   : > { %v1468_v34 = vadd.f32 %v1467_v35, %v1461_v15  ;;  %v1813_v41 = vpack.c.bf16 %v1415_v51, %v1412_v55  ;;  %v1447_v8 = vadd.f32 %v1446_v4, %v1415_v51  ;;  %v1462_v54 = vmul.f32 %v1415_v51, %v1415_v51 }
 0x2ab   : > { %1822 = vst [vmem:[%s235_s24 + $0x18] sm:$0xff] %v1818_v23  }
 0x2ac   : > { %1821 = vst [vmem:[%s235_s24 + $0x10] sm:$0xff] %v1813_v41   ;;  %v1448_v14 = vadd.f32 %v1842_v22, %v1447_v8  ;;  %v1469_v44 = vadd.f32 %v1468_v34, %v1462_v54 }
 0x2ad   : > { %2050 = shalt.err (!%p2047_p7)
}
 0x2ae   : > { %s2051_s11 = scalar_lea.hbm %s2877_s21, 512  ;;  %s2055_s24 = scalar_lea.hbm %s2994_s2, 1024 }
 0x2af   : > { %p2052_p9 = scmp.ne.s32.totalorder %s2877_s21, %s2051_s11  ;;  %p2056_p5 = scmp.lt.u32.totalorder %s2877_s21, %s2994_s2 }
 0x2b0   : > { %p2057_p11 = scmp.lt.u32.totalorder %s2055_s24, %s2051_s11  ;;  %p2059_p4 = scmp.lt.u32.totalorder %s2051_s11, %s2877_s21 }
 0x2b1   : > { %p2053_p1 = pnand %p2052_p9, %p2308_p12 }
 0x2b2   : > { %p2058_p2 = por %p2057_p11, %p2056_p5 }
 0x2b3   : > { %p2054_p0 = pneg %p2053_p1 }
 0x2b4   : > { %p2060_p6 = por %p2059_p4, %p2058_p2 }
 0x2b6   : > { %p2061_p8 = pnand %p2060_p6, %p2054_p0 }
 0x2b8   : > { %2064 = shalt.err (!%p2061_p8)
}
 0x2b9   : > { %s2184_s9 = smov 64   ;;  %v1464_v26 = vmul.f32 %v1843_v61, %v1843_v61  ;;  %v1449_v50 = vadd.f32 %v1843_v61, %v1448_v14  ;;  %v1470_v28 = vadd.f32 %v1469_v44, %v1463_v1  ;;  %s1484_s13 = sand.u32 1, %s2233_s19  }
 0x2ba   : > { %1858 = dma.vmem_to_hbm [thread:$0]  (%p2308_p12), %s2872_s6, 512, %s2877_s21, %s1480_s12, %s2184_s9, %s2184_s9, %s2175_s23  }
 0x2bb   : > { %v1450_v63 = vrot.slane %v1449_v50, 4  ;;  %v1471_v17 = vadd.f32 %v1470_v28, %v1464_v26  ;;  %s1793_s10 = sshll.u32 %s2233_s19, 4  ;;  %s241_s28 = scalar_lea.vmem [#allocation9], %s2359_s14 }
 0x2bc   : > { %s1517_s29 = sshll.u32 %s241_s28, 4  ;;  %s247_s23 = scalar_lea.vmem [#allocation11], %s2359_s14  ;;  %s2915_s29 = int_to_ptr.vmem [resolvable:$true] %s1517_s29 }
 0x2bd   : > { %v1451_v2 = vadd.f32 %v1450_v63, %v1449_v50  ;;  %v1472_v42 = vrot.slane %v1471_v17, 4  ;;  %s1530_s6 = sshll.u32 %s247_s23, 4  ;;  %s2913_s11 = scalar_lea.hbm %s2995_s3, %s1793_s10  ;;  %s2922_s6 = int_to_ptr.vmem [resolvable:$true] %s1530_s6 }
 0x2be   : > { %s2920_s25 = scalar_lea.hbm %s2996_s4, %s1793_s10  ;;  %s2924_s24 = scalar_lea.sflag [#allocation10], %s1484_s13 }
 0x2bf   : > { %v1452_v43 = vrot.slane %v1451_v2, 2  ;;  %v1473_v13 = vadd.f32 %v1472_v42, %v1471_v17  ;;  %s2065_s7 = scalar_lea.vmem %s2915_s29, 16  ;;  %s2185_s8 = smov [#allocation9]  }
 0x2c0   : > { %p2066_p10 = scmp.ne.s32.totalorder %s2915_s29, %s2065_s7  ;;  %s2069_s9 = sshll.u32 %s2185_s8, 4  ;;  %s2070_s9 = int_to_ptr.vmem [resolvable:$false] %s2069_s9 }
 0x2c1   : > { %v1453_v36 = vadd.f32 %v1452_v43, %v1451_v2  ;;  %v1474_v52 = vrot.slane %v1473_v13, 2  ;;  %s2071_s21 = scalar_lea.vmem %s2070_s9, 32  ;;  %p2072_p7 = scmp.lt.s32.totalorder %s2915_s29, %s2070_s9 }
 0x2c2   : > { %p2067_p13 = pnand %p2066_p10, %p2308_p12  ;;  %p2073_p9 = scmp.lt.s32.totalorder %s2071_s21, %s2065_s7 }
 0x2c3   : > { %v1454_v32 = vrot.slane %v1453_v36, 1  ;;  %v1475_v11 = vadd.f32 %v1474_v52, %v1473_v13 }
 0x2c4   : > { %p2068_p3 = pneg %p2067_p13  ;;  %p2074_p1 = por %p2073_p9, %p2072_p7 }
 0x2c5   : > { %v1476_v45 = vrot.slane %v1475_v11, 1  ;;  %v1455_v10 = vadd.f32 %v1454_v32, %v1453_v36 }
 0x2c6   : > { %p2075_p0 = pnand %p2074_p1, %p2068_p3 }
 0x2c7   : > { %1456 = vst [vmem:[%s241_s28] sm:$0x1] %v1455_v10  ;;  %v1477_v57 = vadd.f32 %v1476_v45, %v1475_v11 }
 0x2c8   : > { %2078 = shalt.err (!%p2075_p0)
}
 0x2c9   : > { %s2079_s13 = scalar_lea.hbm %s2913_s11, 16  ;;  %s2083_s12 = scalar_lea.hbm %s2995_s3, 32 }
 0x2ca   : > { %p2080_p5 = scmp.ne.s32.totalorder %s2913_s11, %s2079_s13  ;;  %p2084_p4 = scmp.lt.u32.totalorder %s2913_s11, %s2995_s3 }
 0x2cb   : > { %p2085_p6 = scmp.lt.u32.totalorder %s2083_s12, %s2079_s13  ;;  %p2087_p10 = scmp.lt.u32.totalorder %s2079_s13, %s2913_s11 }
 0x2cc   : > { %p2081_p11 = pnand %p2080_p5, %p2308_p12 }
 0x2cd   : > { %p2086_p8 = por %p2085_p6, %p2084_p4 }
 0x2ce   : > { %p2082_p2 = pneg %p2081_p11 }
 0x2cf   : > { %p2088_p13 = por %p2087_p10, %p2086_p8 }
 0x2d1   : > { %p2089_p3 = pnand %p2088_p13, %p2082_p2 }
 0x2d3   : > { %2092 = shalt.err (!%p2089_p3)
}
 0x2d4   : > { %1859 = dma.vmem_to_hbm [thread:$0]  (%p2308_p12), %s2915_s29, 16, %s2913_s11, %s2924_s24   ;;  %1478 = vst [vmem:[%s247_s23] sm:$0x1] %v1477_v57 }
 0x2d5   : > { %s2093_s7 = scalar_lea.vmem %s2922_s6, 16  ;;  %s2186_s8 = smov [#allocation11]  }
 0x2d6   : > { %p2094_p7 = scmp.ne.s32.totalorder %s2922_s6, %s2093_s7  ;;  %s2097_s9 = sshll.u32 %s2186_s8, 4  ;;  %s2098_s9 = int_to_ptr.vmem [resolvable:$false] %s2097_s9 }
 0x2d7   : > { %s2099_s21 = scalar_lea.vmem %s2098_s9, 32  ;;  %p2100_p0 = scmp.lt.s32.totalorder %s2922_s6, %s2098_s9 }
 0x2d8   : > { %p2095_p9 = pnand %p2094_p7, %p2308_p12  ;;  %p2101_p5 = scmp.lt.s32.totalorder %s2099_s21, %s2093_s7 }
 0x2da   : > { %p2096_p1 = pneg %p2095_p9  ;;  %p2102_p11 = por %p2101_p5, %p2100_p0 }
 0x2dc   : > { %p2103_p2 = pnand %p2102_p11, %p2096_p1 }
 0x2de   : > { %2106 = shalt.err (!%p2103_p2)
}
 0x2df   : > { %s2107_s14 = scalar_lea.hbm %s2920_s25, 16  ;;  %s2111_s11 = scalar_lea.hbm %s2996_s4, 32 }
 0x2e0   : > { %p2108_p4 = scmp.ne.s32.totalorder %s2920_s25, %s2107_s14  ;;  %p2112_p10 = scmp.lt.u32.totalorder %s2920_s25, %s2996_s4 }
 0x2e1   : > { %p2113_p13 = scmp.lt.u32.totalorder %s2111_s11, %s2107_s14  ;;  %p2115_p7 = scmp.lt.u32.totalorder %s2107_s14, %s2920_s25 }
 0x2e2   : > { %p2109_p6 = pnand %p2108_p4, %p2308_p12 }
 0x2e3   : > { %p2114_p3 = por %p2113_p13, %p2112_p10 }
 0x2e4   : > { %p2110_p8 = pneg %p2109_p6 }
 0x2e5   : > { %p2116_p9 = por %p2115_p7, %p2114_p3 }
 0x2e7   : > { %p2117_p1 = pnand %p2116_p9, %p2110_p8 }
 0x2e9   : > { %2120 = shalt.err (!%p2117_p1)
}
 0x2ea   : > { %1860 = dma.vmem_to_hbm [thread:$0]  (%p2308_p12), %s2922_s6, 16, %s2920_s25, %s2924_s24  }
 0x2eb PF: > { %s1542_s28 = sand.u32 1, %s2155_s15   ;;  %p3017_p0 = scmp.ne.s32.totalorder %s3001_s22, 0 }
 0x2ec   : > { %p3018_p5 = scmp.ge.s32.totalorder %s2167_s18, 2  ;;  %s1543_s12 = scalar_lea.sflag [#allocation5], %s1542_s28 }
 0x2ee   : > { %p1873_p11 = pnand %p3018_p5, %p3017_p0 }
 0x2f0   : > { %2146 = dma.done.wait (!%p1873_p11), %s1543_s12, 512  }
 0x2f1   : > { %2148 = vsyncadd (!%p1873_p11), %s1543_s12, 4294966784  ;;  %s1551_s19 = sand.u32 1, %s1663_s20  }
 0x2f2   : > { %s1552_s26 = scalar_lea.sflag [#allocation10], %s1551_s19 }
 0x2f3   : > { %2150 = dma.done.wait (!%p1873_p11), %s1552_s26, 32  }
 0x2f4   : > { %2152 = vsyncadd (!%p1873_p11), %s1552_s26, 4294967264  ;;  %p22_p12 = scmp.ge.s32.totalorder %s2270_s27, 4   ;;  %s3019_s15 = smov %s2159_s16 }
 0x2f5   : > { %s3020_s16 = smov %s2163_s17  ;;  %s3021_s17 = smov %s2304_s30 }
 0x2f6   : > { %s3022_s18 = smov %s2270_s27  ;;  %24 = sbr.rel (!%p22_p12) target bundleno = 8 (0x8), region = 113 }
 0x2fd   :  { %1564 = vsyncpa [#allocation4], 1 }
 0x2fe   :  { %1566 = vsyncpa [#allocation4 + $0x1], 1 }
 0x2ff   :  { %1567 = vsyncpa [#allocation7], 1 }
 0x300   :  { %1568 = vsyncpa [#allocation5], 1 }
 0x301   :  { %1570 = vsyncpa [#allocation5 + $0x1], 1 }
 0x302   :  { %1571 = vsyncpa [#allocation10], 1 }
 0x303   :  { %1573 = vsyncpa [#allocation10 + $0x1], 1 }

// kernel: _lambda_.4
= control target key start
LH: loop header
LB: loop body
LE: loop exit
PB: predicated region body
PF: predicated region fallthrough
CT: control target
= control target key end

     0   :  { %s3017_s0 = inlined_call_operand.hbm [shape: bf16[2,8,8,128], index: 0, kind: input, shape index: {}]   ;;  %s3018_s1 = inlined_call_operand.hbm [shape: f32[2,128], index: 1, kind: input, shape index: {}]   ;;  %s3019_s2 = inlined_call_operand.hbm [shape: bf16[72,128], index: 2, kind: input, shape index: {}]   ;;  %s3020_s3 = inlined_call_operand.hbm [shape: bf16[2,8,8,128], index: 3, kind: output, shape index: {0}]   ;;  %s3021_s4 = inlined_call_operand.hbm [shape: f32[2,1,128], index: 4, kind: output, shape index: {1}]   ;;  %s3022_s5 = inlined_call_operand.hbm [shape: f32[2,1,128], index: 5, kind: output, shape index: {2}]  }
   0x1   :  { %3029 = sst [smem:[#allocation18_spill]] %s3018_s1 }
   0x2   :  { %11 = vsyncpa [#allocation4], 0 }
   0x3   :  { %13 = vsyncpa [#allocation4 + $0x1], 0 }
   0x4   :  { %14 = vsyncpa [#allocation7], 0 }
   0x5   :  { %15 = vsyncpa [#allocation5], 0 }
   0x6   :  { %17 = vsyncpa [#allocation5 + $0x1], 0 }
   0x7   :  { %18 = vsyncpa [#allocation11], 0 }
   0x8   :  { %20 = vsyncpa [#allocation11 + $0x1], 0  ;;  %s2348_s18 = smov 0   ;;  %s2350_s19 = smov 0  }
   0x9   :  { %s2352_s20 = smov 0   ;;  %s2354_s21 = smov 0  }
   0xa LB: > { %s2369_s22 = sadd.s32 4294967295, %s2298_s21   ;;  %s3028_s23 = sadd.s32 4294967294, %s2298_s21   ;;  %s2298_s21 = sphi %s2354_s21, %s3059_s21   ;;  %s2294_s20 = sphi %s2352_s20, %s3058_s20   ;;  %s2290_s19 = sphi %s2350_s19, %s3057_s19   ;;  %s2286_s18 = sphi %s2348_s18, %s3056_s18  }
   0xb   : > { %s2373_s24 = sadd.s32 1, %s2298_s21   ;;  %s33_s25 = sadd.s32 1, %s2294_s20 }
   0xc   : > { %s30_s26 = ssub.s32 %s2298_s21, %s2373_s24  ;;  %p40_p0 = scmp.ne.s32.totalorder %s2294_s20, %s2290_s19 }
   0xd   : > { %p31_p1 = scmp.eq.s32.totalorder %s30_s26, 0  ;;  %p41_p2 = scmp.eq.s32.totalorder %s2298_s21, 0 }
   0xe   : > { %p46_p3 = scmp.ne.s32.totalorder %s2290_s19, %s2286_s18  ;;  %p3023_p4 = scmp.eq.s32.totalorder %s2369_s22, 0 }
   0xf   : > { %s2385_s27 = scalar_select %p31_p1, %s2294_s20, %s33_s25  }
  0x10   : > { %p2387_p5 = por %p41_p2, %p40_p0  ;;  %p2393_p6 = por %p3023_p4, %p46_p3 }
  0x11   : > { %3030 = sst [smem:[#allocation17_spill]] %s2385_s27  ;;  %p112_p7 = scmp.eq.s32.totalorder %s2369_s22, 1 }
  0x12   : > { %s3032_s29 = scalar_select %p2393_p6, 1, 0 }
  0x13   : > { %p118_p8 = scmp.eq.s32.totalorder %s3028_s23, 1  ;;  %p1735_p9 = scmp.ge.s32.totalorder %s2298_s21, 1 }
  0x14   : > { %p177_p10 = scmp.lt.s32.totalorder %s2298_s21, 3  ;;  %p2402_p11 = por %p112_p7, %p40_p0 }
  0x15   : > { %p2406_p12 = por %p118_p8, %p46_p3  ;;  %s2300_s8 = smov [#allocation6]  }
  0x16   : > { %s3033_s30 = scalar_select %p2402_p11, 1, 0 }
  0x17   : > { %s3034_s6 = scalar_select %p2406_p12, 1, 0 }
  0x18   : > { %p2410_p13 = pnand %p1735_p9, %p177_p10  ;;  %s190_s9 = sshll.u32 %s2300_s8, 4  ;;  %s191_s9 = int_to_ptr.vmem [resolvable:$true] %s190_s9 }
  0x19   : > { %p1987_p4 = scmp.lt.s32.totalorder %s2298_s21, 2  ;;  %p3036_p0 = scmp.eq.s32.totalorder %s2369_s22, 0 }
  0x1a   : > { %s3035_s7 = scalar_select %p2410_p13, 1, 0 }
  0x1b   : > { %p1964_p2 = pneg %p2410_p13  ;;  %p2426_p3 = pnand %p1987_p4, %p2387_p5 }
  0x1c   : > { %s2301_s12 = smov [#allocation8]   ;;  %s3039_s1 = sld [smem:[#allocation18_spill]] }
  0x1d   : > { %p2420_p7 = pnand %p1964_p2, %p3036_p0  ;;  %s200_s13 = sshll.u32 %s2301_s12, 4  ;;  %s2430_s13 = int_to_ptr.vmem [resolvable:$true] %s200_s13 }
  0x1e   : > { %s3038_s11 = scalar_select %p2426_p3, 1, 0 }
  0x1f   : > { %p2084_p9 = pneg %p2420_p7 }
  0x22   : > { %s2082_s16 = scalar_lea.hbm %s3039_s1, 32 }
  0x23   : > { %p2083_p8 = scmp.ne.s32.totalorder %s3039_s1, %s2082_s16  ;;  %p2089_p10 = scmp.lt.u32.totalorder %s2082_s16, %s3039_s1 }
  0x25   : > { %p2085_p4 = pnand %p2084_p9, %p2083_p8 }
  0x27   : > { %p2086_p5 = pneg %p2085_p4 }
  0x29   : > { %p2091_p2 = pnand %p2089_p10, %p2086_p5 }
  0x2b   : > { %2094 = shalt.err (!%p2091_p2)
}
  0x2c   : > { %s2095_s8 = scalar_lea.vmem %s191_s9, 32  ;;  %p2103_p11 = scmp.lt.s32.totalorder %s191_s9, %s191_s9 }
  0x2d   : > { %p2096_p0 = scmp.ne.s32.totalorder %s191_s9, %s2095_s8  ;;  %p2104_p6 = scmp.lt.s32.totalorder %s2095_s8, %s2095_s8 }
  0x2f   : > { %p2098_p1 = pnand %p2096_p0, %p2084_p9  ;;  %p2105_p13 = por %p2104_p6, %p2103_p11 }
  0x31   : > { %p2099_p12 = pneg %p2098_p1 }
  0x33   : > { %p2106_p3 = pnand %p2105_p13, %p2099_p12 }
  0x35   : > { %2109 = shalt.err (!%p2106_p3)
}
  0x36   : > { %1967 = dma.hbm_to_vmem [thread:$0]  (!%p2420_p7), %s3039_s1, 32, %s191_s9, [#allocation7]  }
  0x37   : > { %s214_s15 = sand.u32 1, %s2294_s20   ;;  %s2110_s25 = scalar_lea.hbm %s3019_s2, 576 }
  0x38   : > { %p2111_p1 = scmp.ne.s32.totalorder %s3019_s2, %s2110_s25  ;;  %p2117_p12 = scmp.lt.u32.totalorder %s2110_s25, %s3019_s2 }
  0x3a   : > { %p2113_p6 = pnand %p2111_p1, %p2084_p9 }
  0x3c   : > { %p2114_p11 = pneg %p2113_p6 }
  0x3e   : > { %p2119_p13 = pnand %p2117_p12, %p2114_p11 }
  0x40   : > { %2122 = shalt.err (!%p2119_p13)
}
  0x41   : > { %s2123_s9 = scalar_lea.vmem %s2430_s13, 576  ;;  %p2131_p5 = scmp.lt.s32.totalorder %s2430_s13, %s2430_s13 }
  0x42   : > { %p2124_p3 = scmp.ne.s32.totalorder %s2430_s13, %s2123_s9  ;;  %p2132_p10 = scmp.lt.s32.totalorder %s2123_s9, %s2123_s9 }
  0x44   : > { %p2126_p8 = pnand %p2124_p3, %p2084_p9  ;;  %p2133_p2 = por %p2132_p10, %p2131_p5 }
  0x46   : > { %p2127_p4 = pneg %p2126_p8 }
  0x48   : > { %p2134_p0 = pnand %p2133_p2, %p2127_p4 }
  0x4a   : > { %2137 = shalt.err (!%p2134_p0)
}
  0x4b   : > { %s2302_s23 = smov 64   ;;  %s2303_s12 = smov 4  }
  0x4c   : > { %1970 = dma.hbm_to_vmem [thread:$0]  (!%p2420_p7), %s3019_s2, 576, %s2430_s13, [#allocation7], %s2302_s23, %s2302_s23, %s2303_s12  }
  0x4d   : > { %s1739_s17 = sshll.u32 %s214_s15, 5  ;;  %s1865_s25 = sshll.u32 %s2298_s21, 9 }
  0x4e   : > { %s2487_s8 = scalar_lea.hbm %s3017_s0, %s1865_s25  ;;  %s218_s9 = scalar_lea.vmem [#allocation3], %s1739_s17 }
  0x4f   : > { %s225_s10 = sshll.u32 %s218_s9, 4  ;;  %s2491_s1 = scalar_lea.sflag [#allocation4], %s214_s15  ;;  %s2489_s10 = int_to_ptr.vmem [resolvable:$true] %s225_s10 }
  0x50   : > { %s2138_s27 = scalar_lea.hbm %s2487_s8, 512  ;;  %p3040_p7 = scmp.ne.s32.totalorder %s3038_s11, 0 }
  0x51   : > { %p2139_p9 = scmp.ne.s32.totalorder %s2487_s8, %s2138_s27  ;;  %s2143_s16 = scalar_lea.hbm %s3017_s0, 1024 }
  0x52   : > { %p2140_p1 = pneg %p3040_p7  ;;  %p2144_p12 = scmp.lt.u32.totalorder %s2487_s8, %s3017_s0 }
  0x53   : > { %p2145_p13 = scmp.lt.u32.totalorder %s2143_s16, %s2138_s27  ;;  %p2147_p8 = scmp.lt.u32.totalorder %s2138_s27, %s2487_s8 }
  0x54   : > { %p2141_p6 = pnand %p2140_p1, %p2139_p9 }
  0x55   : > { %p2146_p3 = por %p2145_p13, %p2144_p12 }
  0x56   : > { %p2142_p11 = pneg %p2141_p6 }
  0x57   : > { %p2148_p4 = por %p2147_p8, %p2146_p3 }
  0x59   : > { %p2149_p5 = pnand %p2148_p4, %p2142_p11 }
  0x5b   : > { %2152 = shalt.err (!%p2149_p5)
}
  0x5c   : > { %s2153_s15 = scalar_lea.vmem %s2489_s10, 512  ;;  %s2304_s17 = smov [#allocation3]  }
  0x5d   : > { %p2154_p10 = scmp.ne.s32.totalorder %s2489_s10, %s2153_s15  ;;  %s2158_s28 = sshll.u32 %s2304_s17, 4  ;;  %s2159_s28 = int_to_ptr.vmem [resolvable:$false] %s2158_s28 }
  0x5e   : > { %s2160_s9 = scalar_lea.vmem %s2159_s28, 1024  ;;  %p2161_p9 = scmp.lt.s32.totalorder %s2489_s10, %s2159_s28 }
  0x5f   : > { %p2156_p2 = pnand %p2154_p10, %p2140_p1  ;;  %p2162_p6 = scmp.lt.s32.totalorder %s2160_s9, %s2153_s15 }
  0x61   : > { %p2157_p0 = pneg %p2156_p2  ;;  %p2163_p12 = por %p2162_p6, %p2161_p9 }
  0x63   : > { %p2164_p13 = pnand %p2163_p12, %p2157_p0 }
  0x65   : > { %2167 = shalt.err (!%p2164_p13)
}
  0x66   : > { %1974 = dma.hbm_to_vmem [thread:$0]  (!%p3040_p7), %s2487_s8, 512, %s2489_s10, %s2491_s1, %s2302_s23, %s2302_s23, %s2303_s12  }
  0x67   : > { %p3041_p1 = scmp.ne.s32.totalorder %s3035_s7, 0 }
  0x68   : > { %s2525_s27 = sand.u32 (!%p3041_p1), 1, %s2290_s19   ;;  %p3042_p11 = scmp.ne.s32.totalorder (!%p3041_p1), %s3032_s29, 0 }
  0x69   : > { %237 = sbr.rel (%p3041_p1) target bundleno = 672 (0x2a0), region = 32  ;;  %s1743_s13 = sshll.u32 (!%p3041_p1), %s2525_s27, 5 }
  0x6a   : > { %s240_s14 = scalar_lea.sflag (!%p3041_p1), [#allocation4], %s2525_s27  ;;  %s2531_s11 = scalar_lea.vmem (!%p3041_p1), [#allocation3], %s1743_s13 }
  0x70   : > { %2269 = dma.done.wait (%p3042_p11), %s240_s14, 512  }
  0x71   : > { %2271 = vsyncadd (%p3042_p11), %s240_s14, 4294966784  ;;  %p3043_p7 = scmp.eq.s32.totalorder %s2369_s22, 0 }
  0x73   : > { %2273 = dma.done.wait (%p3043_p7), [#allocation7], 608   ;;  %p3044_p3 = pmov %p3043_p7 }
  0x74   : > { %vm353_vm0 = vcmask 60416   ;;  %v2305_v0 = vmov 0   ;;  %vm356_vm1 = vcmask 57344   ;;  %vm357_vm2 = vsmask.f32 256  ;;  %v1868_v4 = vld [vmem:[%s2531_s11] sm:$0xff]  }
  0x75   : > { %2275 = vsyncadd (%p3044_p3), [#allocation7], 4294966688  ;;  %355 = vst.msk [vmem:[#allocation2 + $0x4] sm:$0xf] %vm353_vm0, %v2305_v0  ;;  %vm369_vm3 = vcmask 60419   ;;  %v1870_v8 = vunpack.c.h.bf16 %v1868_v4  ;;  %v1869_v10 = vunpack.c.l.bf16 %v1868_v4  ;;  %v1903_v11 = vld [vmem:[%s2531_s11 + $0x8] sm:$0xff]  }
  0x76   : > { %354 = vst.msk [vmem:[#allocation2] sm:$0xf] %vm353_vm0, %v2305_v0  ;;  %363 = vst.msk [vmem:[#allocation2 + $0x6c] sm:$0xf] %vm353_vm0, %v2305_v0  ;;  %vm370_vm4 = vsmask.f32 7950  ;;  %v1874_v15 = vunpack.c.h.bf16 %v1903_v11  ;;  %v1873_v17 = vunpack.c.l.bf16 %v1903_v11 }
  0x77   : > { %364 = vst.msk [vmem:[#allocation2 + $0x70] sm:$0xf] %vm353_vm0, %v2305_v0  ;;  %vm2546_vm5 = vmand %vm356_vm1, %vm357_vm2  ;;  %v359_v3 = vld [vmem:[#allocation2 + $0x8] sm:$0x1]  ;;  %v2555_v5 = vld [vmem:[#allocation6] ss:$0 sm:$0xff] }
  0x78   : > { %vm2550_vm6 = vmand %vm369_vm3, %vm370_vm4  ;;  %v360_v7 = vsel %vm2546_vm5, 0, %v359_v3  ;;  %v2561_v9 = vld [vmem:[#allocation6 + $0x1] ss:$0 sm:$0xff]  ;;  %v375_v13 = vld [vmem:[#allocation2 + $0x18] sm:$0x8]  ;;  %v309_v18 = vmul.f32 %v1870_v8, %v2555_v5  ;;  %v308_v20 = vmul.f32 %v1869_v10, %v2555_v5  ;;  %v311_v26 = vmul.f32 %v1874_v15, %v2555_v5  ;;  %s2306_s1 = smov 8  }
  0x79   : > { %361 = vst [vmem:[#allocation2 + $0x8] sm:$0x1] %v360_v7  ;;  %v372_v14 = vld [vmem:[#allocation2 + $0xc] sm:$0x8]  ;;  %v381_v16 = vld [vmem:[#allocation2 + $0x30] sm:$0x8]  ;;  %v310_v30 = vmul.f32 %v1873_v17, %v2555_v5 }
  0x7a   : > { %v376_v19 = vsel %vm2550_vm6, 0, %v375_v13  ;;  %v373_v21 = vsel %vm2550_vm6, 0, %v372_v14  ;;  %v378_v22 = vld [vmem:[#allocation2 + $0x24] sm:$0x8]  ;;  %v399_v23 = vld [vmem:[#allocation2 + $0x20] sm:$0x1]  ;;  %v322_v28 = vadd.f32 %v2561_v9, %v309_v18  ;;  %v321_v29 = vadd.f32 %v2561_v9, %v308_v20 }
  0x7b   : > { %377 = vst [vmem:[#allocation2 + $0x18] sm:$0x8] %v376_v19  ;;  %374 = vst [vmem:[#allocation2 + $0xc] sm:$0x8] %v373_v21  ;;  %v382_v27 = vsel %vm2550_vm6, 0, %v381_v16  ;;  %v379_v31 = vsel %vm2550_vm6, 0, %v378_v22  ;;  %v324_v35 = vadd.f32 %v2561_v9, %v311_v26  ;;  %v323_v42 = vadd.f32 %v2561_v9, %v310_v30 }
  0x7c   : > { %v2557_v6 = vld [vmem:[#allocation2 + $0x4] sm:$0xf]  ;;  %383 = vst [vmem:[#allocation2 + $0x30] sm:$0x8] %v382_v27  ;;  %v396_v32 = vld [vmem:[#allocation2 + $0x14] sm:$0x1] }
  0x7d   : > { %v1757_v12 = vcombine.low %v2557_v6, %v2557_v6  ;;  %380 = vst [vmem:[#allocation2 + $0x24] sm:$0x8] %v379_v31  ;;  %v400_v36 = vsel %vm2546_vm5, 0, %v399_v23  ;;  %v402_v37 = vld [vmem:[#allocation2 + $0x2c] sm:$0x1]  ;;  %vm330_vm7 = vcmp.ge.f32.partialorder %v322_v28, 0.0 }
  0x7e   : > { %v338_v38 = vmul.f32 0.01, %v322_v28  ;;  %vm329_vm8 = vcmp.ge.f32.partialorder %v321_v29, 0.0  ;;  %v337_v39 = vmul.f32 0.01, %v321_v29  ;;  %vm332_vm9 = vcmp.ge.f32.partialorder %v324_v35, 0.0 }
  0x7f   : > { %v558_v24 = vshrl.u32 %v1757_v12, 16  ;;  %v561_v25 = vshll.u32 %v1757_v12, 16  ;;  %401 = vst [vmem:[#allocation2 + $0x20] sm:$0x1] %v400_v36  ;;  %v340_v41 = vmul.f32 0.01, %v324_v35 }
  0x80   : > { %v405_v43 = vld [vmem:[#allocation2 + $0x38] sm:$0x1]  ;;  %v452_v44 = vld [vmem:[#allocation2 + $0x8] sm:$0x1]  ;;  %v346_v45 = vsel %vm330_vm7, %v322_v28, %v338_v38  ;;  %v345_v46 = vsel %vm329_vm8, %v321_v29, %v337_v39  ;;  %v397_v47 = vsel %vm2546_vm5, 0, %v396_v32  ;;  %v403_v48 = vsel %vm2546_vm5, 0, %v402_v37 }
  0x81   : > { %v560_v33 = vrot.slane %v558_v24, 4  ;;  %v563_v34 = vrot.slane %v561_v25, 5  ;;  %v384_v49 = vld [vmem:[#allocation2 + $0x3c] sm:$0x8]  ;;  %v1765_v50 = vcombine.low %v2557_v6, %v452_v44  ;;  %v421_v51 = vpack.c.bf16 %v346_v45, %v346_v45  ;;  %398 = vst [vmem:[#allocation2 + $0x14] sm:$0x1] %v397_v47 }
  0x82   : > { %v420_v52 = vpack.c.bf16 %v345_v46, %v345_v46  ;;  %v348_v53 = vsel %vm332_vm9, %v324_v35, %v340_v41  ;;  %404 = vst [vmem:[#allocation2 + $0x2c] sm:$0x1] %v403_v48  ;;  %vm331_vm10 = vcmp.ge.f32.partialorder %v323_v42, 0.0  ;;  %v406_v55 = vsel %vm2546_vm5, 0, %v405_v43  ;;  %v408_v59 = vld [vmem:[#allocation2 + $0x44] sm:$0x1] }
  0x83   : > { %v564_v40 = vor.u32 %v563_v34, %v560_v33  ;;  %v423_v54 = vpack.c.bf16 %v348_v53, %v348_v53  ;;  %v661_v56 = vrot.slane %v1765_v50, 5  ;;  %429 = vst.msk [vmem:[#allocation2 + $0x1c] sm:$0xf] %vm353_vm0, %v421_v51  ;;  %v339_v57 = vmul.f32 0.01, %v323_v42  ;;  %s2307_s29 = smov 16  }
  0x84   : > { %428 = vst.msk [vmem:[#allocation2 + $0x10] sm:$0xf] %vm353_vm0, %v420_v52  ;;  %407 = vst [vmem:[#allocation2 + $0x38] sm:$0x1] %v406_v55  ;;  %v385_v58 = vsel %vm2550_vm6, 0, %v384_v49  ;;  %v409_v3 = vsel %vm2546_vm5, 0, %v408_v59 }
  0x85   : > { %621 = vrot.lane.b32.xlu0 %v564_v40, %s2306_s1  ;;  %431 = vst.msk [vmem:[#allocation2 + $0x34] sm:$0xf] %vm353_vm0, %v423_v54  ;;  %386 = vst [vmem:[#allocation2 + $0x3c] sm:$0x8] %v385_v58  ;;  %v411_v60 = vld [vmem:[#allocation2 + $0x50] sm:$0x1]  ;;  %v347_v63 = vsel %vm331_vm10, %v323_v42, %v339_v57 }
  0x86   : > { %v414_v61 = vld [vmem:[#allocation2 + $0x5c] sm:$0x1]  ;;  %v390_v62 = vld [vmem:[#allocation2 + $0x54] sm:$0x8]  ;;  %v422_v0 = vpack.c.bf16 %v347_v63, %v347_v63  ;;  %v2602_v4 = vld [vmem:[%s2531_s11 + $0x10] sm:$0xff]   ;;  %v412_v6 = vsel %vm2546_vm5, 0, %v411_v60 }
  0x87   : > { %410 = vst [vmem:[#allocation2 + $0x44] sm:$0x1] %v409_v3  ;;  %v415_v7 = vsel %vm2546_vm5, 0, %v414_v61  ;;  %v391_v8 = vsel %vm2550_vm6, 0, %v390_v62  ;;  %v462_v10 = vld [vmem:[#allocation2 + $0x18] sm:$0x8]  ;;  %v1877_v17 = vunpack.c.l.bf16 %v2602_v4  ;;  %v1878_v45 = vunpack.c.h.bf16 %v2602_v4 }
  0x88   : > { %v460_v11 = vld [vmem:[#allocation2 + $0xc] sm:$0x8]  ;;  %430 = vst.msk [vmem:[#allocation2 + $0x28] sm:$0xf] %vm353_vm0, %v422_v0  ;;  %413 = vst [vmem:[#allocation2 + $0x50] sm:$0x1] %v412_v6 }
  0x89   : > { %669 = vrot.lane.b32.xlu0 %v661_v56, %s2307_s29  ;;  %416 = vst [vmem:[#allocation2 + $0x5c] sm:$0x1] %v415_v7  ;;  %392 = vst [vmem:[#allocation2 + $0x54] sm:$0x8] %v391_v8  ;;  %v466_v12 = vld [vmem:[#allocation2 + $0x30] sm:$0x8]  ;;  %v312_v29 = vmul.f32 %v1877_v17, %v2555_v5  ;;  %v313_v60 = vmul.f32 %v1878_v45, %v2555_v5 }
  0x8a   : > { %v454_v13 = vld [vmem:[#allocation2 + $0x20] sm:$0x1]  ;;  %v463_v14 = vld [vmem:[#allocation2 + $0x1c] sm:$0xf]  ;;  %v453_v16 = vld [vmem:[#allocation2 + $0x14] sm:$0x1] }
  0x8b   : > { %v461_v15 = vld [vmem:[#allocation2 + $0x10] sm:$0xf]  ;;  %v1774_v18 = vcombine.low %v462_v10, %v463_v14  ;;  %v2614_v21 = vld [vmem:[#allocation2 + $0x1c] sm:$0xf]  ;;  %s2308_s7 = smov 24   ;;  %v325_v44 = vadd.f32 %v2561_v9, %v312_v29  ;;  %v1782_v59 = vcombine.low %v463_v14, %v463_v14  ;;  %s2309_s23 = smov 40  }
  0x8c   : > { %v1773_v19 = vcombine.low %v460_v11, %v461_v15  ;;  %v2612_v20 = vld [vmem:[#allocation2 + $0x34] sm:$0xf]  ;;  %v2616_v22 = vld [vmem:[#allocation2 + $0x10] sm:$0xf]  ;;  %v464_v24 = vld [vmem:[#allocation2 + $0x24] sm:$0x8]  ;;  %v1767_v27 = vcombine.low %v2614_v21, %v454_v13  ;;  %v1759_v35 = vcombine.low %v2614_v21, %v2614_v21  ;;  %v1781_v41 = vcombine.low %v461_v15, %v461_v15 }
  0x8d   : > { %727 = vrot.lane.b32.xlu1 %v1774_v18, %s2308_s7  ;;  %v1776_v23 = vcombine.low %v466_v12, %v2612_v20  ;;  %v1766_v25 = vcombine.low %v2616_v22, %v453_v16  ;;  %v1758_v26 = vcombine.low %v2616_v22, %v2616_v22  ;;  %v455_v28 = vld [vmem:[#allocation2 + $0x2c] sm:$0x1]  ;;  %v476_v31 = vld [vmem:[#allocation2 + $0x14] sm:$0x1]  ;;  %v477_v39 = vld [vmem:[#allocation2 + $0x20] sm:$0x1]  ;;  %v326_v16 = vadd.f32 %v2561_v9, %v313_v60 }
  0x8e   : > { %725 = vrot.lane.b32.xlu0 %v1773_v19, %s2308_s7  ;;  %v2634_v36 = vld [vmem:[%s2531_s11 + $0x18] sm:$0xff]   ;;  %v663_v42 = vrot.slane %v1767_v27, 5  ;;  %v1789_v43 = vcombine.low %v461_v15, %v476_v31  ;;  %v1790_v47 = vcombine.low %v463_v14, %v477_v39  ;;  %v574_v49 = vshrl.u32 %v1759_v35, 16  ;;  %v387_v29 = vld [vmem:[#allocation2 + $0x48] sm:$0x8]  ;;  %s2310_s12 = smov 32  }
  0x8f   : > { %v2626_v30 = vld [vmem:[#allocation2 + $0x28] sm:$0xf]  ;;  %v566_v34 = vshrl.u32 %v1758_v26, 16  ;;  %v662_v37 = vrot.slane %v1766_v25, 5  ;;  %v569_v40 = vshll.u32 %v1758_v26, 16  ;;  %v1881_v46 = vunpack.c.l.bf16 %v2634_v36  ;;  %s2311_s8 = smov 48  }
  0x90   : > { %v2628_v32 = vld [vmem:[#allocation2 + $0x28] sm:$0xf]  ;;  %v1775_v33 = vcombine.low %v464_v24, %v2626_v30  ;;  %v577_v50 = vshll.u32 %v1759_v35, 16  ;;  %v750_v53 = vshrl.u32 %v1781_v41, 16  ;;  %v853_v55 = vrot.slane %v1789_v43, 5  ;;  %s2312_s10 = smov 56  }
  0x91   : > { %731 = vrot.lane.b32.xlu1 %v1776_v23, %s2308_s7  ;;  %v1768_v38 = vcombine.low %v2628_v32, %v455_v28  ;;  %v568_v48 = vrot.slane %v566_v34, 4  ;;  %v571_v52 = vrot.slane %v569_v40, 5  ;;  %v1760_v54 = vcombine.low %v2628_v32, %v2628_v32  ;;  %v478_v28 = vld [vmem:[#allocation2 + $0x2c] sm:$0x1]  ;;  %v489_v60 = vld [vmem:[#allocation2 + $0x30] sm:$0x8] }
  0x92   : > { %729 = vrot.lane.b32.xlu0 %v1775_v33, %s2308_s7  ;;  %v753_v56 = vshll.u32 %v1781_v41, 16  ;;  %v1783_v57 = vcombine.low %v2626_v30, %v2626_v30  ;;  %v341_v58 = vmul.f32 0.01, %v325_v44  ;;  %vm333_vm11 = vcmp.ge.f32.partialorder %v325_v44, 0.0  ;;  %v487_v2 = vld [vmem:[#allocation2 + $0x24] sm:$0x8] }
  0x93   : > { %v664_v51 = vrot.slane %v1768_v38, 5  ;;  %v854_v61 = vrot.slane %v1790_v47, 5  ;;  %v576_v62 = vrot.slane %v574_v49, 4  ;;  %v579_v63 = vrot.slane %v577_v50, 5  ;;  %v2668_v49 = vld [vmem:[#allocation2 + $0x1c] sm:$0xf] }
  0x94   : > { %v314_v0 = vmul.f32 %v1881_v46, %v2555_v5  ;;  %v572_v3 = vor.u32 %v571_v52, %v568_v48  ;;  %v752_v4 = vrot.slane %v750_v53, 4  ;;  %v582_v6 = vshrl.u32 %v1760_v54, 16  ;;  %s2313_s16 = smov 64   ;;  %v456_v1 = vld [vmem:[#allocation2 + $0x38] sm:$0x1]  ;;  %s273_s25 = scalar_lea.vmem [#allocation9], %s1743_s13 }
  0x95   : > { %671 = vrot.lane.b32.xlu1 %v662_v37, %s2307_s29  ;;  %v585_v7 = vshll.u32 %v1760_v54, 16  ;;  %v755_v8 = vrot.slane %v753_v56, 5  ;;  %v766_v10 = vshrl.u32 %v1783_v57, 16  ;;  %v769_v11 = vshll.u32 %v1783_v57, 16  ;;  %v393_v54 = vld [vmem:[#allocation2 + $0x60] sm:$0x8] }
  0x96   : > { %673 = vrot.lane.b32.xlu0 %v663_v42, %s2307_s29  ;;  %v349_v12 = vsel %vm333_vm11, %v325_v44, %v341_v58  ;;  %v758_v13 = vshrl.u32 %v1782_v59, 16  ;;  %v1784_v14 = vcombine.low %v2612_v20, %v2612_v20  ;;  %v761_v17 = vshll.u32 %v1782_v59, 16  ;;  %v2677_v56 = vld [vmem:[#allocation2 + $0x34] sm:$0xf]  ;;  %v417_v58 = vld [vmem:[#allocation2 + $0x68] sm:$0x1] }
  0x97   : > { %v424_v15 = vpack.c.bf16 %v349_v12, %v349_v12  ;;  %v580_v18 = vor.u32 %v579_v63, %v576_v62  ;;  %v584_v19 = vrot.slane %v582_v6, 4  ;;  %v587_v23 = vrot.slane %v585_v7, 5  ;;  %s1563_s26 = sshll.u32 %s273_s25, 4  ;;  %s1866_s15 = sshll.u32 %s2369_s22, 9  ;;  %s2896_s26 = int_to_ptr.vmem [resolvable:$true] %s1563_s26 }
  0x98   : > { %v1882_v24 = vunpack.c.h.bf16 %v2634_v36  ;;  %v756_v25 = vor.u32 %v755_v8, %v752_v4  ;;  %v768_v26 = vrot.slane %v766_v10, 4  ;;  %v771_v27 = vrot.slane %v769_v11, 5  ;;  %v2687_v4 = vld [vmem:[#allocation2 + $0x28] sm:$0xf]  ;;  %s2901_s9 = scalar_lea.hbm %s3020_s3, %s1866_s15  ;;  %s1542_s13 = scalar_lea.sflag [#allocation5], %s2525_s27 }
  0x99   : > { %675 = vrot.lane.b32.xlu1 %v664_v51, %s2307_s29  ;;  %432 = vst.msk [vmem:[#allocation2 + $0x40] sm:$0xf] %vm353_vm0, %v424_v15  ;;  %v760_v31 = vrot.slane %v758_v13, 4  ;;  %v774_v33 = vshrl.u32 %v1784_v14, 16  ;;  %vm334_vm12 = vcmp.ge.f32.partialorder %v326_v16, 0.0  ;;  %v327_v34 = vadd.f32 %v2561_v9, %v314_v0  ;;  %s2168_s14 = scalar_lea.vmem %s2896_s26, 512 }
  0x9a   : > { %861 = vrot.lane.b32.xlu0 %v853_v55, %s2309_s23  ;;  %v763_v35 = vrot.slane %v761_v17, 5  ;;  %v777_v37 = vshll.u32 %v1784_v14, 16  ;;  %v588_v38 = vor.u32 %v587_v23, %v584_v19  ;;  %v342_v39 = vmul.f32 0.01, %v326_v16  ;;  %v479_v51 = vld [vmem:[#allocation2 + $0x38] sm:$0x1]  ;;  %p2169_p8 = scmp.ne.s32.totalorder %s2896_s26, %s2168_s14 }
  0x9b   : > { %v315_v36 = vmul.f32 %v1882_v24, %v2555_v5  ;;  %v772_v40 = vor.u32 %v771_v27, %v768_v26  ;;  %v1791_v41 = vcombine.low %v2626_v30, %v478_v28  ;;  %vm335_vm13 = vcmp.ge.f32.partialorder %v327_v34, 0.0  ;;  %v485_v5 = vld [vmem:[#allocation2 + $0x18] sm:$0x8]  ;;  %v491_v26 = vld [vmem:[#allocation2 + $0x3c] sm:$0x8]  ;;  %p3051_p4 = scmp.ne.s32.totalorder %s3033_s30, 0 }
  0x9c   : > { %v350_v42 = vsel %vm334_vm12, %v326_v16, %v342_v39  ;;  %v343_v43 = vmul.f32 0.01, %v327_v34  ;;  %v388_v44 = vsel %vm2550_vm6, 0, %v387_v29  ;;  %v764_v46 = vor.u32 %v763_v35, %v760_v31  ;;  %v2696_v16 = vld [vmem:[#allocation2 + $0x34] sm:$0xf]  ;;  %s2314_s11 = smov [#allocation9]  }
  0x9d   : > { %863 = vrot.lane.b32.xlu1 %v854_v61, %s2309_s23  ;;  %v425_v45 = vpack.c.bf16 %v350_v42, %v350_v42  ;;  %389 = vst [vmem:[#allocation2 + $0x48] sm:$0x8] %v388_v44  ;;  %v776_v47 = vrot.slane %v774_v33, 4  ;;  %v779_v48 = vrot.slane %v777_v37, 5  ;;  %v328_v50 = vadd.f32 %v2561_v9, %v315_v36  ;;  %v501_v31 = vld [vmem:[#allocation2 + $0x20] sm:$0x1]  ;;  %p2170_p5 = pnand %p2169_p8, %p3051_p4 }
  0x9e   : > { %623 = vrot.lane.b32.xlu0 %v572_v3, %s2306_s1  ;;  %v855_v30 = vrot.slane %v1791_v41, 5  ;;  %v1805_v52 = vcombine.low %v2668_v49, %v2668_v49  ;;  %v351_v53 = vsel %vm335_vm13, %v327_v34, %v343_v43  ;;  %v1797_v55 = vcombine.low %v485_v5, %v2668_v49  ;;  %v2076_v44 = vld [vmem:[#allocation8] sm:$0xff]  }
  0x9f   : > { %433 = vst.msk [vmem:[#allocation2 + $0x4c] sm:$0xf] %vm353_vm0, %v425_v45  ;;  %v426_v57 = vpack.c.bf16 %v351_v53, %v351_v53  ;;  %v780_v9 = vor.u32 %v779_v48, %v776_v47  ;;  %v1792_v59 = vcombine.low %v2612_v20, %v479_v51  ;;  %v1807_v61 = vcombine.low %v2677_v56, %v2677_v56  ;;  %v2077_v53 = vld [vmem:[#allocation8 + $0x8] sm:$0xff]   ;;  %p2171_p10 = pneg %p2170_p5 }
  0xa0   : > { %vm336_vm14 = vcmp.ge.f32.partialorder %v328_v50, 0.0  ;;  %v942_v62 = vshrl.u32 %v1805_v52, 16  ;;  %v945_v63 = vshll.u32 %v1805_v52, 16  ;;  %v344_v0 = vmul.f32 0.01, %v328_v50  ;;  %1918 = vmatprep.subr.bf16.mxu0 %v2076_v44  ;;  %1936 = vmatprep.subr.bf16.mxu1 %v2076_v44 }
  0xa1   : > { %625 = vrot.lane.b32.xlu1 %v580_v18, %s2306_s1  ;;  %434 = vst.msk [vmem:[#allocation2 + $0x58] sm:$0xf] %vm353_vm0, %v426_v57  ;;  %v394_v3 = vsel %vm2550_vm6, 0, %v393_v54  ;;  %v418_v20 = vsel %vm2546_vm5, 0, %v417_v58  ;;  %v1806_v6 = vcombine.low %v2687_v4, %v2687_v4  ;;  %v856_v8 = vrot.slane %v1792_v59, 5  ;;  %1919 = vmatpush3.bf16.msra.mxu0 %v2076_v44 }
  0xa2   : > { %813 = vrot.lane.b32.xlu0 %v756_v25, %s2310_s12  ;;  %395 = vst [vmem:[#allocation2 + $0x60] sm:$0x8] %v394_v3  ;;  %v352_v7 = vsel %vm336_vm14, %v328_v50, %v344_v0  ;;  %419 = vst [vmem:[#allocation2 + $0x68] sm:$0x1] %v418_v20  ;;  %v1799_v10 = vcombine.low %v489_v60, %v2677_v56  ;;  %v944_v12 = vrot.slane %v942_v62, 4  ;;  %v947_v13 = vrot.slane %v945_v63, 5 }
  0xa3   : > { %v427_v11 = vpack.c.bf16 %v352_v7, %v352_v7  ;;  %v958_v14 = vshrl.u32 %v1807_v61, 16  ;;  %v961_v15 = vshll.u32 %v1807_v61, 16  ;;  %v2699_v17 = vld [vmem:[#allocation2 + $0x40] sm:$0xf]  ;;  %v950_v18 = vshrl.u32 %v1806_v6, 16  ;;  %1941 = vmatpush3.bf16.msra.mxu1 %v2076_v44  ;;  %1920 = vmatprep.subr.bf16.mxu0 %v2077_v53  ;;  %v2078_v0 = vld [vmem:[#allocation8 + $0x10] sm:$0xff]  }
  0xa4   : > { %v1798_v19 = vcombine.low %v487_v2, %v2687_v4  ;;  %v953_v23 = vshll.u32 %v1806_v6, 16  ;;  %v1808_v24 = vcombine.low %v2699_v17, %v2699_v17  ;;  %v948_v25 = vor.u32 %v947_v13, %v944_v12  ;;  %v2712_v42 = vld [vmem:[#allocation2 + $0x40] sm:$0xf]  ;;  %v503_v52 = vld [vmem:[#allocation2 + $0x38] sm:$0x1]  ;;  %1937 = vmatprep.subr.bf16.mxu1 %v2077_v53 }
  0xa5   : > { %627 = vrot.lane.b32.xlu1 %v588_v38, %s2306_s1  ;;  %435 = vst.msk [vmem:[#allocation2 + $0x64] sm:$0xf] %vm353_vm0, %v427_v11  ;;  %v960_v27 = vrot.slane %v958_v14, 4  ;;  %v963_v28 = vrot.slane %v961_v15, 5  ;;  %v1761_v29 = vcombine.low %v2696_v16, %v2696_v16  ;;  %v952_v33 = vrot.slane %v950_v18, 4  ;;  %1921 = vmatpush3.bf16.msra.mxu0 %v2077_v53  ;;  %v2079_v2 = vld [vmem:[#allocation8 + $0x18] sm:$0xff]  }
  0xa6   : > { %817 = vrot.lane.b32.xlu0 %v772_v40, %s2310_s12  ;;  %v1800_v34 = vcombine.low %v491_v26, %v2699_v17  ;;  %v955_v35 = vrot.slane %v953_v23, 5  ;;  %v966_v37 = vshrl.u32 %v1808_v24, 16  ;;  %v969_v38 = vshll.u32 %v1808_v24, 16  ;;  %v2714_v43 = vld [vmem:[#allocation2 + $0x4c] sm:$0xf]  ;;  %1922 = vmatprep.subr.bf16.mxu0 %v2078_v0 }
  0xa7   : > { %v964_v39 = vor.u32 %v963_v28, %v960_v27  ;;  %v1813_v36 = vcombine.low %v2668_v49, %v501_v31  ;;  %v590_v40 = vshrl.u32 %v1761_v29, 16  ;;  %v593_v41 = vshll.u32 %v1761_v29, 16  ;;  %1942 = vmatpush3.bf16.msra.mxu1 %v2077_v53  ;;  %v504_v11 = vld [vmem:[#allocation2 + $0x44] sm:$0x1]  ;;  %v458_v23 = vld [vmem:[#allocation2 + $0x50] sm:$0x1] }
  0xa8   : > { %v956_v45 = vor.u32 %v955_v35, %v952_v33  ;;  %v971_v47 = vrot.slane %v969_v38, 5  ;;  %v1762_v48 = vcombine.low %v2712_v42, %v2712_v42  ;;  %v1763_v51 = vcombine.low %v2714_v43, %v2714_v43  ;;  %v2726_v63 = vld [vmem:[#allocation2 + $0x58] sm:$0xf]  ;;  %1938 = vmatprep.subr.bf16.mxu1 %v2078_v0  ;;  %v457_v31 = vld [vmem:[#allocation2 + $0x44] sm:$0x1] }
  0xa9   : > { %815 = vrot.lane.b32.xlu1 %v764_v46, %s2310_s12  ;;  %v968_v46 = vrot.slane %v966_v37, 4  ;;  %v1045_v5 = vrot.slane %v1813_v36, 5  ;;  %v592_v49 = vrot.slane %v590_v40, 4  ;;  %v595_v50 = vrot.slane %v593_v41, 5  ;;  %1923 = vmatpush3.bf16.msra.mxu0 %v2078_v0  ;;  %v2080_v24 = vld [vmem:[#allocation8 + $0x20] ss:$0 sps:$4 sm:$0xff]  }
  0xaa   : > { %865 = vrot.lane.b32.xlu0 %v855_v30, %s2309_s23  ;;  %v502_v30 = vld [vmem:[#allocation2 + $0x2c] sm:$0x1]  ;;  %v598_v57 = vshrl.u32 %v1762_v48, 16  ;;  %v601_v58 = vshll.u32 %v1762_v48, 16  ;;  %v1815_v60 = vcombine.low %v2677_v56, %v503_v52  ;;  %v606_v61 = vshrl.u32 %v1763_v51, 16  ;;  %1924 = vmatprep.subr.bf16.mxu0 %v2079_v2 }
  0xab   : > { %v972_v54 = vor.u32 %v971_v47, %v968_v46  ;;  %v596_v59 = vor.u32 %v595_v50, %v592_v49  ;;  %v609_v62 = vshll.u32 %v1763_v51, 16  ;;  %v1764_v7 = vcombine.low %v2726_v63, %v2726_v63  ;;  %1943 = vmatpush3.bf16.msra.mxu1 %v2078_v0  ;;  %v469_v33 = vld [vmem:[#allocation2 + $0x40] sm:$0xf]  ;;  %v468_v36 = vld [vmem:[#allocation2 + $0x3c] sm:$0x8] }
  0xac   : > { %v600_v20 = vrot.slane %v598_v57, 4  ;;  %v603_v6 = vrot.slane %v601_v58, 5  ;;  %v1047_v56 = vrot.slane %v1815_v60, 5  ;;  %v1816_v13 = vcombine.low %v2699_v17, %v504_v11  ;;  %1939 = vmatprep.subr.bf16.mxu1 %v2079_v2  ;;  %v473_v44 = vld [vmem:[#allocation2 + $0x58] sm:$0xf] }
  0xad   : > { %819 = vrot.lane.b32.xlu1 %v780_v9, %s2310_s12  ;;  %v365_v9 = vld [vmem:[#allocation2 + $0x74] sm:$0x1]  ;;  %v614_v14 = vshrl.u32 %v1764_v7, 16  ;;  %v617_v15 = vshll.u32 %v1764_v7, 16  ;;  %1925 = vmatpush3.bf16.msra.mxu0 %v2079_v2  ;;  %vm1420_vm15 = vcmask 1043456   ;;  %v1771_v29 = vcombine.low %v2714_v43, %v458_v23 }
  0xae   : > { %917 = vrot.lane.b32.xlu0 %v1797_v55, %s2311_s8  ;;  %v1814_v55 = vcombine.low %v2687_v4, %v502_v30  ;;  %v366_v3 = vsel %vm2546_vm5, 0, %v365_v9  ;;  %v604_v12 = vor.u32 %v603_v6, %v600_v20  ;;  %1946 = vmatprep.subr.msk.bf16.mxu0 %vm1420_vm15, %v2080_v24  ;;  %v1422_v17 = vsel %vm1420_vm15, %v2080_v24, 0  ;;  %v471_v49 = vld [vmem:[#allocation2 + $0x4c] sm:$0xf]  ;;  %v470_v53 = vld [vmem:[#allocation2 + $0x48] sm:$0x8] }
  0xaf   : > { %367 = vst [vmem:[#allocation2 + $0x74] sm:$0x1] %v366_v3  ;;  %1944 = vmatpush3.bf16.msra.mxu1 %v2079_v2  ;;  %v616_v26 = vrot.slane %v614_v14, 4  ;;  %v619_v27 = vrot.slane %v617_v15, 5  ;;  %v1770_v35 = vcombine.low %v2712_v42, %v457_v31  ;;  %v1785_v37 = vcombine.low %v469_v33, %v469_v33  ;;  %v475_v58 = vld [vmem:[#allocation2 + $0x64] sm:$0xf] }
  0xb0   : > { %v1046_v4 = vrot.slane %v1814_v55, 5  ;;  %1947 = vmatprep.subr.msk.bf16.mxu1 %vm1420_vm15, %v2080_v24  ;;  %v667_v38 = vrot.slane %v1771_v29, 5  ;;  %v1777_v46 = vcombine.low %v468_v36, %v469_v33  ;;  %v1787_v48 = vcombine.low %v473_v44, %v473_v44  ;;  %v474_v0 = vld [vmem:[#allocation2 + $0x60] sm:$0x8]  ;;  %v480_v20 = vld [vmem:[#allocation2 + $0x44] sm:$0x1] }
  0xb1   : > { %867 = vrot.lane.b32.xlu1 %v856_v8, %s2309_s23  ;;  %v608_v8 = vrot.slane %v606_v61, 4  ;;  %1927 = vmatpush3.bf16.msra.mxu0 %v1422_v17  ;;  %v666_v40 = vrot.slane %v1770_v35, 5  ;;  %v785_v47 = vshll.u32 %v1785_v37, 16  ;;  %v1786_v50 = vcombine.low %v471_v49, %v471_v49  ;;  %v482_v2 = vld [vmem:[#allocation2 + $0x5c] sm:$0x1] }
  0xb2   : > { %921 = vrot.lane.b32.xlu0 %v1799_v10, %s2311_s8  ;;  %v611_v10 = vrot.slane %v609_v62, 5  ;;  %v798_v55 = vshrl.u32 %v1787_v48, 16  ;;  %v801_v57 = vshll.u32 %v1787_v48, 16  ;;  %v1788_v61 = vcombine.low %v475_v58, %v475_v58  ;;  %v497_v35 = vld [vmem:[#allocation2 + $0x60] sm:$0x8] }
  0xb3   : > { %1945 = vmatpush3.bf16.msra.mxu1 %v1422_v17  ;;  %v790_v9 = vshrl.u32 %v1786_v50, 16  ;;  %v793_v60 = vshll.u32 %v1786_v50, 16  ;;  %v1780_v7 = vcombine.low %v474_v0, %v475_v58  ;;  %v496_v36 = vld [vmem:[#allocation2 + $0x58] sm:$0xf]  ;;  %vm1069_vm0 = vcmask 64512  }
  0xb4   : > { %v612_v18 = vor.u32 %v611_v10, %v608_v8  ;;  %v800_v3 = vrot.slane %v798_v55, 4  ;;  %v806_v8 = vshrl.u32 %v1788_v61, 16  ;;  %v809_v10 = vshll.u32 %v1788_v61, 16 }
  0xb5   : > { %919 = vrot.lane.b32.xlu1 %v1798_v19, %s2311_s8  ;;  %v1769_v19 = vcombine.low %v2696_v16, %v456_v1  ;;  %v792_v6 = vrot.slane %v790_v9, 4  ;;  %v1793_v1 = vcombine.low %v469_v33, %v480_v20  ;;  %v498_v33 = vld [vmem:[#allocation2 + $0x64] sm:$0xf]  ;;  %v505_v9 = vld [vmem:[#allocation2 + $0x50] sm:$0x1]  ;;  %vm1094_vm1 = vcmask 130048  }
  0xb6   : > { %1005 = vrot.lane.b32.xlu0 %v948_v25, %s2312_s10  ;;  %v1048_v25 = vrot.slane %v1816_v13, 5  ;;  %v808_v13 = vrot.slane %v806_v8, 4  ;;  %v811_v14 = vrot.slane %v809_v10, 5  ;;  %v507_v20 = vld [vmem:[#allocation2 + $0x68] sm:$0x1]  ;;  %vm1111_vm3 = vcmask 195584  }
  0xb7   : > { %v665_v28 = vrot.slane %v1769_v19, 5  ;;  %v857_v15 = vrot.slane %v1793_v1, 5  ;;  %v481_v19 = vld [vmem:[#allocation2 + $0x50] sm:$0x1]  ;;  %v506_v1 = vld [vmem:[#allocation2 + $0x5c] sm:$0x1] }
  0xb8   : > { %v812_v23 = vor.u32 %v811_v14, %v808_v13  ;;  %v1794_v24 = vcombine.low %v471_v49, %v481_v19  ;;  %v508_v14 = vld [vmem:[#allocation2 + $0x74] sm:$0x1]  ;;  %vm1128_vm4 = vcmask 261120   ;;  %vm1145_vm5 = vcmask 326656  }
  0xb9   : > { %923 = vrot.lane.b32.xlu1 %v1800_v34, %s2311_s8  ;;  %v620_v34 = vor.u32 %v619_v27, %v616_v26  ;;  %v483_v27 = vld [vmem:[#allocation2 + $0x68] sm:$0x1]  ;;  %vm1162_vm6 = vcmask 392192   ;;  %vm1179_vm7 = vcmask 457728   ;;  %vm1196_vm8 = vcmask 523264  }
  0xba   : > { %1009 = vrot.lane.b32.xlu0 %v964_v39, %s2312_s10  ;;  %v459_v39 = vld [vmem:[#allocation2 + $0x5c] sm:$0x1]  ;;  %v858_v29 = vrot.slane %v1794_v24, 5  ;;  %v1796_v31 = vcombine.low %v475_v58, %v483_v27  ;;  %vm1253_vm9 = vsmask.f32 4368 }
  0xbb   : > { %v1772_v41 = vcombine.low %v2726_v63, %v459_v39  ;;  %v1811_v39 = vcombine.low %v498_v33, %v498_v33  ;;  %vm2824_vm10 = vmor %vm357_vm2, %vm1253_vm9  ;;  %vm1407_vm2 = vcmask 588800  }
  0xbd   : > { %1007 = vrot.lane.b32.xlu1 %v956_v45, %s2312_s10  ;;  %v782_v45 = vshrl.u32 %v1785_v37, 16  ;;  %v668_v30 = vrot.slane %v1772_v41, 5  ;;  %v1803_v41 = vcombine.low %v497_v35, %v498_v33  ;;  %v990_v48 = vshrl.u32 %v1811_v39, 16 }
  0xbe   : > { %1053 = vrot.lane.b32.xlu0 %v1045_v5, %s2313_s16  ;;  %v472_v5 = vld [vmem:[#allocation2 + $0x54] sm:$0x8] }
  0xbf   : > { %v784_v51 = vrot.slane %v782_v45, 4  ;;  %v1779_v52 = vcombine.low %v472_v5, %v473_v44  ;;  %v495_v45 = vld [vmem:[#allocation2 + $0x54] sm:$0x8]  ;;  %v993_v5 = vshll.u32 %v1811_v39, 16  ;;  %v992_v55 = vrot.slane %v990_v48, 4 }
  0xc0   : > { %v1802_v50 = vcombine.low %v495_v45, %v496_v36 }
  0xc1   : > { %1011 = vrot.lane.b32.xlu1 %v972_v54, %s2312_s10  ;;  %v787_v54 = vrot.slane %v785_v47, 5 }
  0xc2   : > { %629 = vrot.lane.b32.xlu0 %v596_v59, %s2306_s1  ;;  %v1778_v59 = vcombine.low %v470_v53, %v471_v49  ;;  %v500_v49 = vld [vmem:[#allocation2 + $0x70] sm:$0xf] }
  0xc3   : > { %v788_v62 = vor.u32 %v787_v54, %v784_v51  ;;  %v1812_v53 = vcombine.low %v500_v49, %v500_v49 }
  0xc5   : > { %1055 = vrot.lane.b32.xlu1 %v1046_v4, %s2313_s16  ;;  %v803_v4 = vrot.slane %v801_v57, 5  ;;  %v995_v57 = vrot.slane %v993_v5, 5  ;;  %v1001_v0 = vshll.u32 %v1812_v53, 16  ;;  %v438_v5 = vld [vmem:[#allocation2 + $0xc] sm:$0x8] }
  0xc6   : > { %1057 = vrot.lane.b32.xlu0 %v1047_v56, %s2313_s16  ;;  %v795_v56 = vrot.slane %v793_v60, 5 }
  0xc7   : > { %v804_v11 = vor.u32 %v803_v4, %v800_v3  ;;  %v996_v3 = vor.u32 %v995_v57, %v992_v55  ;;  %v1003_v8 = vrot.slane %v1001_v0, 5 }
  0xc9   : > { %631 = vrot.lane.b32.xlu1 %v604_v12, %s2306_s1  ;;  %v796_v12 = vor.u32 %v795_v56, %v792_v6 }
  0xca   : > { %633 = vrot.lane.b32.xlu0 %v612_v18, %s2306_s1  ;;  %v1795_v18 = vcombine.low %v473_v44, %v482_v2  ;;  %v1810_v44 = vcombine.low %v496_v36, %v496_v36 }
  0xcc   : > { %v859_v26 = vrot.slane %v1795_v18, 5  ;;  %v982_v51 = vshrl.u32 %v1810_v44, 16 }
  0xcd   : > { %1059 = vrot.lane.b32.xlu1 %v1048_v25, %s2313_s16  ;;  %v494_v25 = vld [vmem:[#allocation2 + $0x4c] sm:$0xf] }
  0xce   : > { %677 = vrot.lane.b32.xlu0 %v665_v28, %s2307_s29  ;;  %v1809_v17 = vcombine.low %v494_v25, %v494_v25  ;;  %v493_v28 = vld [vmem:[#allocation2 + $0x48] sm:$0x8]  ;;  %v984_v60 = vrot.slane %v982_v51, 4  ;;  %v1817_v4 = vcombine.low %v494_v25, %v505_v9  ;;  %v1750_v51 = vcombine.low %v438_v5, %v2616_v22 }
  0xd0   : > { %v974_v37 = vshrl.u32 %v1809_v17, 16  ;;  %v1049_v10 = vrot.slane %v1817_v4, 5 }
  0xd1   : > { %635 = vrot.lane.b32.xlu1 %v620_v34, %s2306_s1  ;;  %v1801_v34 = vcombine.low %v493_v28, %v494_v25  ;;  %s2172_s1 = sshll.u32 %s2314_s11, 4  ;;  %s2173_s1 = int_to_ptr.vmem [resolvable:$false] %s2172_s1 }
  0xd2   : > { %681 = vrot.lane.b32.xlu0 %v667_v38, %s2307_s29  ;;  %v977_v38 = vshll.u32 %v1809_v17, 16  ;;  %p2175_p2 = scmp.lt.s32.totalorder %s2896_s26, %s2173_s1 }
  0xd4   : > { %v979_v47 = vrot.slane %v977_v38, 5 }
  0xd5   : > { %679 = vrot.lane.b32.xlu1 %v666_v40, %s2307_s29  ;;  %v860_v40 = vrot.slane %v1796_v31, 5 }
  0xd6   : > { %733 = vrot.lane.b32.xlu0 %v1777_v46, %s2308_s7  ;;  %v976_v46 = vrot.slane %v974_v37, 4 }
  0xd8   : > { %v980_v54 = vor.u32 %v979_v47, %v976_v46 }
  0xd9   : > { %683 = vrot.lane.b32.xlu1 %v668_v30, %s2307_s29  ;;  %v499_v30 = vld [vmem:[#allocation2 + $0x6c] sm:$0x8]  ;;  %s2174_s29 = scalar_lea.vmem %s2173_s1, 1024 }
  0xda   : > { %737 = vrot.lane.b32.xlu0 %v1779_v52, %s2308_s7  ;;  %v985_v52 = vshll.u32 %v1810_v44, 16  ;;  %v2081_v44 = vld [vmem:[#allocation2 + $0x4] sm:$0xf]  ;;  %p2176_p0 = scmp.lt.s32.totalorder %s2174_s29, %s2168_s14 }
  0xdc   : > { %v987_v61 = vrot.slane %v985_v52, 5  ;;  %p2177_p9 = por %p2176_p0, %p2175_p2 }
  0xdd   : > { %735 = vrot.lane.b32.xlu1 %v1778_v59, %s2308_s7  ;;  %v1804_v59 = vcombine.low %v499_v30, %v500_v49 }
  0xde   : > { %821 = vrot.lane.b32.xlu0 %v788_v62, %s2310_s12  ;;  %v998_v62 = vshrl.u32 %v1812_v53, 16  ;;  %p2178_p6 = pnand %p2177_p9, %p2171_p10 }
  0xe0   : > { %v1000_v56 = vrot.slane %v998_v62, 4 }
  0xe1   : > { %739 = vrot.lane.b32.xlu1 %v1780_v7, %s2308_s7  ;;  %v988_v7 = vor.u32 %v987_v61, %v984_v60  ;;  %v442_v61 = vld [vmem:[#allocation2 + $0x24] sm:$0x8] }
  0xe2   : > { %825 = vrot.lane.b32.xlu0 %v804_v11, %s2310_s12  ;;  %v1819_v11 = vcombine.low %v498_v33, %v507_v20  ;;  %v1004_v2 = vor.u32 %v1003_v8, %v1000_v56 }
  0xe4   : > { %v1051_v13 = vrot.slane %v1819_v11, 5 }
  0xe5   : > { %823 = vrot.lane.b32.xlu1 %v796_v12, %s2310_s12  ;;  %v1818_v12 = vcombine.low %v496_v36, %v506_v1 }
  0xe6   : > { %869 = vrot.lane.b32.xlu0 %v857_v15, %s2309_s23 }
  0xe7   : > { %v1050_v19 = vrot.slane %v1818_v12, 5 }
  0xe9   : > { %827 = vrot.lane.b32.xlu1 %v812_v23, %s2310_s12  ;;  %v1820_v23 = vcombine.low %v500_v49, %v508_v14 }
  0xea   : > { %873 = vrot.lane.b32.xlu0 %v859_v26, %s2309_s23 }
  0xeb   : > { %v1052_v26 = vrot.slane %v1820_v23, 5 }
  0xed   : > { %871 = vrot.lane.b32.xlu1 %v858_v29, %s2309_s23 }
  0xee   : > { %925 = vrot.lane.b32.xlu0 %v1801_v34, %s2311_s8 }
  0xf1   : > { %875 = vrot.lane.b32.xlu1 %v860_v40, %s2309_s23  ;;  %v436_v40 = vld [vmem:[#allocation2] sm:$0x8] }
  0xf2   : > { %929 = vrot.lane.b32.xlu0 %v1803_v41, %s2311_s8  ;;  %v1749_v45 = vcombine.low %v436_v40, %v2081_v44 }
  0xf5   : > { %927 = vrot.lane.b32.xlu1 %v1802_v50, %s2311_s8  ;;  %v440_v50 = vld [vmem:[#allocation2 + $0x18] sm:$0x8] }
  0xf6   : > { %1013 = vrot.lane.b32.xlu0 %v980_v54, %s2312_s10  ;;  %v1751_v53 = vcombine.low %v440_v50, %v2614_v21 }
  0xf7   : > { %v622_v58 = vpop.permute.xlu0 %621 }
  0xf8   : > { %v1072_v48 = vsel %vm1069_vm0, %v1749_v45, %v622_v58 }
  0xf9   : > { %931 = vrot.lane.b32.xlu1 %v1804_v59, %s2311_s8 }
  0xfa   : > { %1017 = vrot.lane.b32.xlu0 %v996_v3, %s2312_s10 }
  0xfb   : > { %v670_v6 = vpop.permute.xlu0 %669 }
  0xfc   : > { %v1096_v30 = vsel %vm1094_vm1, %v1072_v48, %v670_v6  ;;  %v1752_v6 = vcombine.low %v442_v61, %v2628_v32 }
  0xfd   : > { %1015 = vrot.lane.b32.xlu1 %v988_v7, %s2312_s10 }
  0xfe   : > { %1061 = vrot.lane.b32.xlu0 %v1049_v10, %s2313_s16 }
  0xff   : > { %v728_v15 = vpop.permute.xlu1 %727 }
 0x100   : > { %v726_v18 = vpop.permute.xlu0 %725 }
 0x101   : > { %1019 = vrot.lane.b32.xlu1 %v1004_v2, %s2312_s10  ;;  %v1113_v55 = vsel %vm1111_vm3, %v1096_v30, %v726_v18 }
 0x102   : > { %1065 = vrot.lane.b32.xlu0 %v1051_v13, %s2313_s16 }
 0x103   : > { %v2771_v24 = vpop.permute.xlu1 %731 }
 0x104   : > { %v730_v25 = vpop.permute.xlu0 %729 }
 0x105   : > { %1063 = vrot.lane.b32.xlu1 %v1050_v19, %s2313_s16 }
 0x107   : > { %v672_v27 = vpop.permute.xlu1 %671 }
 0x108   : > { %v674_v17 = vpop.permute.xlu0 %673 }
 0x109   : > { %1067 = vrot.lane.b32.xlu1 %v1052_v26, %s2313_s16 }
 0x10b   : > { %v2775_v28 = vpop.permute.xlu1 %675 }
 0x10c   : > { %v862_v29 = vpop.permute.xlu0 %861 }
 0x10f   : > { %v864_v31 = vpop.permute.xlu1 %863 }
 0x110   : > { %v624_v33 = vpop.permute.xlu0 %623 }
 0x111   : > { %v1075_v57 = vsel %vm1069_vm0, %v1750_v51, %v624_v33 }
 0x112   : > { %v1098_v22 = vsel %vm1094_vm1, %v1075_v57, %v672_v27 }
 0x113   : > { %v626_v34 = vpop.permute.xlu1 %625  ;;  %v1115_v7 = vsel %vm1111_vm3, %v1098_v22, %v728_v15 }
 0x114   : > { %v814_v35 = vpop.permute.xlu0 %813  ;;  %v1078_v59 = vsel %vm1069_vm0, %v1751_v53, %v626_v34 }
 0x115   : > { %v1130_v58 = vsel %vm1128_vm4, %v1113_v55, %v814_v35  ;;  %v1100_v62 = vsel %vm1094_vm1, %v1078_v59, %v674_v17 }
 0x116   : > { %v1147_v21 = vsel %vm1145_vm5, %v1130_v58, %v862_v29  ;;  %v1117_v8 = vsel %vm1111_vm3, %v1100_v62, %v730_v25 }
 0x117   : > { %v628_v37 = vpop.permute.xlu1 %627 }
 0x118   : > { %v818_v38 = vpop.permute.xlu0 %817  ;;  %v1081_v13 = vsel %vm1069_vm0, %v1752_v6, %v628_v37 }
 0x119   : > { %v1134_v14 = vsel %vm1128_vm4, %v1117_v8, %v818_v38  ;;  %v1102_v27 = vsel %vm1094_vm1, %v1081_v13, %v2775_v28 }
 0x11a   : > { %v1119_v40 = vsel %vm1111_vm3, %v1102_v27, %v2771_v24 }
 0x11b   : > { %v816_v39 = vpop.permute.xlu1 %815 }
 0x11c   : > { %v866_v36 = vpop.permute.xlu0 %865  ;;  %v1132_v10 = vsel %vm1128_vm4, %v1115_v7, %v816_v39 }
 0x11d   : > { %v1149_v18 = vsel %vm1145_vm5, %v1132_v10, %v864_v31  ;;  %v1151_v32 = vsel %vm1145_vm5, %v1134_v14, %v866_v36 }
 0x11f   : > { %v2777_v41 = vpop.permute.xlu1 %819 }
 0x120   : > { %v918_v46 = vpop.permute.xlu0 %917 }
 0x121   : > { %v1164_v0 = vsel %vm1162_vm6, %v1147_v21, %v918_v46  ;;  %v1136_v46 = vsel %vm1128_vm4, %v1119_v40, %v2777_v41  ;;  %v448_v40 = vld [vmem:[#allocation2 + $0x48] sm:$0x8] }
 0x123   : > { %v2779_v47 = vpop.permute.xlu1 %867 }
 0x124   : > { %v922_v49 = vpop.permute.xlu0 %921 }
 0x125   : > { %v1168_v23 = vsel %vm1162_vm6, %v1151_v32, %v922_v49  ;;  %v1153_v49 = vsel %vm1145_vm5, %v1136_v46, %v2779_v47  ;;  %v1755_v46 = vcombine.low %v448_v40, %v2714_v43 }
 0x127   : > { %v920_v52 = vpop.permute.xlu1 %919 }
 0x128   : > { %v1006_v54 = vpop.permute.xlu0 %1005  ;;  %v1166_v15 = vsel %vm1162_vm6, %v1149_v18, %v920_v52 }
 0x129   : > { %v1181_v4 = vsel %vm1179_vm7, %v1164_v0, %v1006_v54 }
 0x12b   : > { %v924_v9 = vpop.permute.xlu1 %923 }
 0x12c   : > { %v1010_v60 = vpop.permute.xlu0 %1009  ;;  %v1170_v52 = vsel %vm1162_vm6, %v1153_v49, %v924_v9 }
 0x12d   : > { %v1185_v17 = vsel %vm1179_vm7, %v1168_v23, %v1010_v60 }
 0x12f   : > { %v1008_v3 = vpop.permute.xlu1 %1007 }
 0x130   : > { %v1054_v20 = vpop.permute.xlu0 %1053  ;;  %v1183_v25 = vsel %vm1179_vm7, %v1166_v15, %v1008_v3 }
 0x131   : > { %v1198_v56 = vsel %vm1196_vm8, %v1181_v4, %v1054_v20 }
 0x132   : > { %v1822_v11 = vcombine.high %v1198_v56, %v1198_v56  ;;  %v1821_v19 = vcombine.low %v1198_v56, %v1198_v56 }
 0x133   : > { %v1012_v1 = vpop.permute.xlu1 %1011 }
 0x134   : > { %v1261_v2 = vshrl.u32 %v1822_v11, 16  ;;  %v2799_v12 = vpop.permute.xlu0 %629  ;;  %v1256_v38 = vshrl.u32 %v1821_v19, 16  ;;  %v1264_v39 = vshll.u32 %v1822_v11, 16  ;;  %v1187_v54 = vsel %vm1179_vm7, %v1170_v52, %v1012_v1 }
 0x136   : > { %v1263_v29 = vrot.slane %v1261_v2, 7  ;;  %v1837_v53 = vrot.slane %v1256_v38, 11  ;;  %v444_v38 = vld [vmem:[#allocation2 + $0x30] sm:$0x8] }
 0x137   : > { %v1056_v26 = vpop.permute.xlu1 %1055 }
 0x138   : > { %v1200_v33 = vsel %vm1196_vm8, %v1183_v25, %v1056_v26  ;;  %v1058_v34 = vpop.permute.xlu0 %1057  ;;  %v1266_v48 = vor.u32 %v1264_v39, %v1263_v29 }
 0x139   : > { %v1823_v31 = vcombine.low %v1200_v33, %v1200_v33  ;;  %v1824_v35 = vcombine.high %v1200_v33, %v1200_v33  ;;  %v1202_v37 = vsel %vm1196_vm8, %v1185_v17, %v1058_v34 }
 0x13a   : > { %v1826_v36 = vcombine.high %v1202_v37, %v1202_v37  ;;  %v1825_v57 = vcombine.low %v1202_v37, %v1202_v37  ;;  %v1267_v60 = vsel %vm2824_vm10, %v1837_v53, %v1266_v48 }
 0x13b   : > { %v1269_v44 = vshrl.u32 %v1823_v31, 16  ;;  %v1274_v45 = vshrl.u32 %v1824_v35, 16  ;;  %v2815_v28 = vpop.permute.xlu1 %631  ;;  %v1277_v30 = vshll.u32 %v1824_v35, 16 }
 0x13c   : > { %v2819_v5 = vpop.permute.xlu0 %633  ;;  %v1287_v24 = vshrl.u32 %v1826_v36, 16  ;;  %v1282_v0 = vshrl.u32 %v1825_v57, 16  ;;  %v1290_v3 = vshll.u32 %v1826_v36, 16 }
 0x13d   : > { %v1276_v50 = vrot.slane %v1274_v45, 7  ;;  %v1838_v41 = vrot.slane %v1269_v44, 11  ;;  %v1753_v44 = vcombine.low %v444_v38, %v2696_v16  ;;  %v1090_v52 = vsel %vm1069_vm0, %v1755_v46, %v2819_v5 }
 0x13e   : > { %v1289_v22 = vrot.slane %v1287_v24, 7  ;;  %v1839_v11 = vrot.slane %v1282_v0, 11 }
 0x13f   : > { %v1279_v55 = vor.u32 %v1277_v30, %v1276_v50  ;;  %v1060_v58 = vpop.permute.xlu1 %1059  ;;  %v1084_v49 = vsel %vm1069_vm0, %v1753_v44, %v2799_v12  ;;  %v446_v50 = vld [vmem:[#allocation2 + $0x3c] sm:$0x8] }
 0x140   : > { %v1204_v59 = vsel %vm1196_vm8, %v1187_v54, %v1060_v58  ;;  %v678_v47 = vpop.permute.xlu0 %677  ;;  %v1292_v56 = vor.u32 %v1290_v3, %v1289_v22  ;;  %v1754_v16 = vcombine.low %v446_v50, %v2712_v42 }
 0x141   : > { %v1827_v61 = vcombine.low %v1204_v59, %v1204_v59  ;;  %v1828_v21 = vcombine.high %v1204_v59, %v1204_v59  ;;  %v1280_v9 = vsel %vm2824_vm10, %v1838_v41, %v1279_v55  ;;  %v1104_v30 = vsel %vm1094_vm1, %v1084_v49, %v678_v47  ;;  %v450_v55 = vld [vmem:[#allocation2 + $0x54] sm:$0x8] }
 0x142   : > { %v1845_v62 = vcombine.low %v1267_v60, %v1280_v9  ;;  %v1293_v18 = vsel %vm2824_vm10, %v1839_v11, %v1292_v56  ;;  %v1087_v42 = vsel %vm1069_vm0, %v1754_v16, %v2815_v28 }
 0x143   : > { %v1295_v4 = vshrl.u32 %v1827_v61, 16  ;;  %v1300_v20 = vshrl.u32 %v1828_v21, 16  ;;  %v2835_v6 = vpop.permute.xlu1 %635  ;;  %v1303_v10 = vshll.u32 %v1828_v21, 16  ;;  %v1756_v61 = vcombine.low %v450_v55, %v2726_v63 }
 0x144   : > { %v682_v7 = vpop.permute.xlu0 %681  ;;  %1928 = vmatprep.mubr.msk.bf16.mxu0 %vm1407_vm2, %v1845_v62 }
 0x145   : > { %v1302_v8 = vrot.slane %v1300_v20, 7  ;;  %v1840_v1 = vrot.slane %v1295_v4, 11  ;;  %v1108_v57 = vsel %vm1094_vm1, %v1090_v52, %v682_v7  ;;  %v1093_v63 = vsel %vm1069_vm0, %v1756_v61, %v2835_v6 }
 0x147   : > { %v1305_v2 = vor.u32 %v1303_v10, %v1302_v8  ;;  %v680_v13 = vpop.permute.xlu1 %679 }
 0x148   : > { %v734_v14 = vpop.permute.xlu0 %733  ;;  %v1106_v62 = vsel %vm1094_vm1, %v1087_v42, %v680_v13 }
 0x149   : > { %v1306_v32 = vsel %vm2824_vm10, %v1840_v1, %v1305_v2  ;;  %v1121_v53 = vsel %vm1111_vm3, %v1104_v30, %v734_v14 }
 0x14a   : > { %v1846_v15 = vcombine.low %v1293_v18, %v1306_v32 }
 0x14b   : > { %v684_v19 = vpop.permute.xlu1 %683 }
 0x14c   : > { %v738_v23 = vpop.permute.xlu0 %737  ;;  %1929 = vmatmul.mubr.msk.bf16.vlgmr.msra.gmra.mrb[0].mxu0 %vm1407_vm2, %v1846_v15  ;;  %v1110_v11 = vsel %vm1094_vm1, %v1093_v63, %v684_v19 }
 0x14d   : > { %v1125_v59 = vsel %vm1111_vm3, %v1108_v57, %v738_v23 }
 0x14f   : > { %v736_v25 = vpop.permute.xlu1 %735 }
 0x150   : > { %v822_v26 = vpop.permute.xlu0 %821  ;;  %v1123_v4 = vsel %vm1111_vm3, %v1106_v62, %v736_v25 }
 0x151   : > { %v1138_v41 = vsel %vm1128_vm4, %v1121_v53, %v822_v26 }
 0x153   : > { %v740_v27 = vpop.permute.xlu1 %739 }
 0x154   : > { %v826_v17 = vpop.permute.xlu0 %825  ;;  %v1127_v18 = vsel %vm1111_vm3, %v1110_v11, %v740_v27 }
 0x155   : > { %v1142_v60 = vsel %vm1128_vm4, %v1125_v59, %v826_v17 }
 0x157   : > { %v824_v29 = vpop.permute.xlu1 %823 }
 0x158   : > { %v870_v33 = vpop.permute.xlu0 %869  ;;  %v1140_v56 = vsel %vm1128_vm4, %v1123_v4, %v824_v29 }
 0x159   : > { %v1155_v43 = vsel %vm1145_vm5, %v1138_v41, %v870_v33 }
 0x15b   : > { %v828_v34 = vpop.permute.xlu1 %827 }
 0x15c   : > { %v874_v31 = vpop.permute.xlu0 %873  ;;  %v1144_v15 = vsel %vm1128_vm4, %v1127_v18, %v828_v34 }
 0x15d   : > { %v1159_v21 = vsel %vm1145_vm5, %v1142_v60, %v874_v31 }
 0x15f   : > { %v872_v35 = vpop.permute.xlu1 %871 }
 0x160   : > { %v926_v37 = vpop.permute.xlu0 %925  ;;  %v1157_v28 = vsel %vm1145_vm5, %v1140_v56, %v872_v35 }
 0x161   : > { %v1172_v12 = vsel %vm1162_vm6, %v1155_v43, %v926_v37 }
 0x163   : > { %v876_v39 = vpop.permute.xlu1 %875 }
 0x164   : > { %v930_v36 = vpop.permute.xlu0 %929  ;;  %v1161_v6 = vsel %vm1145_vm5, %v1144_v15, %v876_v39 }
 0x165   : > { %v1176_v0 = vsel %vm1162_vm6, %v1159_v21, %v930_v36 }
 0x167   : > { %v928_v45 = vpop.permute.xlu1 %927 }
 0x168   : > { %v1014_v48 = vpop.permute.xlu0 %1013  ;;  %v1174_v1 = vsel %vm1162_vm6, %v1157_v28, %v928_v45 }
 0x169   : > { %v1189_v47 = vsel %vm1179_vm7, %v1172_v12, %v1014_v48 }
 0x16b   : > { %v932_v24 = vpop.permute.xlu1 %931 }
 0x16c   : > { %v1018_v54 = vpop.permute.xlu0 %1017  ;;  %v1178_v19 = vsel %vm1162_vm6, %v1161_v6, %v932_v24 }
 0x16d   : > { %v1193_v20 = vsel %vm1179_vm7, %v1176_v0, %v1018_v54 }
 0x16f   : > { %v1016_v58 = vpop.permute.xlu1 %1015 }
 0x170   : > { %v1062_v5 = vpop.permute.xlu0 %1061  ;;  %v1191_v32 = vsel %vm1179_vm7, %v1174_v1, %v1016_v58 }
 0x171   : > { %v1206_v22 = vsel %vm1196_vm8, %v1189_v47, %v1062_v5 }
 0x172   : > { %v1830_v9 = vcombine.high %v1206_v22, %v1206_v22  ;;  %v1829_v2 = vcombine.low %v1206_v22, %v1206_v22 }
 0x173   : > { %v1020_v3 = vpop.permute.xlu1 %1019 }
 0x174   : > { %v1066_v7 = vpop.permute.xlu0 %1065  ;;  %v1313_v10 = vshrl.u32 %v1830_v9, 16  ;;  %v1308_v29 = vshrl.u32 %v1829_v2, 16  ;;  %v1316_v35 = vshll.u32 %v1830_v9, 16  ;;  %v1195_v37 = vsel %vm1179_vm7, %v1178_v19, %v1020_v3 }
 0x175   : > { %v1210_v8 = vsel %vm1196_vm8, %v1193_v20, %v1066_v7 }
 0x176   : > { %v1834_v13 = vcombine.high %v1210_v8, %v1210_v8  ;;  %v1315_v25 = vrot.slane %v1313_v10, 7  ;;  %v1833_v36 = vcombine.low %v1210_v8, %v1210_v8  ;;  %v1841_v49 = vrot.slane %v1308_v29, 11 }
 0x177   : > { %v1064_v14 = vpop.permute.xlu1 %1063 }
 0x178   : > { %v1208_v23 = vsel %vm1196_vm8, %v1191_v32, %v1064_v14  ;;  %v1339_v33 = vshrl.u32 %v1834_v13, 16  ;;  %v1318_v40 = vor.u32 %v1316_v35, %v1315_v25  ;;  %v1334_v24 = vshrl.u32 %v1833_v36, 16 }
 0x179   : > { %v1831_v26 = vcombine.low %v1208_v23, %v1208_v23  ;;  %v1832_v17 = vcombine.high %v1208_v23, %v1208_v23  ;;  %v1342_v52 = vshll.u32 %v1834_v13, 16 }
 0x17a   : > { %v1341_v46 = vrot.slane %v1339_v33, 7  ;;  %v1319_v41 = vsel %vm2824_vm10, %v1841_v49, %v1318_v40  ;;  %v1843_v58 = vrot.slane %v1334_v24, 11 }
 0x17b   : > { %v1068_v31 = vpop.permute.xlu1 %1067  ;;  %v1321_v27 = vshrl.u32 %v1831_v26, 16  ;;  %v1326_v38 = vshrl.u32 %v1832_v17, 16  ;;  %v1329_v45 = vshll.u32 %v1832_v17, 16 }
 0x17c   : > { %v1212_v34 = vsel %vm1196_vm8, %v1195_v37, %v1068_v31  ;;  %v1344_v43 = vor.u32 %v1342_v52, %v1341_v46 }
 0x17d   : > { %v1328_v44 = vrot.slane %v1326_v38, 7  ;;  %v1835_v39 = vcombine.low %v1212_v34, %v1212_v34  ;;  %v1836_v48 = vcombine.high %v1212_v34, %v1212_v34  ;;  %v1842_v50 = vrot.slane %v1321_v27, 11 }
 0x17e   : > { %v1345_v5 = vsel %vm2824_vm10, %v1843_v58, %v1344_v43 }
 0x17f   : > { %v1331_v30 = vor.u32 %v1329_v45, %v1328_v44  ;;  %v1347_v53 = vshrl.u32 %v1835_v39, 16  ;;  %v1352_v54 = vshrl.u32 %v1836_v48, 16  ;;  %v1355_v57 = vshll.u32 %v1836_v48, 16 }
 0x181   : > { %v1332_v16 = vsel %vm2824_vm10, %v1842_v50, %v1331_v30  ;;  %v1354_v55 = vrot.slane %v1352_v54, 7  ;;  %v1844_v59 = vrot.slane %v1347_v53, 11 }
 0x182   : > { %v1847_v12 = vcombine.low %v1319_v41, %v1332_v16 }
 0x183   : > { %v1357_v47 = vor.u32 %v1355_v57, %v1354_v55 }
 0x184   : > { %1932 = vmatprep.mubr.msk.bf16.mxu1 %vm1407_vm2, %v1847_v12 }
 0x185   : > { %v1358_v60 = vsel %vm2824_vm10, %v1844_v59, %v1357_v47 }
 0x186   : > { %v1848_v22 = vcombine.low %v1345_v5, %v1358_v60 }
 0x188   : > { %1933 = vmatmul.mubr.msk.bf16.vlgmr.msra.gmra.mrb[0].mxu1 %vm1407_vm2, %v1848_v22 }
 0x21f   : > { %v1930_v42 = vpop.f32.mrb[0].mxu0 }
 0x220   : > { %v1458_v61 = vpop.f32.mrb[1].mxu0  ;;  %v1521_v7 = vmul.f32 %v1930_v42, %v1930_v42 }
 0x221   : > { %v1931_v21 = vpop.f32.mrb[2].mxu0  ;;  %v1519_v0 = vmul.f32 %v1458_v61, %v1458_v61 }
 0x222   : > { %v1891_v9 = vpack.c.bf16 %v1931_v21, %v1930_v42  ;;  %v1461_v62 = vpop.f32.mrb[3].mxu0  ;;  %v1522_v8 = vmul.f32 %v1931_v21, %v1931_v21 }
 0x223   : > { %v1886_v3 = vpack.c.bf16 %v1461_v62, %v1458_v61  ;;  %v1505_v4 = vadd.f32 %v1461_v62, %v1458_v61  ;;  %v1520_v20 = vmul.f32 %v1461_v62, %v1461_v62 }
 0x224   : > { %1906 = vst [vmem:[%s273_s25 + $0x8] sm:$0xff] %v1891_v9  }
 0x225   : > { %1887 = vst [vmem:[%s273_s25] sm:$0xff] %v1886_v3   ;;  %v1506_v51 = vadd.f32 %v1930_v42, %v1505_v4  ;;  %v1527_v56 = vadd.f32 %v1520_v20, %v1519_v0 }
 0x227   : > { %v1528_v63 = vadd.f32 %v1527_v56, %v1521_v7  ;;  %v1507_v28 = vadd.f32 %v1931_v21, %v1506_v51 }
 0x229   : > { %v1529_v10 = vadd.f32 %v1528_v63, %v1522_v8 }
 0x25b   : > { %v1934_v11 = vpop.f32.mrb[0].mxu1 }
 0x25c   : > { %v1474_v1 = vpop.f32.mrb[1].mxu1  ;;  %v1525_v26 = vmul.f32 %v1934_v11, %v1934_v11 }
 0x25d   : > { %v1508_v2 = vadd.f32 %v1507_v28, %v1474_v1  ;;  %v1523_v13 = vmul.f32 %v1474_v1, %v1474_v1  ;;  %v1935_v14 = vpop.f32.mrb[2].mxu1 }
 0x25e   : > { %v1901_v18 = vpack.c.bf16 %v1935_v14, %v1934_v11  ;;  %v1477_v32 = vpop.f32.mrb[3].mxu1 }
 0x25f   : > { %v1530_v15 = vadd.f32 %v1529_v10, %v1523_v13  ;;  %v1896_v23 = vpack.c.bf16 %v1477_v32, %v1474_v1  ;;  %v1509_v6 = vadd.f32 %v1508_v2, %v1477_v32  ;;  %v1524_v25 = vmul.f32 %v1477_v32, %v1477_v32 }
 0x260   : > { %1908 = vst [vmem:[%s273_s25 + $0x18] sm:$0xff] %v1901_v18  }
 0x261   : > { %1907 = vst [vmem:[%s273_s25 + $0x10] sm:$0xff] %v1896_v23   ;;  %v1510_v17 = vadd.f32 %v1934_v11, %v1509_v6  ;;  %v1531_v19 = vadd.f32 %v1530_v15, %v1524_v25 }
 0x262   : > { %2181 = shalt.err (!%p2178_p6)
}
 0x263   : > { %s2182_s7 = scalar_lea.hbm %s2901_s9, 512  ;;  %s2186_s8 = scalar_lea.hbm %s3020_s3, 1024 }
 0x264   : > { %p2183_p12 = scmp.ne.s32.totalorder %s2901_s9, %s2182_s7  ;;  %p2187_p11 = scmp.lt.u32.totalorder %s2901_s9, %s3020_s3 }
 0x265   : > { %p2188_p7 = scmp.lt.u32.totalorder %s2186_s8, %s2182_s7  ;;  %p2190_p8 = scmp.lt.u32.totalorder %s2182_s7, %s2901_s9 }
 0x266   : > { %p2184_p13 = pnand %p2183_p12, %p3051_p4 }
 0x267   : > { %p2189_p3 = por %p2188_p7, %p2187_p11 }
 0x268   : > { %p2185_p1 = pneg %p2184_p13 }
 0x269   : > { %p2191_p5 = por %p2190_p8, %p2189_p3 }
 0x26b   : > { %p2192_p10 = pnand %p2191_p5, %p2185_p1 }
 0x26d   : > { %2195 = shalt.err (!%p2192_p10)
}
 0x26e   : > { %s2315_s15 = smov 4   ;;  %v1526_v29 = vmul.f32 %v1935_v14, %v1935_v14  ;;  %v1511_v33 = vadd.f32 %v1935_v14, %v1510_v17  ;;  %v1532_v31 = vadd.f32 %v1531_v19, %v1525_v26  ;;  %s1546_s17 = sand.u32 1, %s2369_s22  }
 0x26f   : > { %1958 = dma.vmem_to_hbm [thread:$0]  (%p3051_p4), %s2896_s26, 512, %s2901_s9, %s1542_s13, %s2313_s16, %s2313_s16, %s2315_s15  }
 0x270   : > { %v1512_v35 = vrot.slane %v1511_v33, 4  ;;  %v1533_v37 = vadd.f32 %v1532_v31, %v1526_v29  ;;  %s1861_s28 = sshll.u32 %s2369_s22, 4  ;;  %s279_s14 = scalar_lea.vmem [#allocation10], %s2525_s27 }
 0x271   : > { %s1579_s11 = sshll.u32 %s279_s14, 4  ;;  %s285_s16 = scalar_lea.vmem [#allocation12], %s2525_s27  ;;  %s2940_s11 = int_to_ptr.vmem [resolvable:$true] %s1579_s11 }
 0x272   : > { %v1513_v27 = vadd.f32 %v1512_v35, %v1511_v33  ;;  %v1534_v38 = vrot.slane %v1533_v37, 4  ;;  %s1592_s26 = sshll.u32 %s285_s16, 4  ;;  %s2938_s1 = scalar_lea.hbm %s3021_s4, %s1861_s28  ;;  %s2947_s26 = int_to_ptr.vmem [resolvable:$true] %s1592_s26 }
 0x273   : > { %s2945_s7 = scalar_lea.hbm %s3022_s5, %s1861_s28  ;;  %s2949_s23 = scalar_lea.sflag [#allocation11], %s1546_s17 }
 0x274   : > { %v1514_v36 = vrot.slane %v1513_v27, 2  ;;  %v1535_v34 = vadd.f32 %v1534_v38, %v1533_v37  ;;  %s2196_s12 = scalar_lea.vmem %s2940_s11, 16  ;;  %s2316_s8 = smov [#allocation10]  }
 0x275   : > { %p2197_p2 = scmp.ne.s32.totalorder %s2940_s11, %s2196_s12  ;;  %s2200_s10 = sshll.u32 %s2316_s8, 4  ;;  %s2201_s10 = int_to_ptr.vmem [resolvable:$false] %s2200_s10 }
 0x276   : > { %v1515_v40 = vadd.f32 %v1514_v36, %v1513_v27  ;;  %v1536_v44 = vrot.slane %v1535_v34, 2  ;;  %s2202_s25 = scalar_lea.vmem %s2201_s10, 32  ;;  %p2203_p6 = scmp.lt.s32.totalorder %s2940_s11, %s2201_s10 }
 0x277   : > { %p2198_p0 = pnand %p2197_p2, %p3051_p4  ;;  %p2204_p12 = scmp.lt.s32.totalorder %s2202_s25, %s2196_s12 }
 0x278   : > { %v1516_v45 = vrot.slane %v1515_v40, 1  ;;  %v1537_v39 = vadd.f32 %v1536_v44, %v1535_v34 }
 0x279   : > { %p2199_p9 = pneg %p2198_p0  ;;  %p2205_p13 = por %p2204_p12, %p2203_p6 }
 0x27a   : > { %v1538_v46 = vrot.slane %v1537_v39, 1  ;;  %v1517_v48 = vadd.f32 %v1516_v45, %v1515_v40 }
 0x27b   : > { %p2206_p1 = pnand %p2205_p13, %p2199_p9 }
 0x27c   : > { %1518 = vst [vmem:[%s279_s14] sm:$0x1] %v1517_v48  ;;  %v1539_v49 = vadd.f32 %v1538_v46, %v1537_v39 }
 0x27d   : > { %2209 = shalt.err (!%p2206_p1)
}
 0x27e   : > { %s2210_s15 = scalar_lea.hbm %s2938_s1, 16  ;;  %s2214_s14 = scalar_lea.hbm %s3021_s4, 32 }
 0x27f   : > { %p2211_p11 = scmp.ne.s32.totalorder %s2938_s1, %s2210_s15  ;;  %p2215_p8 = scmp.lt.u32.totalorder %s2938_s1, %s3021_s4 }
 0x280   : > { %p2216_p5 = scmp.lt.u32.totalorder %s2214_s14, %s2210_s15  ;;  %p2218_p2 = scmp.lt.u32.totalorder %s2210_s15, %s2938_s1 }
 0x281   : > { %p2212_p7 = pnand %p2211_p11, %p3051_p4 }
 0x282   : > { %p2217_p10 = por %p2216_p5, %p2215_p8 }
 0x283   : > { %p2213_p3 = pneg %p2212_p7 }
 0x284   : > { %p2219_p0 = por %p2218_p2, %p2217_p10 }
 0x286   : > { %p2220_p9 = pnand %p2219_p0, %p2213_p3 }
 0x288   : > { %2223 = shalt.err (!%p2220_p9)
}
 0x289   : > { %1959 = dma.vmem_to_hbm [thread:$0]  (%p3051_p4), %s2940_s11, 16, %s2938_s1, %s2949_s23   ;;  %1540 = vst [vmem:[%s285_s16] sm:$0x1] %v1539_v49 }
 0x28a   : > { %s2224_s22 = scalar_lea.vmem %s2947_s26, 16  ;;  %s2317_s29 = smov [#allocation12]  }
 0x28b   : > { %p2225_p6 = scmp.ne.s32.totalorder %s2947_s26, %s2224_s22  ;;  %s2228_s12 = sshll.u32 %s2317_s29, 4  ;;  %s2229_s12 = int_to_ptr.vmem [resolvable:$false] %s2228_s12 }
 0x28c   : > { %s2230_s8 = scalar_lea.vmem %s2229_s12, 32  ;;  %p2231_p1 = scmp.lt.s32.totalorder %s2947_s26, %s2229_s12 }
 0x28d   : > { %p2226_p12 = pnand %p2225_p6, %p3051_p4  ;;  %p2232_p11 = scmp.lt.s32.totalorder %s2230_s8, %s2224_s22 }
 0x28f   : > { %p2227_p13 = pneg %p2226_p12  ;;  %p2233_p7 = por %p2232_p11, %p2231_p1 }
 0x291   : > { %p2234_p3 = pnand %p2233_p7, %p2227_p13 }
 0x293   : > { %2237 = shalt.err (!%p2234_p3)
}
 0x294   : > { %s2238_s27 = scalar_lea.hbm %s2945_s7, 16  ;;  %s2242_s1 = scalar_lea.hbm %s3022_s5, 32 }
 0x295   : > { %p2239_p8 = scmp.ne.s32.totalorder %s2945_s7, %s2238_s27  ;;  %p2243_p2 = scmp.lt.u32.totalorder %s2945_s7, %s3022_s5 }
 0x296   : > { %p2244_p0 = scmp.lt.u32.totalorder %s2242_s1, %s2238_s27  ;;  %p2246_p6 = scmp.lt.u32.totalorder %s2238_s27, %s2945_s7 }
 0x297   : > { %p2240_p5 = pnand %p2239_p8, %p3051_p4 }
 0x298   : > { %p2245_p9 = por %p2244_p0, %p2243_p2 }
 0x299   : > { %p2241_p10 = pneg %p2240_p5 }
 0x29a   : > { %p2247_p12 = por %p2246_p6, %p2245_p9 }
 0x29c   : > { %p2248_p13 = pnand %p2247_p12, %p2241_p10 }
 0x29e   : > { %2251 = shalt.err (!%p2248_p13)
}
 0x29f   : > { %1960 = dma.vmem_to_hbm [thread:$0]  (%p3051_p4), %s2947_s26, 16, %s2945_s7, %s2949_s23  }
 0x2a0 PF: > { %s1604_s15 = sand.u32 1, %s2286_s18   ;;  %p3052_p1 = scmp.ne.s32.totalorder %s3034_s6, 0 }
 0x2a1   : > { %p3053_p11 = scmp.ge.s32.totalorder %s2298_s21, 2  ;;  %s1605_s17 = scalar_lea.sflag [#allocation5], %s1604_s15 }
 0x2a3   : > { %p1976_p7 = pnand %p3053_p11, %p3052_p1 }
 0x2a5   : > { %2277 = dma.done.wait (!%p1976_p7), %s1605_s17, 512  }
 0x2a6   : > { %2279 = vsyncadd (!%p1976_p7), %s1605_s17, 4294966784  ;;  %s3054_s28 = sadd.s32 4294967294, %s2298_s21  }
 0x2a7   : > { %s1613_s14 = sand.u32 1, %s3054_s28  }
 0x2a8   : > { %s1614_s9 = scalar_lea.sflag [#allocation11], %s1613_s14 }
 0x2a9   : > { %2281 = dma.done.wait (!%p1976_p7), %s1614_s9, 32  }
 0x2aa   : > { %2283 = vsyncadd (!%p1976_p7), %s1614_s9, 4294967264  ;;  %s3055_s30 = sld [smem:[#allocation17_spill]]  ;;  %p23_p4 = scmp.ge.s32.totalorder %s2373_s24, 4  }
 0x2ab   : > { %s3056_s18 = smov %s2290_s19  ;;  %s3057_s19 = smov %s2294_s20 }
 0x2ac   : > { %s3059_s21 = smov %s2373_s24  ;;  %25 = sbr.rel (!%p23_p4) target bundleno = 10 (0xa), region = 120 }
 0x2b0   : > { %s3058_s20 = smov %s3055_s30 }
 0x2b3   :  { %1626 = vsyncpa [#allocation4], 1 }
 0x2b4   :  { %1628 = vsyncpa [#allocation4 + $0x1], 1 }
 0x2b5   :  { %1629 = vsyncpa [#allocation7], 1 }
 0x2b6   :  { %1630 = vsyncpa [#allocation5], 1 }
 0x2b7   :  { %1632 = vsyncpa [#allocation5 + $0x1], 1 }
 0x2b8   :  { %1633 = vsyncpa [#allocation11], 1 }
 0x2b9   :  { %1635 = vsyncpa [#allocation11 + $0x1], 1 }

</bundles_post_ra>
